<compile_context>
chip_gen: v5e
topology: v5e:2x2
jax: 0.10.0
libtpu: 0.0.40
codegen_flags: <defaults>
</compile_context>

<pallas_src>
import jax
import jax.numpy as jnp
from jax import lax
from jax.experimental import pallas as pl
from jax.experimental.pallas import tpu as pltpu


# ------------------------- fused Pallas kernel ----------------------------- #
def _upblock_kernel(alpha_ref,                       # SMEM (3,) PReLU slopes
                    x_ref,                           # (1, H, W, C)      f32
                    w1_ref, b1_ref,                  # (9C, 16C) bf16, (1, 16C) f32
                    w2_ref, b2_ref,                  # (9*16C, C) bf16, (1, C) f32
                    w3_ref, b3_ref,                  # (9C, 16C) bf16, (1, 16C) f32
                    o_ref,                           # (1, H, W, 16C)    f32
                    xpad_ref,                        # (H+2, Wp, C)   f32 scratch
                    h0pad_ref,                       # (H+2, Wp, 16C) f32 scratch
                    psml_ref,                        # (M, 9C)    bf16 im2col scratch
                    pbig_ref):                       # (M, 9*16C) bf16 im2col scratch
    _, H, W, C = x_ref.shape
    P = o_ref.shape[-1]                              # 16*C (phase-major, lane-dense)
    M = H * W
    Wp = xpad_ref.shape[1]                           # sublane-aligned padded width

    # Zero ONLY the halo strips actually read as padding (2 rows + 2 cols).
    # Interiors are fully rewritten every grid step.  Done every step (cheap)
    # rather than once under pl.when(id==0), so per-core scratch stays valid
    # when the "parallel" grid axis is sharded across TensorCores.
    xpad_ref[0:1, :, :] = jnp.zeros((1, Wp, C), jnp.float32)
    xpad_ref[H + 1:H + 2, :, :] = jnp.zeros((1, Wp, C), jnp.float32)
    xpad_ref[:, 0:1, :] = jnp.zeros((H + 2, 1, C), jnp.float32)
    xpad_ref[:, W + 1:W + 2, :] = jnp.zeros((H + 2, 1, C), jnp.float32)
    h0pad_ref[0:1, :, :] = jnp.zeros((1, Wp, P), jnp.float32)
    h0pad_ref[H + 1:H + 2, :, :] = jnp.zeros((1, Wp, P), jnp.float32)
    h0pad_ref[:, 0:1, :] = jnp.zeros((H + 2, 1, P), jnp.float32)
    h0pad_ref[:, W + 1:W + 2, :] = jnp.zeros((H + 2, 1, P), jnp.float32)

    xpad_ref[1:H + 1, 1:W + 1, :] = x_ref[0]

    def stage(src_ref, patch_ref, w_ref, b_ref, alpha):
        """im2col over the 3x3 low-res taps into a bf16 patch, then ONE fused
        GEMM (M, 9*fin) @ (9*fin, fout) on the MXU, + bias, PReLU (all f32)."""
        fin = src_ref.shape[-1]
        for p in range(3):                           # unrolled at trace time
            for q in range(3):
                t = 3 * p + q
                tap = src_ref[p:p + H, q:q + W, :].reshape(M, fin)
                patch_ref[:, t * fin:(t + 1) * fin] = tap.astype(jnp.bfloat16)
        acc = jnp.dot(patch_ref[...], w_ref[...],
                      preferred_element_type=jnp.float32)
        acc = acc + b_ref[...]
        return jnp.where(acc >= 0, acc, alpha * acc)

    # up_conv1: deconv(x) in phase space -> h0 (M, 16C); park it in h0pad.
    h0 = stage(xpad_ref, psml_ref, w1_ref, b1_ref, alpha_ref[0])
    h0pad_ref[1:H + 1, 1:W + 1, :] = h0.reshape(H, W, P)
    # (h0 value is dead from here on; the final residual re-reads h0pad.)

    # up_conv2: stride-4 conv over h0, expressed in phase space -> l0 (M, C).
    l0 = stage(h0pad_ref, pbig_ref, w2_ref, b2_ref, alpha_ref[1])

    # fused residual: d = l0 - x (exact f32 x), reusing the xpad scratch.
    d = l0 - xpad_ref[1:H + 1, 1:W + 1, :].reshape(M, C)
    xpad_ref[1:H + 1, 1:W + 1, :] = d.reshape(H, W, C)

    # up_conv3: deconv(l0 - x) -> h1; final residual re-reads h0 from VMEM.
    h1 = stage(xpad_ref, psml_ref, w3_ref, b3_ref, alpha_ref[2])
    o_ref[0] = h1.reshape(H, W, P) + h0pad_ref[1:H + 1, 1:W + 1, :]


# --------------------- phase-space weight construction --------------------- #
def _phase_weights_deconv(w, s, pad):
    """ConvTranspose2d weight (Cin, Cout, K, K) -> (9, Cin, s*s*Cout).
    Tap (p,q) indexes the 3x3 low-res input window; output column order is
    (rh, rw, cout).  kh = s*(1-p) + rh + pad (taps outside [0,K) are zeroed)."""
    Cin, Cout, K, _ = w.shape
    p = jnp.arange(3)
    r = jnp.arange(s)
    k = s * (1 - p)[:, None] + r[None, :] + pad            # (3, s)
    valid = (k >= 0) & (k < K)
    kc = jnp.clip(k, 0, K - 1)
    wg = w[:, :, kc, :][:, :, :, :, kc]                    # (ci, co, p, rh, q, rw)
    m = (valid[:, :, None, None] & valid[None, None, :, :]).astype(w.dtype)
    wg = wg * m[None, None]
    wg = jnp.transpose(wg, (2, 4, 0, 3, 5, 1))             # (p, q, ci, rh, rw, co)
    return wg.reshape(9, Cin, s * s * Cout)


def _phase_weights_conv(w, s, pad):
    """Conv2d weight (Cout, Cin, K, K) -> (9, s*s*Cin, Cout).
    Consumes the phase-space h0 (feature order (rh, rw, cin)); tap (p,q) indexes
    the 3x3 low-res window.  kh = s*(p-1) + rh + pad (invalid taps zeroed)."""
    Cout, Cin, K, _ = w.shape
    p = jnp.arange(3)
    r = jnp.arange(s)
    k = s * (p - 1)[:, None] + r[None, :] + pad            # (3, s)
    valid = (k >= 0) & (k < K)
    kc = jnp.clip(k, 0, K - 1)
    wg = w[:, :, kc, :][:, :, :, :, kc]                    # (co, ci, p, rh, q, rw)
    m = (valid[:, :, None, None] & valid[None, None, :, :]).astype(w.dtype)
    wg = wg * m[None, None]
    wg = jnp.transpose(wg, (2, 4, 3, 5, 1, 0))             # (p, q, rh, rw, ci, co)
    return wg.reshape(9, s * s * Cin, Cout)


def _phase_bias(b, s):
    return jnp.broadcast_to(b, (s, s, b.shape[0])).reshape(1, -1).astype(jnp.float32)


# ------------------------------- wrapper ----------------------------------- #
def up_block(x_nchw, params, K=8, stride=4, pad=2):
    """UpBlock forward. x: NCHW float32; returns NCHW (N, C, s*H, s*W)."""
    s = stride
    assert K == 2 * s and pad == s // 2, "phase decomposition assumes k=2s, p=s/2"
    N, C, H, W = x_nchw.shape
    P = s * s * C                       # lane-dense (==128) when C % 8 == 0
    Wp = ((W + 2 + 7) // 8) * 8         # sublane-aligned padded scratch width

    x = jnp.transpose(x_nchw, (0, 2, 3, 1)).astype(jnp.float32)       # NHWC

    # Phase weights pre-reshaped for the fused GEMM, cast to bf16 (MXU-native).
    w1p = _phase_weights_deconv(params['w1'], s, pad).reshape(9 * C, P).astype(jnp.bfloat16)
    w2p = _phase_weights_conv(params['w2'], s, pad).reshape(9 * P, C).astype(jnp.bfloat16)
    w3p = _phase_weights_deconv(params['w3'], s, pad).reshape(9 * C, P).astype(jnp.bfloat16)
    b1p = _phase_bias(params['b1'], s)
    b2r = params['b2'].reshape(1, C).astype(jnp.float32)
    b3p = _phase_bias(params['b3'], s)
    alphas = jnp.stack([params['a1'], params['a2'], params['a3']]).astype(jnp.float32)

    out_phase = pl.pallas_call(
        _upblock_kernel,
        out_shape=jax.ShapeDtypeStruct((N, H, W, P), jnp.float32),
        grid=(N,),
        in_specs=[
            pl.BlockSpec(memory_space=pltpu.MemorySpace.SMEM),        # PReLU slopes
            pl.BlockSpec((1, H, W, C), lambda n: (n, 0, 0, 0)),       # x (NHWC)
            pl.BlockSpec((9 * C, P), lambda n: (0, 0)),               # deconv1 W (bf16)
            pl.BlockSpec((1, P), lambda n: (0, 0)),                   # deconv1 b
            pl.BlockSpec((9 * P, C), lambda n: (0, 0)),               # conv2 W (bf16)
            pl.BlockSpec((1, C), lambda n: (0, 0)),                   # conv2 b
            pl.BlockSpec((9 * C, P), lambda n: (0, 0)),               # deconv3 W (bf16)
            pl.BlockSpec((1, P), lambda n: (0, 0)),                   # deconv3 b
        ],
        out_specs=pl.BlockSpec((1, H, W, P), lambda n: (n, 0, 0, 0)),
        scratch_shapes=[
            pltpu.VMEM((H + 2, Wp, C), jnp.float32),     # x / (l0 - x), halo pad
            pltpu.VMEM((H + 2, Wp, P), jnp.float32),     # h0 phase, halo pad
            pltpu.VMEM((H * W, 9 * C), jnp.bfloat16),    # im2col patch (stages 1/3)
            pltpu.VMEM((H * W, 9 * P), jnp.bfloat16),    # im2col patch (stage 2)
        ],
        # At production RBPN sizes on v7x: add an H row-tile grid axis (halo=1),
        # Buffered(1) on the constant weight blocks, bf16 h0pad/output, and an
        # explicit vmem_limit_bytes.  Not needed at these toy shapes.
        compiler_params=pltpu.CompilerParams(
            dimension_semantics=("parallel",)),          # 2-TC split on v7x
    )(alphas, x, w1p, b1p, w2p, b2r, w3p, b3p)

    # depth-to-space of the lane-dense phase output, then NHWC -> NCHW (once).
    out = out_phase.reshape(N, H, W, s, s, C)
    out = jnp.transpose(out, (0, 1, 3, 2, 4, 5)).reshape(N, s * H, s * W, C)
    return jnp.transpose(out, (0, 3, 1, 2))


# ---------------------- pure-JAX reference (sanity) ------------------------ #
def _prelu(x, a):
    return jnp.where(x >= 0, x, a * x)


def _bf(v):
    return v.astype(jnp.bfloat16).astype(jnp.float32)


def up_block_ref(x, p, K=8, s=4, pad=2):
    """Mirrors the kernel numerics: conv operands (inputs + weights) rounded to
    bf16, accumulation / bias / PReLU / residuals in f32."""
    dn = ('NCHW', 'OIHW', 'NCHW')

    def deconv(x, w, b):
        wc = jnp.transpose(w, (1, 0, 2, 3))[:, :, ::-1, ::-1]
        y = lax.conv_general_dilated(_bf(x), _bf(wc), (1, 1),
                                     [(K - 1 - pad, K - 1 - pad)] * 2,
                                     lhs_dilation=(s, s),
                                     dimension_numbers=dn,
                                     preferred_element_type=jnp.float32)
        return y + b[None, :, None, None]

    def conv(x, w, b):
        y = lax.conv_general_dilated(_bf(x), _bf(w), (s, s), [(pad, pad)] * 2,
                                     dimension_numbers=dn,
                                     preferred_element_type=jnp.float32)
        return y + b[None, :, None, None]

    h0 = _prelu(deconv(x, p['w1'], p['b1']), p['a1'])
    l0 = _prelu(conv(h0, p['w2'], p['b2']), p['a2'])
    h1 = _prelu(deconv(l0 - x, p['w3'], p['b3']), p['a3'])
    return h1 + h0


# ----------------------------------- main ----------------------------------- #
if __name__ == "__main__":
    N, C, H, W = 2, 8, 8, 8        # num_filter=8 -> phase dim 16*C = 128 lanes
    K, S, PD = 8, 4, 2
    ks = jax.random.split(jax.random.PRNGKey(0), 8)
    x = jax.random.normal(ks[0], (N, C, H, W), jnp.float32)
    params = dict(
        # ConvTranspose2d weights: (Cin, Cout, K, K); Conv2d: (Cout, Cin, K, K)
        w1=jax.random.normal(ks[1], (C, C, K, K), jnp.float32) * 0.05,
        b1=jax.random.normal(ks[2], (C,), jnp.float32) * 0.05,
        a1=jnp.float32(0.25),                      # PReLU default init
        w2=jax.random.normal(ks[3], (C, C, K, K), jnp.float32) * 0.05,
        b2=jax.random.normal(ks[4], (C,), jnp.float32) * 0.05,
        a2=jnp.float32(0.25),
        w3=jax.random.normal(ks[5], (C, C, K, K), jnp.float32) * 0.05,
        b3=jax.random.normal(ks[6], (C,), jnp.float32) * 0.05,
        a3=jnp.float32(0.25),
    )

    out = jax.block_until_ready(jax.jit(up_block)(x, params))
    assert out.shape == (N, C, S * H, S * W), out.shape

    ref = up_block_ref(x, params)
    err = float(jnp.max(jnp.abs(out - ref)))
    # bf16 MXU operands -> tolerance loosened vs the old pure-f32 check.
    assert jnp.allclose(out, ref, atol=5e-3, rtol=5e-3), f"max abs err {err}"

    print("KERNEL_OK")
</pallas_src>

<mosaic_0001>
module attributes {stable_mosaic.version = 11 : i64} {
  func.func @_upblock_kernel(%arg0: i32, %arg1: memref<3xf32, #tpu.memory_space<smem>>, %arg2: memref<1x8x8x8xf32, #tpu.memory_space<vmem>>, %arg3: memref<72x128xbf16, #tpu.memory_space<vmem>>, %arg4: memref<1x128xf32, #tpu.memory_space<vmem>>, %arg5: memref<1152x8xbf16, #tpu.memory_space<vmem>>, %arg6: memref<1x8xf32, #tpu.memory_space<vmem>>, %arg7: memref<72x128xbf16, #tpu.memory_space<vmem>>, %arg8: memref<1x128xf32, #tpu.memory_space<vmem>>, %arg9: memref<1x8x8x128xf32, #tpu.memory_space<vmem>>, %arg10: memref<10x16x8xf32, #tpu.memory_space<vmem>>, %arg11: memref<10x16x128xf32, #tpu.memory_space<vmem>>, %arg12: memref<64x72xbf16, #tpu.memory_space<vmem>>, %arg13: memref<64x1152xbf16, #tpu.memory_space<vmem>>) attributes {dimension_semantics = [#tpu.dimension_semantics<parallel>], iteration_bounds = array<i64: 2>, scalar_prefetch = 0 : i64, scratch_operands = 4 : i64, tpu.core_type = #tpu.core_type<tc>, window_params = [{transform_indices = @transform_0, window_bounds = array<i64: 3>}, {transform_indices = @transform_1, window_bounds = array<i64: 1, 8, 8, 8>}, {pipeline_mode = #tpu.pipeline_mode<synchronous>, transform_indices = @transform_2, window_bounds = array<i64: 72, 128>}, {pipeline_mode = #tpu.pipeline_mode<synchronous>, transform_indices = @transform_3, window_bounds = array<i64: 1, 128>}, {pipeline_mode = #tpu.pipeline_mode<synchronous>, transform_indices = @transform_4, window_bounds = array<i64: 1152, 8>}, {pipeline_mode = #tpu.pipeline_mode<synchronous>, transform_indices = @transform_5, window_bounds = array<i64: 1, 8>}, {pipeline_mode = #tpu.pipeline_mode<synchronous>, transform_indices = @transform_6, window_bounds = array<i64: 72, 128>}, {pipeline_mode = #tpu.pipeline_mode<synchronous>, transform_indices = @transform_7, window_bounds = array<i64: 1, 128>}, {transform_indices = @transform_8, window_bounds = array<i64: 1, 8, 8, 128>}]} {
    %cst = arith.constant 0.000000e+00 : f32
    %0 = vector.broadcast %cst : f32 to vector<1x16x8xf32>
    %c0 = arith.constant 0 : index
    %c0_0 = arith.constant 0 : index
    %c0_1 = arith.constant 0 : index
    %1 = vector.load %arg10[%c0, %c0_0, %c0_1] : memref<10x16x8xf32, #tpu.memory_space<vmem>>, vector<1x16x8xf32>
    tpu.vector_store %arg10[%c0, %c0_0, %c0_1], %0 {strides = array<i32>} : memref<10x16x8xf32, #tpu.memory_space<vmem>>, vector<1x16x8xf32>,
    %cst_2 = arith.constant 0.000000e+00 : f32
    %2 = vector.broadcast %cst_2 : f32 to vector<1x16x8xf32>
    %c9 = arith.constant 9 : index
    %c0_3 = arith.constant 0 : index
    %c0_4 = arith.constant 0 : index
    %3 = vector.load %arg10[%c9, %c0_3, %c0_4] : memref<10x16x8xf32, #tpu.memory_space<vmem>>, vector<1x16x8xf32>
    tpu.vector_store %arg10[%c9, %c0_3, %c0_4], %2 {strides = array<i32>} : memref<10x16x8xf32, #tpu.memory_space<vmem>>, vector<1x16x8xf32>,
    %cst_5 = arith.constant 0.000000e+00 : f32
    %4 = vector.broadcast %cst_5 : f32 to vector<10x1x8xf32>
    %c0_6 = arith.constant 0 : index
    %c0_7 = arith.constant 0 : index
    %c0_8 = arith.constant 0 : index
    %5 = vector.load %arg10[%c0_6, %c0_7, %c0_8] : memref<10x16x8xf32, #tpu.memory_space<vmem>>, vector<10x1x8xf32>
    tpu.vector_store %arg10[%c0_6, %c0_7, %c0_8], %4 {strides = array<i32>} : memref<10x16x8xf32, #tpu.memory_space<vmem>>, vector<10x1x8xf32>,
    %cst_9 = arith.constant 0.000000e+00 : f32
    %6 = vector.broadcast %cst_9 : f32 to vector<10x1x8xf32>
    %c0_10 = arith.constant 0 : index
    %c9_11 = arith.constant 9 : index
    %c0_12 = arith.constant 0 : index
    %7 = vector.load %arg10[%c0_10, %c9_11, %c0_12] : memref<10x16x8xf32, #tpu.memory_space<vmem>>, vector<10x1x8xf32>
    tpu.vector_store %arg10[%c0_10, %c9_11, %c0_12], %6 {strides = array<i32>} : memref<10x16x8xf32, #tpu.memory_space<vmem>>, vector<10x1x8xf32>,
    %cst_13 = arith.constant 0.000000e+00 : f32
    %8 = vector.broadcast %cst_13 : f32 to vector<1x16x128xf32>
    %c0_14 = arith.constant 0 : index
    %c0_15 = arith.constant 0 : index
    %c0_16 = arith.constant 0 : index
    %9 = vector.load %arg11[%c0_14, %c0_15, %c0_16] : memref<10x16x128xf32, #tpu.memory_space<vmem>>, vector<1x16x128xf32>
    tpu.vector_store %arg11[%c0_14, %c0_15, %c0_16], %8 {strides = array<i32>} : memref<10x16x128xf32, #tpu.memory_space<vmem>>, vector<1x16x128xf32>,
    %cst_17 = arith.constant 0.000000e+00 : f32
    %10 = vector.broadcast %cst_17 : f32 to vector<1x16x128xf32>
    %c9_18 = arith.constant 9 : index
    %c0_19 = arith.constant 0 : index
    %c0_20 = arith.constant 0 : index
    %11 = vector.load %arg11[%c9_18, %c0_19, %c0_20] : memref<10x16x128xf32, #tpu.memory_space<vmem>>, vector<1x16x128xf32>
    tpu.vector_store %arg11[%c9_18, %c0_19, %c0_20], %10 {strides = array<i32>} : memref<10x16x128xf32, #tpu.memory_space<vmem>>, vector<1x16x128xf32>,
    %cst_21 = arith.constant 0.000000e+00 : f32
    %12 = vector.broadcast %cst_21 : f32 to vector<10x1x128xf32>
    %c0_22 = arith.constant 0 : index
    %c0_23 = arith.constant 0 : index
    %c0_24 = arith.constant 0 : index
    %13 = vector.load %arg11[%c0_22, %c0_23, %c0_24] : memref<10x16x128xf32, #tpu.memory_space<vmem>>, vector<10x1x128xf32>
    tpu.vector_store %arg11[%c0_22, %c0_23, %c0_24], %12 {strides = array<i32>} : memref<10x16x128xf32, #tpu.memory_space<vmem>>, vector<10x1x128xf32>,
    %cst_25 = arith.constant 0.000000e+00 : f32
    %14 = vector.broadcast %cst_25 : f32 to vector<10x1x128xf32>
    %c0_26 = arith.constant 0 : index
    %c9_27 = arith.constant 9 : index
    %c0_28 = arith.constant 0 : index
    %15 = vector.load %arg11[%c0_26, %c9_27, %c0_28] : memref<10x16x128xf32, #tpu.memory_space<vmem>>, vector<10x1x128xf32>
    tpu.vector_store %arg11[%c0_26, %c9_27, %c0_28], %14 {strides = array<i32>} : memref<10x16x128xf32, #tpu.memory_space<vmem>>, vector<10x1x128xf32>,
    %c0_29 = arith.constant 0 : index
    %c0_30 = arith.constant 0 : index
    %c0_31 = arith.constant 0 : index
    %c0_32 = arith.constant 0 : index
    %16 = vector.load %arg2[%c0_29, %c0_30, %c0_31, %c0_32] : memref<1x8x8x8xf32, #tpu.memory_space<vmem>>, vector<1x8x8x8xf32>
    %17 = vector.shape_cast %16 : vector<1x8x8x8xf32> to vector<8x8x8xf32>
    %c1 = arith.constant 1 : index
    %c1_33 = arith.constant 1 : index
    %c0_34 = arith.constant 0 : index
    %18 = vector.load %arg10[%c1, %c1_33, %c0_34] : memref<10x16x8xf32, #tpu.memory_space<vmem>>, vector<8x8x8xf32>
    tpu.vector_store %arg10[%c1, %c1_33, %c0_34], %17 {strides = array<i32>} : memref<10x16x8xf32, #tpu.memory_space<vmem>>, vector<8x8x8xf32>,
    %c0_35 = arith.constant 0 : index
    %19 = memref.load %arg1[%c0_35] : memref<3xf32, #tpu.memory_space<smem>>
    %c0_36 = arith.constant 0 : index
    %c0_37 = arith.constant 0 : index
    %c0_38 = arith.constant 0 : index
    %20 = vector.load %arg10[%c0_36, %c0_37, %c0_38] : memref<10x16x8xf32, #tpu.memory_space<vmem>>, vector<8x8x8xf32>
    %21 = vector.shape_cast %20 : vector<8x8x8xf32> to vector<64x8xf32>
    %22 = arith.truncf %21 : vector<64x8xf32> to vector<64x8xbf16>
    %c0_39 = arith.constant 0 : index
    %c0_40 = arith.constant 0 : index
    %23 = vector.load %arg12[%c0_39, %c0_40] : memref<64x72xbf16, #tpu.memory_space<vmem>>, vector<64x8xbf16>
    tpu.vector_store %arg12[%c0_39, %c0_40], %22 {strides = array<i32>} : memref<64x72xbf16, #tpu.memory_space<vmem>>, vector<64x8xbf16>,
    %c0_41 = arith.constant 0 : index
    %c1_42 = arith.constant 1 : index
    %c0_43 = arith.constant 0 : index
    %24 = vector.load %arg10[%c0_41, %c1_42, %c0_43] : memref<10x16x8xf32, #tpu.memory_space<vmem>>, vector<8x8x8xf32>
    %25 = vector.shape_cast %24 : vector<8x8x8xf32> to vector<64x8xf32>
    %26 = arith.truncf %25 : vector<64x8xf32> to vector<64x8xbf16>
    %c0_44 = arith.constant 0 : index
    %c8 = arith.constant 8 : index
    %27 = vector.load %arg12[%c0_44, %c8] : memref<64x72xbf16, #tpu.memory_space<vmem>>, vector<64x8xbf16>
    tpu.vector_store %arg12[%c0_44, %c8], %26 {strides = array<i32>} : memref<64x72xbf16, #tpu.memory_space<vmem>>, vector<64x8xbf16>,
    %c0_45 = arith.constant 0 : index
    %c2 = arith.constant 2 : index
    %c0_46 = arith.constant 0 : index
    %28 = vector.load %arg10[%c0_45, %c2, %c0_46] : memref<10x16x8xf32, #tpu.memory_space<vmem>>, vector<8x8x8xf32>
    %29 = vector.shape_cast %28 : vector<8x8x8xf32> to vector<64x8xf32>
    %30 = arith.truncf %29 : vector<64x8xf32> to vector<64x8xbf16>
    %c0_47 = arith.constant 0 : index
    %c16 = arith.constant 16 : index
    %31 = vector.load %arg12[%c0_47, %c16] : memref<64x72xbf16, #tpu.memory_space<vmem>>, vector<64x8xbf16>
    tpu.vector_store %arg12[%c0_47, %c16], %30 {strides = array<i32>} : memref<64x72xbf16, #tpu.memory_space<vmem>>, vector<64x8xbf16>,
    %c1_48 = arith.constant 1 : index
    %c0_49 = arith.constant 0 : index
    %c0_50 = arith.constant 0 : index
    %32 = vector.load %arg10[%c1_48, %c0_49, %c0_50] : memref<10x16x8xf32, #tpu.memory_space<vmem>>, vector<8x8x8xf32>
    %33 = vector.shape_cast %32 : vector<8x8x8xf32> to vector<64x8xf32>
    %34 = arith.truncf %33 : vector<64x8xf32> to vector<64x8xbf16>
    %c0_51 = arith.constant 0 : index
    %c24 = arith.constant 24 : index
    %35 = vector.load %arg12[%c0_51, %c24] : memref<64x72xbf16, #tpu.memory_space<vmem>>, vector<64x8xbf16>
    tpu.vector_store %arg12[%c0_51, %c24], %34 {strides = array<i32>} : memref<64x72xbf16, #tpu.memory_space<vmem>>, vector<64x8xbf16>,
    %c1_52 = arith.constant 1 : index
    %c1_53 = arith.constant 1 : index
    %c0_54 = arith.constant 0 : index
    %36 = vector.load %arg10[%c1_52, %c1_53, %c0_54] : memref<10x16x8xf32, #tpu.memory_space<vmem>>, vector<8x8x8xf32>
    %37 = vector.shape_cast %36 : vector<8x8x8xf32> to vector<64x8xf32>
    %38 = arith.truncf %37 : vector<64x8xf32> to vector<64x8xbf16>
    %c0_55 = arith.constant 0 : index
    %c32 = arith.constant 32 : index
    %39 = vector.load %arg12[%c0_55, %c32] : memref<64x72xbf16, #tpu.memory_space<vmem>>, vector<64x8xbf16>
    tpu.vector_store %arg12[%c0_55, %c32], %38 {strides = array<i32>} : memref<64x72xbf16, #tpu.memory_space<vmem>>, vector<64x8xbf16>,
    %c1_56 = arith.constant 1 : index
    %c2_57 = arith.constant 2 : index
    %c0_58 = arith.constant 0 : index
    %40 = vector.load %arg10[%c1_56, %c2_57, %c0_58] : memref<10x16x8xf32, #tpu.memory_space<vmem>>, vector<8x8x8xf32>
    %41 = vector.shape_cast %40 : vector<8x8x8xf32> to vector<64x8xf32>
    %42 = arith.truncf %41 : vector<64x8xf32> to vector<64x8xbf16>
    %c0_59 = arith.constant 0 : index
    %c40 = arith.constant 40 : index
    %43 = vector.load %arg12[%c0_59, %c40] : memref<64x72xbf16, #tpu.memory_space<vmem>>, vector<64x8xbf16>
    tpu.vector_store %arg12[%c0_59, %c40], %42 {strides = array<i32>} : memref<64x72xbf16, #tpu.memory_space<vmem>>, vector<64x8xbf16>,
    %c2_60 = arith.constant 2 : index
    %c0_61 = arith.constant 0 : index
    %c0_62 = arith.constant 0 : index
    %44 = vector.load %arg10[%c2_60, %c0_61, %c0_62] : memref<10x16x8xf32, #tpu.memory_space<vmem>>, vector<8x8x8xf32>
    %45 = vector.shape_cast %44 : vector<8x8x8xf32> to vector<64x8xf32>
    %46 = arith.truncf %45 : vector<64x8xf32> to vector<64x8xbf16>
    %c0_63 = arith.constant 0 : index
    %c48 = arith.constant 48 : index
    %47 = vector.load %arg12[%c0_63, %c48] : memref<64x72xbf16, #tpu.memory_space<vmem>>, vector<64x8xbf16>
    tpu.vector_store %arg12[%c0_63, %c48], %46 {strides = array<i32>} : memref<64x72xbf16, #tpu.memory_space<vmem>>, vector<64x8xbf16>,
    %c2_64 = arith.constant 2 : index
    %c1_65 = arith.constant 1 : index
    %c0_66 = arith.constant 0 : index
    %48 = vector.load %arg10[%c2_64, %c1_65, %c0_66] : memref<10x16x8xf32, #tpu.memory_space<vmem>>, vector<8x8x8xf32>
    %49 = vector.shape_cast %48 : vector<8x8x8xf32> to vector<64x8xf32>
    %50 = arith.truncf %49 : vector<64x8xf32> to vector<64x8xbf16>
    %c0_67 = arith.constant 0 : index
    %c56 = arith.constant 56 : index
    %51 = vector.load %arg12[%c0_67, %c56] : memref<64x72xbf16, #tpu.memory_space<vmem>>, vector<64x8xbf16>
    tpu.vector_store %arg12[%c0_67, %c56], %50 {strides = array<i32>} : memref<64x72xbf16, #tpu.memory_space<vmem>>, vector<64x8xbf16>,
    %c2_68 = arith.constant 2 : index
    %c2_69 = arith.constant 2 : index
    %c0_70 = arith.constant 0 : index
    %52 = vector.load %arg10[%c2_68, %c2_69, %c0_70] : memref<10x16x8xf32, #tpu.memory_space<vmem>>, vector<8x8x8xf32>
    %53 = vector.shape_cast %52 : vector<8x8x8xf32> to vector<64x8xf32>
    %54 = arith.truncf %53 : vector<64x8xf32> to vector<64x8xbf16>
    %c0_71 = arith.constant 0 : index
    %c64 = arith.constant 64 : index
    %55 = vector.load %arg12[%c0_71, %c64] : memref<64x72xbf16, #tpu.memory_space<vmem>>, vector<64x8xbf16>
    tpu.vector_store %arg12[%c0_71, %c64], %54 {strides = array<i32>} : memref<64x72xbf16, #tpu.memory_space<vmem>>, vector<64x8xbf16>,
    %c0_72 = arith.constant 0 : index
    %c0_73 = arith.constant 0 : index
    %56 = vector.load %arg12[%c0_72, %c0_73] : memref<64x72xbf16, #tpu.memory_space<vmem>>, vector<64x72xbf16>
    %c0_74 = arith.constant 0 : index
    %c0_75 = arith.constant 0 : index
    %57 = vector.load %arg3[%c0_74, %c0_75] : memref<72x128xbf16, #tpu.memory_space<vmem>>, vector<72x128xbf16>
    %cst_76 = arith.constant dense<0.000000e+00> : vector<64x128xf32>
    %58 = tpu.matmul %56, %57, %cst_76 {dimension_numbers = #tpu.dot_dimension_numbers<[1], [0], [0], [1], [0, 0, 1, 1], [], []>} : vector<64x72xbf16>, vector<72x128xbf16>, vector<64x128xf32> -> vector<64x128xf32>
    %c0_77 = arith.constant 0 : index
    %c0_78 = arith.constant 0 : index
    %59 = vector.load %arg4[%c0_77, %c0_78] : memref<1x128xf32, #tpu.memory_space<vmem>>, vector<1x128xf32>
    %60 = vector.broadcast %59 : vector<1x128xf32> to vector<64x128xf32>
    %61 = arith.addf %58, %60 : vector<64x128xf32>
    %cst_79 = arith.constant 0.000000e+00 : f32
    %62 = vector.broadcast %cst_79 : f32 to vector<64x128xf32>
    %63 = arith.cmpf oge, %61, %62 : vector<64x128xf32>
    %64 = vector.broadcast %19 : f32 to vector<64x128xf32>
    %65 = arith.mulf %64, %61 : vector<64x128xf32>
    %66 = arith.select %63, %61, %65 : vector<64x128xi1>, vector<64x128xf32>
    %67 = vector.shape_cast %66 : vector<64x128xf32> to vector<8x8x128xf32>
    %c1_80 = arith.constant 1 : index
    %c1_81 = arith.constant 1 : index
    %c0_82 = arith.constant 0 : index
    %68 = vector.load %arg11[%c1_80, %c1_81, %c0_82] : memref<10x16x128xf32, #tpu.memory_space<vmem>>, vector<8x8x128xf32>
    tpu.vector_store %arg11[%c1_80, %c1_81, %c0_82], %67 {strides = array<i32>} : memref<10x16x128xf32, #tpu.memory_space<vmem>>, vector<8x8x128xf32>,
    %c1_83 = arith.constant 1 : index
    %69 = memref.load %arg1[%c1_83] : memref<3xf32, #tpu.memory_space<smem>>
    %c0_84 = arith.constant 0 : index
    %c0_85 = arith.constant 0 : index
    %c0_86 = arith.constant 0 : index
    %70 = vector.load %arg11[%c0_84, %c0_85, %c0_86] : memref<10x16x128xf32, #tpu.memory_space<vmem>>, vector<8x8x128xf32>
    %71 = vector.shape_cast %70 : vector<8x8x128xf32> to vector<64x128xf32>
    %72 = arith.truncf %71 : vector<64x128xf32> to vector<64x128xbf16>
    %c0_87 = arith.constant 0 : index
    %c0_88 = arith.constant 0 : index
    %73 = vector.load %arg13[%c0_87, %c0_88] : memref<64x1152xbf16, #tpu.memory_space<vmem>>, vector<64x128xbf16>
    tpu.vector_store %arg13[%c0_87, %c0_88], %72 {strides = array<i32>} : memref<64x1152xbf16, #tpu.memory_space<vmem>>, vector<64x128xbf16>,
    %c0_89 = arith.constant 0 : index
    %c1_90 = arith.constant 1 : index
    %c0_91 = arith.constant 0 : index
    %74 = vector.load %arg11[%c0_89, %c1_90, %c0_91] : memref<10x16x128xf32, #tpu.memory_space<vmem>>, vector<8x8x128xf32>
    %75 = vector.shape_cast %74 : vector<8x8x128xf32> to vector<64x128xf32>
    %76 = arith.truncf %75 : vector<64x128xf32> to vector<64x128xbf16>
    %c0_92 = arith.constant 0 : index
    %c128 = arith.constant 128 : index
    %77 = vector.load %arg13[%c0_92, %c128] : memref<64x1152xbf16, #tpu.memory_space<vmem>>, vector<64x128xbf16>
    tpu.vector_store %arg13[%c0_92, %c128], %76 {strides = array<i32>} : memref<64x1152xbf16, #tpu.memory_space<vmem>>, vector<64x128xbf16>,
    %c0_93 = arith.constant 0 : index
    %c2_94 = arith.constant 2 : index
    %c0_95 = arith.constant 0 : index
    %78 = vector.load %arg11[%c0_93, %c2_94, %c0_95] : memref<10x16x128xf32, #tpu.memory_space<vmem>>, vector<8x8x128xf32>
    %79 = vector.shape_cast %78 : vector<8x8x128xf32> to vector<64x128xf32>
    %80 = arith.truncf %79 : vector<64x128xf32> to vector<64x128xbf16>
    %c0_96 = arith.constant 0 : index
    %c256 = arith.constant 256 : index
    %81 = vector.load %arg13[%c0_96, %c256] : memref<64x1152xbf16, #tpu.memory_space<vmem>>, vector<64x128xbf16>
    tpu.vector_store %arg13[%c0_96, %c256], %80 {strides = array<i32>} : memref<64x1152xbf16, #tpu.memory_space<vmem>>, vector<64x128xbf16>,
    %c1_97 = arith.constant 1 : index
    %c0_98 = arith.constant 0 : index
    %c0_99 = arith.constant 0 : index
    %82 = vector.load %arg11[%c1_97, %c0_98, %c0_99] : memref<10x16x128xf32, #tpu.memory_space<vmem>>, vector<8x8x128xf32>
    %83 = vector.shape_cast %82 : vector<8x8x128xf32> to vector<64x128xf32>
    %84 = arith.truncf %83 : vector<64x128xf32> to vector<64x128xbf16>
    %c0_100 = arith.constant 0 : index
    %c384 = arith.constant 384 : index
    %85 = vector.load %arg13[%c0_100, %c384] : memref<64x1152xbf16, #tpu.memory_space<vmem>>, vector<64x128xbf16>
    tpu.vector_store %arg13[%c0_100, %c384], %84 {strides = array<i32>} : memref<64x1152xbf16, #tpu.memory_space<vmem>>, vector<64x128xbf16>,
    %c1_101 = arith.constant 1 : index
    %c1_102 = arith.constant 1 : index
    %c0_103 = arith.constant 0 : index
    %86 = vector.load %arg11[%c1_101, %c1_102, %c0_103] : memref<10x16x128xf32, #tpu.memory_space<vmem>>, vector<8x8x128xf32>
    %87 = vector.shape_cast %86 : vector<8x8x128xf32> to vector<64x128xf32>
    %88 = arith.truncf %87 : vector<64x128xf32> to vector<64x128xbf16>
    %c0_104 = arith.constant 0 : index
    %c512 = arith.constant 512 : index
    %89 = vector.load %arg13[%c0_104, %c512] : memref<64x1152xbf16, #tpu.memory_space<vmem>>, vector<64x128xbf16>
    tpu.vector_store %arg13[%c0_104, %c512], %88 {strides = array<i32>} : memref<64x1152xbf16, #tpu.memory_space<vmem>>, vector<64x128xbf16>,
    %c1_105 = arith.constant 1 : index
    %c2_106 = arith.constant 2 : index
    %c0_107 = arith.constant 0 : index
    %90 = vector.load %arg11[%c1_105, %c2_106, %c0_107] : memref<10x16x128xf32, #tpu.memory_space<vmem>>, vector<8x8x128xf32>
    %91 = vector.shape_cast %90 : vector<8x8x128xf32> to vector<64x128xf32>
    %92 = arith.truncf %91 : vector<64x128xf32> to vector<64x128xbf16>
    %c0_108 = arith.constant 0 : index
    %c640 = arith.constant 640 : index
    %93 = vector.load %arg13[%c0_108, %c640] : memref<64x1152xbf16, #tpu.memory_space<vmem>>, vector<64x128xbf16>
    tpu.vector_store %arg13[%c0_108, %c640], %92 {strides = array<i32>} : memref<64x1152xbf16, #tpu.memory_space<vmem>>, vector<64x128xbf16>,
    %c2_109 = arith.constant 2 : index
    %c0_110 = arith.constant 0 : index
    %c0_111 = arith.constant 0 : index
    %94 = vector.load %arg11[%c2_109, %c0_110, %c0_111] : memref<10x16x128xf32, #tpu.memory_space<vmem>>, vector<8x8x128xf32>
    %95 = vector.shape_cast %94 : vector<8x8x128xf32> to vector<64x128xf32>
    %96 = arith.truncf %95 : vector<64x128xf32> to vector<64x128xbf16>
    %c0_112 = arith.constant 0 : index
    %c768 = arith.constant 768 : index
    %97 = vector.load %arg13[%c0_112, %c768] : memref<64x1152xbf16, #tpu.memory_space<vmem>>, vector<64x128xbf16>
    tpu.vector_store %arg13[%c0_112, %c768], %96 {strides = array<i32>} : memref<64x1152xbf16, #tpu.memory_space<vmem>>, vector<64x128xbf16>,
    %c2_113 = arith.constant 2 : index
    %c1_114 = arith.constant 1 : index
    %c0_115 = arith.constant 0 : index
    %98 = vector.load %arg11[%c2_113, %c1_114, %c0_115] : memref<10x16x128xf32, #tpu.memory_space<vmem>>, vector<8x8x128xf32>
    %99 = vector.shape_cast %98 : vector<8x8x128xf32> to vector<64x128xf32>
    %100 = arith.truncf %99 : vector<64x128xf32> to vector<64x128xbf16>
    %c0_116 = arith.constant 0 : index
    %c896 = arith.constant 896 : index
    %101 = vector.load %arg13[%c0_116, %c896] : memref<64x1152xbf16, #tpu.memory_space<vmem>>, vector<64x128xbf16>
    tpu.vector_store %arg13[%c0_116, %c896], %100 {strides = array<i32>} : memref<64x1152xbf16, #tpu.memory_space<vmem>>, vector<64x128xbf16>,
    %c2_117 = arith.constant 2 : index
    %c2_118 = arith.constant 2 : index
    %c0_119 = arith.constant 0 : index
    %102 = vector.load %arg11[%c2_117, %c2_118, %c0_119] : memref<10x16x128xf32, #tpu.memory_space<vmem>>, vector<8x8x128xf32>
    %103 = vector.shape_cast %102 : vector<8x8x128xf32> to vector<64x128xf32>
    %104 = arith.truncf %103 : vector<64x128xf32> to vector<64x128xbf16>
    %c0_120 = arith.constant 0 : index
    %c1024 = arith.constant 1024 : index
    %105 = vector.load %arg13[%c0_120, %c1024] : memref<64x1152xbf16, #tpu.memory_space<vmem>>, vector<64x128xbf16>
    tpu.vector_store %arg13[%c0_120, %c1024], %104 {strides = array<i32>} : memref<64x1152xbf16, #tpu.memory_space<vmem>>, vector<64x128xbf16>,
    %c0_121 = arith.constant 0 : index
    %c0_122 = arith.constant 0 : index
    %106 = vector.load %arg13[%c0_121, %c0_122] : memref<64x1152xbf16, #tpu.memory_space<vmem>>, vector<64x1152xbf16>
    %c0_123 = arith.constant 0 : index
    %c0_124 = arith.constant 0 : index
    %107 = vector.load %arg5[%c0_123, %c0_124] : memref<1152x8xbf16, #tpu.memory_space<vmem>>, vector<1152x8xbf16>
    %cst_125 = arith.constant dense<0.000000e+00> : vector<64x8xf32>
    %108 = tpu.matmul %106, %107, %cst_125 {dimension_numbers = #tpu.dot_dimension_numbers<[1], [0], [0], [1], [0, 0, 1, 1], [], []>} : vector<64x1152xbf16>, vector<1152x8xbf16>, vector<64x8xf32> -> vector<64x8xf32>
    %c0_126 = arith.constant 0 : index
    %c0_127 = arith.constant 0 : index
    %109 = vector.load %arg6[%c0_126, %c0_127] : memref<1x8xf32, #tpu.memory_space<vmem>>, vector<1x8xf32>
    %110 = vector.broadcast %109 : vector<1x8xf32> to vector<64x8xf32>
    %111 = arith.addf %108, %110 : vector<64x8xf32>
    %cst_128 = arith.constant 0.000000e+00 : f32
    %112 = vector.broadcast %cst_128 : f32 to vector<64x8xf32>
    %113 = arith.cmpf oge, %111, %112 : vector<64x8xf32>
    %114 = vector.broadcast %69 : f32 to vector<64x8xf32>
    %115 = arith.mulf %114, %111 : vector<64x8xf32>
    %116 = arith.select %113, %111, %115 : vector<64x8xi1>, vector<64x8xf32>
    %c1_129 = arith.constant 1 : index
    %c1_130 = arith.constant 1 : index
    %c0_131 = arith.constant 0 : index
    %117 = vector.load %arg10[%c1_129, %c1_130, %c0_131] : memref<10x16x8xf32, #tpu.memory_space<vmem>>, vector<8x8x8xf32>
    %118 = vector.shape_cast %117 : vector<8x8x8xf32> to vector<64x8xf32>
    %119 = arith.subf %116, %118 : vector<64x8xf32>
    %120 = vector.shape_cast %119 : vector<64x8xf32> to vector<8x8x8xf32>
    %c1_132 = arith.constant 1 : index
    %c1_133 = arith.constant 1 : index
    %c0_134 = arith.constant 0 : index
    %121 = vector.load %arg10[%c1_132, %c1_133, %c0_134] : memref<10x16x8xf32, #tpu.memory_space<vmem>>, vector<8x8x8xf32>
    tpu.vector_store %arg10[%c1_132, %c1_133, %c0_134], %120 {strides = array<i32>} : memref<10x16x8xf32, #tpu.memory_space<vmem>>, vector<8x8x8xf32>,
    %c2_135 = arith.constant 2 : index
    %122 = memref.load %arg1[%c2_135] : memref<3xf32, #tpu.memory_space<smem>>
    %c0_136 = arith.constant 0 : index
    %c0_137 = arith.constant 0 : index
    %c0_138 = arith.constant 0 : index
    %123 = vector.load %arg10[%c0_136, %c0_137, %c0_138] : memref<10x16x8xf32, #tpu.memory_space<vmem>>, vector<8x8x8xf32>
    %124 = vector.shape_cast %123 : vector<8x8x8xf32> to vector<64x8xf32>
    %125 = arith.truncf %124 : vector<64x8xf32> to vector<64x8xbf16>
    %c0_139 = arith.constant 0 : index
    %c0_140 = arith.constant 0 : index
    %126 = vector.load %arg12[%c0_139, %c0_140] : memref<64x72xbf16, #tpu.memory_space<vmem>>, vector<64x8xbf16>
    tpu.vector_store %arg12[%c0_139, %c0_140], %125 {strides = array<i32>} : memref<64x72xbf16, #tpu.memory_space<vmem>>, vector<64x8xbf16>,
    %c0_141 = arith.constant 0 : index
    %c1_142 = arith.constant 1 : index
    %c0_143 = arith.constant 0 : index
    %127 = vector.load %arg10[%c0_141, %c1_142, %c0_143] : memref<10x16x8xf32, #tpu.memory_space<vmem>>, vector<8x8x8xf32>
    %128 = vector.shape_cast %127 : vector<8x8x8xf32> to vector<64x8xf32>
    %129 = arith.truncf %128 : vector<64x8xf32> to vector<64x8xbf16>
    %c0_144 = arith.constant 0 : index
    %c8_145 = arith.constant 8 : index
    %130 = vector.load %arg12[%c0_144, %c8_145] : memref<64x72xbf16, #tpu.memory_space<vmem>>, vector<64x8xbf16>
    tpu.vector_store %arg12[%c0_144, %c8_145], %129 {strides = array<i32>} : memref<64x72xbf16, #tpu.memory_space<vmem>>, vector<64x8xbf16>,
    %c0_146 = arith.constant 0 : index
    %c2_147 = arith.constant 2 : index
    %c0_148 = arith.constant 0 : index
    %131 = vector.load %arg10[%c0_146, %c2_147, %c0_148] : memref<10x16x8xf32, #tpu.memory_space<vmem>>, vector<8x8x8xf32>
    %132 = vector.shape_cast %131 : vector<8x8x8xf32> to vector<64x8xf32>
    %133 = arith.truncf %132 : vector<64x8xf32> to vector<64x8xbf16>
    %c0_149 = arith.constant 0 : index
    %c16_150 = arith.constant 16 : index
    %134 = vector.load %arg12[%c0_149, %c16_150] : memref<64x72xbf16, #tpu.memory_space<vmem>>, vector<64x8xbf16>
    tpu.vector_store %arg12[%c0_149, %c16_150], %133 {strides = array<i32>} : memref<64x72xbf16, #tpu.memory_space<vmem>>, vector<64x8xbf16>,
    %c1_151 = arith.constant 1 : index
    %c0_152 = arith.constant 0 : index
    %c0_153 = arith.constant 0 : index
    %135 = vector.load %arg10[%c1_151, %c0_152, %c0_153] : memref<10x16x8xf32, #tpu.memory_space<vmem>>, vector<8x8x8xf32>
    %136 = vector.shape_cast %135 : vector<8x8x8xf32> to vector<64x8xf32>
    %137 = arith.truncf %136 : vector<64x8xf32> to vector<64x8xbf16>
    %c0_154 = arith.constant 0 : index
    %c24_155 = arith.constant 24 : index
    %138 = vector.load %arg12[%c0_154, %c24_155] : memref<64x72xbf16, #tpu.memory_space<vmem>>, vector<64x8xbf16>
    tpu.vector_store %arg12[%c0_154, %c24_155], %137 {strides = array<i32>} : memref<64x72xbf16, #tpu.memory_space<vmem>>, vector<64x8xbf16>,
    %c1_156 = arith.constant 1 : index
    %c1_157 = arith.constant 1 : index
    %c0_158 = arith.constant 0 : index
    %139 = vector.load %arg10[%c1_156, %c1_157, %c0_158] : memref<10x16x8xf32, #tpu.memory_space<vmem>>, vector<8x8x8xf32>
    %140 = vector.shape_cast %139 : vector<8x8x8xf32> to vector<64x8xf32>
    %141 = arith.truncf %140 : vector<64x8xf32> to vector<64x8xbf16>
    %c0_159 = arith.constant 0 : index
    %c32_160 = arith.constant 32 : index
    %142 = vector.load %arg12[%c0_159, %c32_160] : memref<64x72xbf16, #tpu.memory_space<vmem>>, vector<64x8xbf16>
    tpu.vector_store %arg12[%c0_159, %c32_160], %141 {strides = array<i32>} : memref<64x72xbf16, #tpu.memory_space<vmem>>, vector<64x8xbf16>,
    %c1_161 = arith.constant 1 : index
    %c2_162 = arith.constant 2 : index
    %c0_163 = arith.constant 0 : index
    %143 = vector.load %arg10[%c1_161, %c2_162, %c0_163] : memref<10x16x8xf32, #tpu.memory_space<vmem>>, vector<8x8x8xf32>
    %144 = vector.shape_cast %143 : vector<8x8x8xf32> to vector<64x8xf32>
    %145 = arith.truncf %144 : vector<64x8xf32> to vector<64x8xbf16>
    %c0_164 = arith.constant 0 : index
    %c40_165 = arith.constant 40 : index
    %146 = vector.load %arg12[%c0_164, %c40_165] : memref<64x72xbf16, #tpu.memory_space<vmem>>, vector<64x8xbf16>
    tpu.vector_store %arg12[%c0_164, %c40_165], %145 {strides = array<i32>} : memref<64x72xbf16, #tpu.memory_space<vmem>>, vector<64x8xbf16>,
    %c2_166 = arith.constant 2 : index
    %c0_167 = arith.constant 0 : index
    %c0_168 = arith.constant 0 : index
    %147 = vector.load %arg10[%c2_166, %c0_167, %c0_168] : memref<10x16x8xf32, #tpu.memory_space<vmem>>, vector<8x8x8xf32>
    %148 = vector.shape_cast %147 : vector<8x8x8xf32> to vector<64x8xf32>
    %149 = arith.truncf %148 : vector<64x8xf32> to vector<64x8xbf16>
    %c0_169 = arith.constant 0 : index
    %c48_170 = arith.constant 48 : index
    %150 = vector.load %arg12[%c0_169, %c48_170] : memref<64x72xbf16, #tpu.memory_space<vmem>>, vector<64x8xbf16>
    tpu.vector_store %arg12[%c0_169, %c48_170], %149 {strides = array<i32>} : memref<64x72xbf16, #tpu.memory_space<vmem>>, vector<64x8xbf16>,
    %c2_171 = arith.constant 2 : index
    %c1_172 = arith.constant 1 : index
    %c0_173 = arith.constant 0 : index
    %151 = vector.load %arg10[%c2_171, %c1_172, %c0_173] : memref<10x16x8xf32, #tpu.memory_space<vmem>>, vector<8x8x8xf32>
    %152 = vector.shape_cast %151 : vector<8x8x8xf32> to vector<64x8xf32>
    %153 = arith.truncf %152 : vector<64x8xf32> to vector<64x8xbf16>
    %c0_174 = arith.constant 0 : index
    %c56_175 = arith.constant 56 : index
    %154 = vector.load %arg12[%c0_174, %c56_175] : memref<64x72xbf16, #tpu.memory_space<vmem>>, vector<64x8xbf16>
    tpu.vector_store %arg12[%c0_174, %c56_175], %153 {strides = array<i32>} : memref<64x72xbf16, #tpu.memory_space<vmem>>, vector<64x8xbf16>,
    %c2_176 = arith.constant 2 : index
    %c2_177 = arith.constant 2 : index
    %c0_178 = arith.constant 0 : index
    %155 = vector.load %arg10[%c2_176, %c2_177, %c0_178] : memref<10x16x8xf32, #tpu.memory_space<vmem>>, vector<8x8x8xf32>
    %156 = vector.shape_cast %155 : vector<8x8x8xf32> to vector<64x8xf32>
    %157 = arith.truncf %156 : vector<64x8xf32> to vector<64x8xbf16>
    %c0_179 = arith.constant 0 : index
    %c64_180 = arith.constant 64 : index
    %158 = vector.load %arg12[%c0_179, %c64_180] : memref<64x72xbf16, #tpu.memory_space<vmem>>, vector<64x8xbf16>
    tpu.vector_store %arg12[%c0_179, %c64_180], %157 {strides = array<i32>} : memref<64x72xbf16, #tpu.memory_space<vmem>>, vector<64x8xbf16>,
    %c0_181 = arith.constant 0 : index
    %c0_182 = arith.constant 0 : index
    %159 = vector.load %arg12[%c0_181, %c0_182] : memref<64x72xbf16, #tpu.memory_space<vmem>>, vector<64x72xbf16>
    %c0_183 = arith.constant 0 : index
    %c0_184 = arith.constant 0 : index
    %160 = vector.load %arg7[%c0_183, %c0_184] : memref<72x128xbf16, #tpu.memory_space<vmem>>, vector<72x128xbf16>
    %cst_185 = arith.constant dense<0.000000e+00> : vector<64x128xf32>
    %161 = tpu.matmul %159, %160, %cst_185 {dimension_numbers = #tpu.dot_dimension_numbers<[1], [0], [0], [1], [0, 0, 1, 1], [], []>} : vector<64x72xbf16>, vector<72x128xbf16>, vector<64x128xf32> -> vector<64x128xf32>
    %c0_186 = arith.constant 0 : index
    %c0_187 = arith.constant 0 : index
    %162 = vector.load %arg8[%c0_186, %c0_187] : memref<1x128xf32, #tpu.memory_space<vmem>>, vector<1x128xf32>
    %163 = vector.broadcast %162 : vector<1x128xf32> to vector<64x128xf32>
    %164 = arith.addf %161, %163 : vector<64x128xf32>
    %cst_188 = arith.constant 0.000000e+00 : f32
    %165 = vector.broadcast %cst_188 : f32 to vector<64x128xf32>
    %166 = arith.cmpf oge, %164, %165 : vector<64x128xf32>
    %167 = vector.broadcast %122 : f32 to vector<64x128xf32>
    %168 = arith.mulf %167, %164 : vector<64x128xf32>
    %169 = arith.select %166, %164, %168 : vector<64x128xi1>, vector<64x128xf32>
    %170 = vector.shape_cast %169 : vector<64x128xf32> to vector<8x8x128xf32>
    %c1_189 = arith.constant 1 : index
    %c1_190 = arith.constant 1 : index
    %c0_191 = arith.constant 0 : index
    %171 = vector.load %arg11[%c1_189, %c1_190, %c0_191] : memref<10x16x128xf32, #tpu.memory_space<vmem>>, vector<8x8x128xf32>
    %172 = arith.addf %170, %171 : vector<8x8x128xf32>
    %c0_192 = arith.constant 0 : index
    %c0_193 = arith.constant 0 : index
    %c0_194 = arith.constant 0 : index
    %c0_195 = arith.constant 0 : index
    %173 = vector.load %arg9[%c0_192, %c0_193, %c0_194, %c0_195] : memref<1x8x8x128xf32, #tpu.memory_space<vmem>>, vector<1x8x8x128xf32>
    %174 = vector.shape_cast %173 : vector<1x8x8x128xf32> to vector<8x8x128xf32>
    %175 = vector.shape_cast %172 : vector<8x8x128xf32> to vector<1x8x8x128xf32>
    tpu.vector_store %arg9[%c0_192, %c0_193, %c0_194, %c0_195], %175 {strides = array<i32>} : memref<1x8x8x128xf32, #tpu.memory_space<vmem>>, vector<1x8x8x128xf32>,
    return
  }
  func.func @transform_0(%arg0: i32) -> i32 {
    %c0_i32 = arith.constant 0 : i32
    %c0_i32_0 = arith.constant 0 : i32
    return %c0_i32 : i32
  }
  func.func @transform_1(%arg0: i32) -> (i32, i32, i32, i32) {
    %c0_i32 = arith.constant 0 : i32
    %c0_i32_0 = arith.constant 0 : i32
    %c0_i32_1 = arith.constant 0 : i32
    %c0_i32_2 = arith.constant 0 : i32
    return %arg0, %c0_i32, %c0_i32_0, %c0_i32_1 : i32, i32, i32, i32
  }
  func.func @transform_2(%arg0: i32) -> (i32, i32) {
    %c0_i32 = arith.constant 0 : i32
    %c0_i32_0 = arith.constant 0 : i32
    %c0_i32_1 = arith.constant 0 : i32
    return %c0_i32, %c0_i32_0 : i32, i32
  }
  func.func @transform_3(%arg0: i32) -> (i32, i32) {
    %c0_i32 = arith.constant 0 : i32
    %c0_i32_0 = arith.constant 0 : i32
    %c0_i32_1 = arith.constant 0 : i32
    return %c0_i32, %c0_i32_0 : i32, i32
  }
  func.func @transform_4(%arg0: i32) -> (i32, i32) {
    %c0_i32 = arith.constant 0 : i32
    %c0_i32_0 = arith.constant 0 : i32
    %c0_i32_1 = arith.constant 0 : i32
    return %c0_i32, %c0_i32_0 : i32, i32
  }
  func.func @transform_5(%arg0: i32) -> (i32, i32) {
    %c0_i32 = arith.constant 0 : i32
    %c0_i32_0 = arith.constant 0 : i32
    %c0_i32_1 = arith.constant 0 : i32
    return %c0_i32, %c0_i32_0 : i32, i32
  }
  func.func @transform_6(%arg0: i32) -> (i32, i32) {
    %c0_i32 = arith.constant 0 : i32
    %c0_i32_0 = arith.constant 0 : i32
    %c0_i32_1 = arith.constant 0 : i32
    return %c0_i32, %c0_i32_0 : i32, i32
  }
  func.func @transform_7(%arg0: i32) -> (i32, i32) {
    %c0_i32 = arith.constant 0 : i32
    %c0_i32_0 = arith.constant 0 : i32
    %c0_i32_1 = arith.constant 0 : i32
    return %c0_i32, %c0_i32_0 : i32, i32
  }
  func.func @transform_8(%arg0: i32) -> (i32, i32, i32, i32) {
    %c0_i32 = arith.constant 0 : i32
    %c0_i32_0 = arith.constant 0 : i32
    %c0_i32_1 = arith.constant 0 : i32
    %c0_i32_2 = arith.constant 0 : i32
    return %arg0, %c0_i32, %c0_i32_0, %c0_i32_1 : i32, i32, i32, i32
  }
}

</mosaic_0001>

<bundles_post_ra>
// kernel: up_block.1
= control target key start
LH: loop header
LB: loop body
LE: loop exit
PB: predicated region body
PF: predicated region fallthrough
CT: control target
= control target key end

     0   :  { %13 = vsyncpa [#allocation7], 0  ;;  %s3825_s27 = smov 0   ;;  %s4641_s0 = inlined_call_operand.vmem [shape: f32[3], index: 0, kind: input, shape index: {}]   ;;  %s4642_s1 = inlined_call_operand.vmem [shape: f32[2,8,8,8], index: 1, kind: input, shape index: {}]   ;;  %s4643_s2 = inlined_call_operand.vmem [shape: bf16[72,128], index: 2, kind: input, shape index: {}]   ;;  %s4644_s3 = inlined_call_operand.vmem [shape: f32[1,128], index: 3, kind: input, shape index: {}]   ;;  %s4645_s4 = inlined_call_operand.vmem [shape: bf16[1152,8], index: 4, kind: input, shape index: {}]   ;;  %s4646_s5 = inlined_call_operand.vmem [shape: f32[1,8], index: 5, kind: input, shape index: {}]   ;;  %s4647_s6 = inlined_call_operand.vmem [shape: bf16[72,128], index: 6, kind: input, shape index: {}]   ;;  %s4648_s7 = inlined_call_operand.vmem [shape: f32[1,128], index: 7, kind: input, shape index: {}]   ;;  %s4649_s8 = inlined_call_operand.vmem [shape: f32[2,8,8,128], index: 8, kind: output, shape index: {}]  }
   0x1 LB: > { %s3831_s28 = sadd.s32 4294967295, %s3768_s27   ;;  %p3056_p0 = scmp.ge.s32.totalorder %s3768_s27, 1  ;;  %s3768_s27 = sphi %s3825_s27, %s19_s27  }
   0x2   : > { %p223_p1 = scmp.lt.s32.totalorder %s3768_s27, 3  ;;  %s235_s9 = sshll.u32 %s4641_s0, 4  ;;  %s236_s9 = int_to_ptr.vmem [resolvable:$true] %s235_s9 }
   0x3   : > { %p3720_p3 = scmp.eq.s32.totalorder %s3831_s28, 0  ;;  %s3770_s10 = smov [#allocation6]  }
   0x4   : > { %p224_p2 = pnand %p3056_p0, %p223_p1 }
   0x6   : > { %p3716_p4 = pneg %p224_p2  ;;  %274 = sbr.rel (%p224_p2) target bundleno = 1159 (0x487), region = 52 }
   0x8   : > { %p3717_p5 = pnand %p3720_p3, %p3716_p4 }
   0xa   : > { %3719 = dma.vmem_to_smem (!%p3717_p5), %s236_s9, 16, %s3770_s10, [#allocation7]  }
   0xb   : > { %3763 = dma.done.wait (%p3720_p3), [#allocation7], 16  }
   0xc   : > { %3765 = vsyncadd (%p3720_p3), [#allocation7], 4294967280 }
   0xd   : > { %281 = sfence }
   0xe   : > { %vm321_vm0 = vcmask 64512   ;;  %v3771_v0 = vmov 0.0   ;;  %s3772_s11 = smov 8   ;;  %vm327_vm1 = vcmask 57344   ;;  %p310_p6 = scmp.lt.s32.totalorder %s3831_s28, 1  ;;  %vm407_vm2 = vcmask 60416  }
   0xf   : > { %322 = vst.msk [vmem:[#allocation2] sm:$0xff] %vm321_vm0, %v3771_v0  ;;  %s3773_s12 = smov 16   ;;  %s3774_s17 = smov 24   ;;  %vm464_vm3 = vcmask 126016   ;;  %vm521_vm4 = vcmask 191616   ;;  %vm578_vm5 = vcmask 257216  }
  0x10   : > { %323 = vst.msk [vmem:[#allocation2 + $0x8] sm:$0xff] %vm321_vm0, %v3771_v0  ;;  %s4651_s28 = smov (!%p310_p6, %s3831_s28), 1  ;;  %s3775_s18 = smov 32   ;;  %v889_v55 = vld [vmem:[%s4643_s2 + $0x20] sm:$0xf]  ;;  %vm954_vm6 = vcmask 1043456  }
  0x11   : > { %325 = vst.msk [vmem:[#allocation2 + $0x90] sm:$0xff] %vm321_vm0, %v3771_v0  ;;  %s3573_s13 = sshll.u32 %s4651_s28, 6  ;;  %s3776_s19 = smov 40   ;;  %v931_v57 = vunpack.c.l.b16 %v889_v55  ;;  %vm635_vm7 = vcmask 322816   ;;  %vm692_vm8 = vcmask 388416   ;;  %vm750_vm9 = vcmask 454016  }
  0x12   : > { %326 = vst.msk [vmem:[#allocation2 + $0x98] sm:$0xff] %vm321_vm0, %v3771_v0  ;;  %s3874_s16 = scalar_lea.vmem %s4642_s1, %s3573_s13  ;;  %s3777_s20 = smov 48   ;;  %vm807_vm10 = vcmask 519616   ;;  %vm864_vm11 = vcmask 585216   ;;  %vm941_vm12 = vcmask 588800  }
  0x13   : > { %348 = vst [vmem:[#allocation3] sm:$0xff] %v3771_v0  ;;  %v373_v5 = vld [vmem:[%s3874_s16] sm:$0xff]  ;;  %v374_v6 = vld [vmem:[%s3874_s16 + $0x8] sm:$0xff]  ;;  %v375_v7 = vld [vmem:[%s3874_s16 + $0x10] sm:$0xff]  ;;  %s3778_s21 = smov 56   ;;  %s3779_s22 = smov 64   ;;  %v936_v59 = vpack.c.b16 %v931_v57, %v931_v57 }
  0x14   : > { %349 = vst [vmem:[#allocation3 + $0x8] sm:$0xff] %v3771_v0  ;;  %v376_v17 = vld [vmem:[%s3874_s16 + $0x18] sm:$0xff]  ;;  %v377_v25 = vld [vmem:[%s3874_s16 + $0x20] sm:$0xff]  ;;  %v378_v30 = vld [vmem:[%s3874_s16 + $0x28] sm:$0xff]  ;;  %s3101_s10 = sld [smem:[#allocation6 + $0x1]]  ;;  %s4628_s25 = scalar_lea.vmem %s4649_s8, %s3573_s13 }
  0x15   : > { %351 = vst [vmem:[#allocation3 + $0x90] sm:$0xff] %v3771_v0  ;;  %v379_v37 = vld [vmem:[%s3874_s16 + $0x30] sm:$0xff]  ;;  %v380_v56 = vld [vmem:[%s3874_s16 + $0x38] sm:$0xff]  ;;  %v956_v61 = vsel %vm954_vm6, %v936_v59, 0  ;;  %s390_s16 = sld [smem:[#allocation6]] }
  0x16   : > { %352 = vst [vmem:[#allocation3 + $0x98] sm:$0xff] %v3771_v0  ;;  %961 = vmatpush.bf16.msra.mxu0 %v956_v61  ;;  %s3534_s14 = sld [smem:[#allocation6 + $0x2]] }
  0x17   : > { %v416_v1 = vld [vmem:[#allocation2 + $0x1] sm:$0xff]  ;;  %354 = vst [vmem:[#allocation3 + $0x10] sm:$0x1] %v3771_v0 }
  0x18   : > { %v424_v2 = vpack.c.bf16 %v416_v1, %v416_v1  ;;  %355 = vst [vmem:[#allocation3 + $0x20] sm:$0x1] %v3771_v0  ;;  %v3581_v1 = vld [vmem:[%s4643_s2 + $0x10] sm:$0xff] }
  0x19   : > { %356 = vst [vmem:[#allocation3 + $0x30] sm:$0x1] %v3771_v0 }
  0x1a   : > { %440 = vrot.lane.b32.xlu0 %v424_v2, %s3772_s11  ;;  %357 = vst [vmem:[#allocation3 + $0x40] sm:$0x1] %v3771_v0 }
  0x1b   : > { %358 = vst [vmem:[#allocation3 + $0x50] sm:$0x1] %v3771_v0 }
  0x1c   : > { %359 = vst [vmem:[#allocation3 + $0x60] sm:$0x1] %v3771_v0 }
  0x1d   : > { %360 = vst [vmem:[#allocation3 + $0x70] sm:$0x1] %v3771_v0 }
  0x1e   : > { %361 = vst [vmem:[#allocation3 + $0x80] sm:$0x1] %v3771_v0 }
  0x1f   : > { %364 = vst [vmem:[#allocation3 + $0x19] sm:$0x1] %v3771_v0 }
  0x20   : > { %365 = vst [vmem:[#allocation3 + $0x29] sm:$0x1] %v3771_v0 }
  0x21   : > { %366 = vst [vmem:[#allocation3 + $0x39] sm:$0x1] %v3771_v0 }
  0x22   : > { %367 = vst [vmem:[#allocation3 + $0x49] sm:$0x1] %v3771_v0 }
  0x23   : > { %368 = vst [vmem:[#allocation3 + $0x59] sm:$0x1] %v3771_v0 }
  0x24   : > { %369 = vst [vmem:[#allocation3 + $0x69] sm:$0x1] %v3771_v0 }
  0x25   : > { %370 = vst [vmem:[#allocation3 + $0x79] sm:$0x1] %v3771_v0 }
  0x26   : > { %371 = vst [vmem:[#allocation3 + $0x89] sm:$0x1] %v3771_v0 }
  0x27   : > { %338 = vst.msk [vmem:[#allocation2 + $0x9] sm:$0x1] %vm327_vm1, %v3771_v0 }
  0x28   : > { %328 = vst.msk [vmem:[#allocation2] sm:$0x1] %vm327_vm1, %v3771_v0 }
  0x29   : > { %329 = vst.msk [vmem:[#allocation2 + $0x10] sm:$0x1] %vm327_vm1, %v3771_v0 }
  0x2a   : > { %330 = vst.msk [vmem:[#allocation2 + $0x20] sm:$0x1] %vm327_vm1, %v3771_v0 }
  0x2b   : > { %331 = vst.msk [vmem:[#allocation2 + $0x30] sm:$0x1] %vm327_vm1, %v3771_v0 }
  0x2c   : > { %332 = vst.msk [vmem:[#allocation2 + $0x40] sm:$0x1] %vm327_vm1, %v3771_v0 }
  0x2d   : > { %333 = vst.msk [vmem:[#allocation2 + $0x50] sm:$0x1] %vm327_vm1, %v3771_v0 }
  0x2e   : > { %v473_v3 = vld [vmem:[#allocation2 + $0x2] sm:$0xff]  ;;  %334 = vst.msk [vmem:[#allocation2 + $0x60] sm:$0x1] %vm327_vm1, %v3771_v0 }
  0x2f   : > { %v481_v4 = vpack.c.bf16 %v473_v3, %v473_v3  ;;  %335 = vst.msk [vmem:[#allocation2 + $0x70] sm:$0x1] %vm327_vm1, %v3771_v0  ;;  %v391_v42 = vld [vmem:[#allocation2] sm:$0xff] }
  0x30   : > { %336 = vst.msk [vmem:[#allocation2 + $0x80] sm:$0x1] %vm327_vm1, %v3771_v0  ;;  %v3927_v44 = vpack.c.bf16 %v391_v42, %v391_v42 }
  0x31   : > { %497 = vrot.lane.b32.xlu1 %v481_v4, %s3773_s12  ;;  %337 = vst.msk [vmem:[#allocation2 + $0x90] sm:$0x1] %vm327_vm1, %v3771_v0 }
  0x32   : > { %339 = vst.msk [vmem:[#allocation2 + $0x19] sm:$0x1] %vm327_vm1, %v3771_v0 }
  0x33   : > { %340 = vst.msk [vmem:[#allocation2 + $0x29] sm:$0x1] %vm327_vm1, %v3771_v0 }
  0x34   : > { %341 = vst.msk [vmem:[#allocation2 + $0x39] sm:$0x1] %vm327_vm1, %v3771_v0 }
  0x35   : > { %342 = vst.msk [vmem:[#allocation2 + $0x49] sm:$0x1] %vm327_vm1, %v3771_v0 }
  0x36   : > { %343 = vst.msk [vmem:[#allocation2 + $0x59] sm:$0x1] %vm327_vm1, %v3771_v0 }
  0x37   : > { %344 = vst.msk [vmem:[#allocation2 + $0x69] sm:$0x1] %vm327_vm1, %v3771_v0 }
  0x38   : > { %345 = vst.msk [vmem:[#allocation2 + $0x79] sm:$0x1] %vm327_vm1, %v3771_v0 }
  0x39   : > { %346 = vst.msk [vmem:[#allocation2 + $0x89] sm:$0x1] %vm327_vm1, %v3771_v0 }
  0x3a   : > { %347 = vst.msk [vmem:[#allocation2 + $0x99] sm:$0x1] %vm327_vm1, %v3771_v0 }
  0x3b   : > { %353 = vst [vmem:[#allocation3] sm:$0x1] %v3771_v0 }
  0x3c   : > { %362 = vst [vmem:[#allocation3 + $0x90] sm:$0x1] %v3771_v0 }
  0x3d   : > { %363 = vst [vmem:[#allocation3 + $0x9] sm:$0x1] %v3771_v0 }
  0x3e   : > { %372 = vst [vmem:[#allocation3 + $0x99] sm:$0x1] %v3771_v0  ;;  %v3582_v0 = vld [vmem:[%s4643_s2 + $0x18] sm:$0xff] }
  0x3f   : > { %382 = vst.msk [vmem:[#allocation2 + $0x11] sm:$0xff] %vm321_vm0, %v373_v5  ;;  %962 = vmatpush.bf16.msra.mxu0 %v3582_v0 }
  0x40   : > { %383 = vst.msk [vmem:[#allocation2 + $0x21] sm:$0xff] %vm321_vm0, %v374_v6  ;;  %v3580_v6 = vld [vmem:[%s4643_s2 + $0x8] sm:$0xff] }
  0x41   : > { %384 = vst.msk [vmem:[#allocation2 + $0x31] sm:$0xff] %vm321_vm0, %v375_v7 }
  0x42   : > { %385 = vst.msk [vmem:[#allocation2 + $0x41] sm:$0xff] %vm321_vm0, %v376_v17 }
  0x43   : > { %386 = vst.msk [vmem:[#allocation2 + $0x51] sm:$0xff] %vm321_vm0, %v377_v25  ;;  %963 = vmatpush.bf16.msra.mxu0 %v3581_v1 }
  0x44   : > { %387 = vst.msk [vmem:[#allocation2 + $0x61] sm:$0xff] %vm321_vm0, %v378_v30 }
  0x45   : > { %388 = vst.msk [vmem:[#allocation2 + $0x71] sm:$0xff] %vm321_vm0, %v379_v37 }
  0x46   : > { %v417_v8 = vld [vmem:[#allocation2 + $0x11] sm:$0xff]  ;;  %408 = vst.msk [vmem:[#allocation4] sm:$0xf] %vm407_vm2, %v3927_v44 }
  0x47   : > { %v474_v9 = vld [vmem:[#allocation2 + $0x12] sm:$0xff]  ;;  %v425_v11 = vpack.c.bf16 %v417_v8, %v417_v8  ;;  %v588_v14 = vld [vmem:[#allocation2 + $0x21] sm:$0xff]  ;;  %389 = vst.msk [vmem:[#allocation2 + $0x81] sm:$0xff] %vm321_vm0, %v380_v56  ;;  %964 = vmatpush.bf16.msra.mxu0 %v3580_v6 }
  0x48   : > { %v530_v10 = vld [vmem:[#allocation2 + $0x10] sm:$0xff]  ;;  %v482_v12 = vpack.c.bf16 %v474_v9, %v474_v9  ;;  %v596_v15 = vpack.c.bf16 %v588_v14, %v588_v14  ;;  %v702_v16 = vld [vmem:[#allocation2 + $0x20] sm:$0xff]  ;;  %v3634_v6 = vld [vmem:[%s4645_s4 + $0x78] sm:$0xff] }
  0x49   : > { %v3883_v13 = vpack.c.bf16 %v530_v10, %v530_v10  ;;  %442 = vrot.lane.b32.xlu0 %v425_v11, %s3772_s11  ;;  %v3891_v18 = vpack.c.bf16 %v702_v16, %v702_v16  ;;  %v645_v19 = vld [vmem:[#allocation2 + $0x22] sm:$0xff]  ;;  %v760_v21 = vld [vmem:[#allocation2 + $0x31] sm:$0xff]  ;;  %2072 = vmatpush.bf16.msra.mxu2 %v3634_v6 }
  0x4a   : > { %499 = vrot.lane.b32.xlu1 %v482_v12, %s3773_s12  ;;  %v653_v20 = vpack.c.bf16 %v645_v19, %v645_v19  ;;  %v703_v22 = vld [vmem:[#allocation2 + $0x30] sm:$0xff]  ;;  %v768_v23 = vpack.c.bf16 %v760_v21, %v760_v21  ;;  %v533_v28 = vld [vmem:[#allocation2 + $0x40] sm:$0xff] }
  0x4b   : > { %554 = vrot.lane.b32.xlu2 %v3883_v13, %s3774_s17  ;;  %v711_v24 = vpack.c.bf16 %v703_v22, %v703_v22  ;;  %v817_v26 = vld [vmem:[#allocation2 + $0x32] sm:$0xff]  ;;  %v541_v29 = vpack.c.bf16 %v533_v28, %v533_v28  ;;  %v647_v31 = vld [vmem:[#allocation2 + $0x42] sm:$0xff]  ;;  %409 = vst.msk [vmem:[#allocation4 + $0x4] sm:$0xf] %vm407_vm2, %v3883_v13 }
  0x4c   : > { %v825_v27 = vpack.c.bf16 %v817_v26, %v817_v26  ;;  %v655_v32 = vpack.c.bf16 %v647_v31, %v647_v31  ;;  %v761_v33 = vld [vmem:[#allocation2 + $0x41] sm:$0xff]  ;;  %v705_v35 = vld [vmem:[#allocation2 + $0x50] sm:$0xff]  ;;  %410 = vst.msk [vmem:[#allocation4 + $0x8] sm:$0xf] %vm407_vm2, %v3891_v18 }
  0x4d   : > { %v769_v34 = vpack.c.bf16 %v761_v33, %v761_v33  ;;  %v713_v36 = vpack.c.bf16 %v705_v35, %v705_v35  ;;  %v819_v38 = vld [vmem:[#allocation2 + $0x52] sm:$0xff]  ;;  %v535_v45 = vld [vmem:[#allocation2 + $0x60] sm:$0xff]  ;;  %411 = vst.msk [vmem:[#allocation4 + $0xc] sm:$0xf] %vm407_vm2, %v711_v24 }
  0x4e   : > { %v827_v39 = vpack.c.bf16 %v819_v38, %v819_v38  ;;  %v421_v40 = vld [vmem:[#allocation2 + $0x51] sm:$0xff]  ;;  %v543_v47 = vpack.c.bf16 %v535_v45, %v535_v45  ;;  %412 = vst.msk [vmem:[#allocation4 + $0x10] sm:$0xf] %vm407_vm2, %v541_v29  ;;  %v592_v49 = vld [vmem:[#allocation2 + $0x61] sm:$0xff] }
  0x4f   : > { %v429_v41 = vpack.c.bf16 %v421_v40, %v421_v40  ;;  %v707_v46 = vld [vmem:[#allocation2 + $0x70] sm:$0xff]  ;;  %413 = vst.msk [vmem:[#allocation4 + $0x14] sm:$0xf] %vm407_vm2, %v713_v36  ;;  %v600_v52 = vpack.c.bf16 %v592_v49, %v592_v49  ;;  %v820_v54 = vld [vmem:[#allocation2 + $0x62] sm:$0xff] }
  0x50   : > { %v3939_v48 = vpack.c.bf16 %v707_v46, %v707_v46  ;;  %414 = vst.msk [vmem:[#allocation4 + $0x18] sm:$0xf] %vm407_vm2, %v543_v47  ;;  %v828_v58 = vpack.c.bf16 %v820_v54, %v820_v54  ;;  %v764_v60 = vld [vmem:[#allocation2 + $0x71] sm:$0xff]  ;;  %v3579_v8 = vld [vmem:[%s4643_s2] sm:$0xff] }
  0x51   : > { %611 = vrot.lane.b32.xlu0 %v425_v11, %s3775_s18  ;;  %v772_v63 = vpack.c.bf16 %v764_v60, %v764_v60  ;;  %v480_v5 = vld [vmem:[#allocation2 + $0x72] sm:$0xff]  ;;  %965 = vmatpush.bf16.msra.mxu0 %v3579_v8  ;;  %v708_v17 = vld [vmem:[#allocation2 + $0x80] sm:$0xff] }
  0x52   : > { %613 = vrot.lane.b32.xlu1 %v596_v15, %s3775_s18  ;;  %415 = vst.msk [vmem:[#allocation4 + $0x1c] sm:$0xf] %vm407_vm2, %v3939_v48  ;;  %v488_v7 = vpack.c.bf16 %v480_v5, %v480_v5  ;;  %v651_v19 = vld [vmem:[#allocation2 + $0x82] sm:$0xff] }
  0x53   : > { %556 = vrot.lane.b32.xlu2 %v3891_v18, %s3774_s17 }
  0x59   : > { %670 = vrot.lane.b32.xlu0 %v653_v20, %s3776_s19 }
  0x5a   : > { %726 = vrot.lane.b32.xlu1 %v3891_v18, %s3777_s20  ;;  %v716_v18 = vpack.c.bf16 %v708_v17, %v708_v17  ;;  %v3624_v17 = vld [vmem:[%s4645_s4 + $0x28] sm:$0xff] }
  0x5b   : > { %668 = vrot.lane.b32.xlu2 %v482_v12, %s3776_s19  ;;  %v594_v12 = vld [vmem:[#allocation2 + $0x81] sm:$0xff] }
  0x5c   : > { %v602_v16 = vpack.c.bf16 %v594_v12, %v594_v12 }
  0x61   : > { %783 = vrot.lane.b32.xlu0 %v596_v15, %s3778_s21 }
  0x62   : > { %785 = vrot.lane.b32.xlu1 %v768_v23, %s3778_s21 }
  0x63   : > { %728 = vrot.lane.b32.xlu2 %v711_v24, %s3777_s20 }
  0x69   : > { %842 = vrot.lane.b32.xlu0 %v825_v27, %s3779_s22 }
  0x6a   : > { %444 = vrot.lane.b32.xlu1 %v596_v15, %s3772_s11 }
  0x6b   : > { %840 = vrot.lane.b32.xlu2 %v653_v20, %s3779_s22 }
  0x71   : > { %501 = vrot.lane.b32.xlu0 %v653_v20, %s3773_s12 }
  0x72   : > { %503 = vrot.lane.b32.xlu1 %v825_v27, %s3773_s12 }
  0x73   : > { %446 = vrot.lane.b32.xlu2 %v768_v23, %s3772_s11 }
  0x79   : > { %560 = vrot.lane.b32.xlu0 %v541_v29, %s3774_s17 }
  0x7a   : > { %615 = vrot.lane.b32.xlu1 %v768_v23, %s3775_s18  ;;  %v659_v23 = vpack.c.bf16 %v651_v19, %v651_v19  ;;  %v3630_v19 = vld [vmem:[%s4645_s4 + $0x58] sm:$0xff] }
  0x7b   : > { %558 = vrot.lane.b32.xlu2 %v711_v24, %s3774_s17  ;;  %v766_v24 = vld [vmem:[#allocation2 + $0x91] sm:$0xff] }
  0x7c   : > { %v774_v30 = vpack.c.bf16 %v766_v24, %v766_v24  ;;  %v1046_v24 = vld [vmem:[#allocation3 + $0x1] sm:$0xff] }
  0x81   : > { %672 = vrot.lane.b32.xlu0 %v825_v27, %s3776_s19  ;;  %v709_v27 = vld [vmem:[#allocation2 + $0x90] sm:$0xff] }
  0x82   : > { %674 = vrot.lane.b32.xlu1 %v655_v32, %s3776_s19  ;;  %v717_v31 = vpack.c.bf16 %v709_v27, %v709_v27  ;;  %v1054_v27 = vpack.c.bf16 %v1046_v24, %v1046_v24 }
  0x83   : > { %617 = vrot.lane.b32.xlu2 %v769_v34, %s3775_s18 }
  0x84   : > { %1062 = vst [vmem:[#allocation5 + $0x4] sm:$0xf] %v1054_v27 }
  0x89   : > { %732 = vrot.lane.b32.xlu0 %v713_v36, %s3777_s20 }
  0x8a   : > { %787 = vrot.lane.b32.xlu1 %v769_v34, %s3778_s21 }
  0x8b   : > { %730 = vrot.lane.b32.xlu2 %v541_v29, %s3777_s20 }
  0x8c   : > { %v441_v43 = vpop.permute.xlu0 %440 }
  0x8d   : > { %465 = vst.msk [vmem:[#allocation4] sm:$0xf] %vm464_vm3, %v441_v43 }
  0x91   : > { %844 = vrot.lane.b32.xlu0 %v655_v32, %s3779_s22 }
  0x92   : > { %846 = vrot.lane.b32.xlu1 %v827_v39, %s3779_s22 }
  0x93   : > { %789 = vrot.lane.b32.xlu2 %v429_v41, %s3778_s21 }
  0x99   : > { %450 = vrot.lane.b32.xlu0 %v429_v41, %s3772_s11 }
  0x9a   : > { %505 = vrot.lane.b32.xlu1 %v655_v32, %s3773_s12  ;;  %v823_v32 = vld [vmem:[#allocation2 + $0x92] sm:$0xff] }
  0x9b   : > { %448 = vrot.lane.b32.xlu2 %v769_v34, %s3772_s11  ;;  %v831_v38 = vpack.c.bf16 %v823_v32, %v823_v32  ;;  %v3647_v32 = vld [vmem:[%s4645_s4 + $0xe0] sm:$0xff] }
  0xa1   : > { %562 = vrot.lane.b32.xlu0 %v713_v36, %s3774_s17 }
  0xa2   : > { %564 = vrot.lane.b32.xlu1 %v543_v47, %s3774_s17 }
  0xa3   : > { %507 = vrot.lane.b32.xlu2 %v827_v39, %s3773_s12  ;;  %v498_v50 = vpop.permute.xlu1 %497 }
  0xa4   : > { %522 = vst.msk [vmem:[#allocation4] sm:$0xf] %vm521_vm4, %v498_v50 }
  0xa5   : > { %v555_v51 = vpop.permute.xlu2 %554 }
  0xa6   : > { %579 = vst.msk [vmem:[#allocation4] sm:$0xf] %vm578_vm5, %v555_v51 }
  0xa9   : > { %621 = vrot.lane.b32.xlu0 %v600_v52, %s3775_s18 }
  0xaa   : > { %676 = vrot.lane.b32.xlu1 %v827_v39, %s3776_s19 }
  0xab   : > { %619 = vrot.lane.b32.xlu2 %v429_v41, %s3775_s18 }
  0xad   : > { %v557_v53 = vpop.permute.xlu2 %556 }
  0xb1   : > { %734 = vrot.lane.b32.xlu0 %v543_v47, %s3777_s20 }
  0xb2   : > { %736 = vrot.lane.b32.xlu1 %v3939_v48, %s3777_s20 }
  0xb3   : > { %678 = vrot.lane.b32.xlu2 %v828_v58, %s3776_s19 }
  0xb5   : > { %v669_v62 = vpop.permute.xlu2 %668 }
  0xb9   : > { %793 = vrot.lane.b32.xlu0 %v772_v63, %s3778_s21 }
  0xba   : > { %848 = vrot.lane.b32.xlu1 %v828_v58, %s3779_s22 }
  0xbb   : > { %791 = vrot.lane.b32.xlu2 %v600_v52, %s3778_s21  ;;  %v443_v2 = vpop.permute.xlu0 %442 }
  0xbc   : > { %v500_v3 = vpop.permute.xlu1 %499  ;;  %466 = vst.msk [vmem:[#allocation4 + $0x4] sm:$0xf] %vm464_vm3, %v443_v2 }
  0xbd   : > { %v729_v4 = vpop.permute.xlu2 %728  ;;  %523 = vst.msk [vmem:[#allocation4 + $0x4] sm:$0xf] %vm521_vm4, %v500_v3 }
  0xbe   : > { %580 = vst.msk [vmem:[#allocation4 + $0x4] sm:$0xf] %vm578_vm5, %v557_v53 }
  0xc1   : > { %452 = vrot.lane.b32.xlu0 %v600_v52, %s3772_s11 }
  0xc2   : > { %454 = vrot.lane.b32.xlu1 %v772_v63, %s3772_s11 }
  0xc3   : > { %850 = vrot.lane.b32.xlu2 %v488_v7, %s3779_s22  ;;  %v612_v9 = vpop.permute.xlu0 %611 }
  0xc4   : > { %v614_v10 = vpop.permute.xlu1 %613  ;;  %636 = vst.msk [vmem:[#allocation4] sm:$0xf] %vm635_vm7, %v612_v9 }
  0xc5   : > { %v841_v11 = vpop.permute.xlu2 %840  ;;  %693 = vst.msk [vmem:[#allocation4] sm:$0xf] %vm692_vm8, %v669_v62 }
  0xc6   : > { %637 = vst.msk [vmem:[#allocation4 + $0x4] sm:$0xf] %vm635_vm7, %v614_v10  ;;  %v3626_v10 = vld [vmem:[%s4645_s4 + $0x38] sm:$0xff] }
  0xc7   : > { %2043 = vmatpush.bf16.msra.mxu1 %v3626_v10  ;;  %3699 = vmatpush.bf16.msra.mxu3 %v3626_v10  ;;  %v3657_v10 = vld [vmem:[%s4645_s4 + $0x130] sm:$0xff] }
  0xc9   : > { %511 = vrot.lane.b32.xlu0 %v488_v7, %s3773_s12 }
  0xca   : > { %566 = vrot.lane.b32.xlu1 %v3939_v48, %s3774_s17 }
  0xcb   : > { %509 = vrot.lane.b32.xlu2 %v828_v58, %s3773_s12  ;;  %v671_v13 = vpop.permute.xlu0 %670 }
  0xcc   : > { %v727_v14 = vpop.permute.xlu1 %726  ;;  %694 = vst.msk [vmem:[#allocation4 + $0x4] sm:$0xf] %vm692_vm8, %v671_v13  ;;  %v3625_v13 = vld [vmem:[%s4645_s4 + $0x30] sm:$0xff] }
  0xcd   : > { %v447_v15 = vpop.permute.xlu2 %446  ;;  %752 = vst.msk [vmem:[#allocation4 + $0x4] sm:$0xf] %vm750_vm9, %v729_v4  ;;  %2044 = vmatpush.bf16.msra.mxu1 %v3625_v13  ;;  %3700 = vmatpush.bf16.msra.mxu3 %v3625_v13  ;;  %v3656_v13 = vld [vmem:[%s4645_s4 + $0x128] sm:$0xff] }
  0xce   : > { %751 = vst.msk [vmem:[#allocation4] sm:$0xf] %vm750_vm9, %v727_v14  ;;  %v3631_v14 = vld [vmem:[%s4645_s4 + $0x60] sm:$0xff] }
  0xcf   : > { %468 = vst.msk [vmem:[#allocation4 + $0xc] sm:$0xf] %vm464_vm3, %v447_v15 }
  0xd1   : > { %623 = vrot.lane.b32.xlu0 %v772_v63, %s3775_s18  ;;  %2045 = vmatpush.bf16.msra.mxu1 %v3624_v17 }
  0xd2   : > { %625 = vrot.lane.b32.xlu1 %v602_v16, %s3775_s18  ;;  %3701 = vmatpush.bf16.msra.mxu3 %v3624_v17 }
  0xd3   : > { %568 = vrot.lane.b32.xlu2 %v716_v18, %s3774_s17  ;;  %v784_v20 = vpop.permute.xlu0 %783 }
  0xd4   : > { %v786_v21 = vpop.permute.xlu1 %785  ;;  %808 = vst.msk [vmem:[#allocation4] sm:$0xf] %vm807_vm10, %v784_v20 }
  0xd5   : > { %v559_v22 = vpop.permute.xlu2 %558  ;;  %865 = vst.msk [vmem:[#allocation4] sm:$0xf] %vm864_vm11, %v841_v11  ;;  %v3632_v11 = vld [vmem:[%s4645_s4 + $0x68] sm:$0xff] }
  0xd6   : > { %809 = vst.msk [vmem:[#allocation4 + $0x4] sm:$0xf] %vm807_vm10, %v786_v21  ;;  %v3623_v21 = vld [vmem:[%s4645_s4 + $0x20] sm:$0xff] }
  0xd7   : > { %2046 = vmatpush.bf16.msra.mxu1 %v3623_v21  ;;  %3702 = vmatpush.bf16.msra.mxu3 %v3623_v21 }
  0xd9   : > { %682 = vrot.lane.b32.xlu0 %v659_v23, %s3776_s19 }
  0xda   : > { %738 = vrot.lane.b32.xlu1 %v716_v18, %s3777_s20  ;;  %v3650_v18 = vld [vmem:[%s4645_s4 + $0xf8] sm:$0xff] }
  0xdb   : > { %680 = vrot.lane.b32.xlu2 %v488_v7, %s3776_s19  ;;  %v843_v25 = vpop.permute.xlu0 %842  ;;  %v3633_v7 = vld [vmem:[%s4645_s4 + $0x70] sm:$0xff]  ;;  %2130 = vmatpush.bf16.msrb.mxu0 %v3650_v18  ;;  %v3654_v18 = vld [vmem:[%s4645_s4 + $0x118] sm:$0xff] }
  0xdc   : > { %v445_v26 = vpop.permute.xlu1 %444  ;;  %v3067_v28 = vld [vmem:[#allocation4] sm:$0xf]  ;;  %866 = vst.msk [vmem:[#allocation4 + $0x4] sm:$0xf] %vm864_vm11, %v843_v25  ;;  %2073 = vmatpush.bf16.msra.mxu2 %v3633_v7 }
  0xdd   : > { %v618_v29 = vpop.permute.xlu2 %617  ;;  %2370 = vst.msk [vmem:[#allocation4] sm:$0xf] %vm407_vm2, %v3927_v44 }
  0xde   : > { %467 = vst.msk [vmem:[#allocation4 + $0x8] sm:$0xf] %vm464_vm3, %v445_v26 }
  0xe0   : > { %2074 = vmatpush.bf16.msra.mxu2 %v3632_v11 }
  0xe1   : > { %795 = vrot.lane.b32.xlu0 %v602_v16, %s3778_s21 }
  0xe2   : > { %797 = vrot.lane.b32.xlu1 %v774_v30, %s3778_s21  ;;  %v3628_v30 = vld [vmem:[%s4645_s4 + $0x48] sm:$0xff] }
  0xe3   : > { %740 = vrot.lane.b32.xlu2 %v717_v31, %s3777_s20  ;;  %v502_v33 = vpop.permute.xlu0 %501  ;;  %v3575_v35 = vld [vmem:[#allocation4] sm:$0xf0]  ;;  %v3621_v31 = vld [vmem:[%s4645_s4 + $0x10] sm:$0xff] }
  0xe4   : > { %v504_v34 = vpop.permute.xlu1 %503  ;;  %524 = vst.msk [vmem:[#allocation4 + $0x8] sm:$0xf] %vm521_vm4, %v502_v33  ;;  %v3068_v36 = vor.u32 %v3575_v35, %v3067_v28  ;;  %2075 = vmatpush.bf16.msra.mxu2 %v3631_v14  ;;  %v3622_v28 = vld [vmem:[%s4645_s4 + $0x18] sm:$0xff]  ;;  %v3627_v33 = vld [vmem:[%s4645_s4 + $0x40] sm:$0xff] }
  0xe5   : > { %v731_v37 = vpop.permute.xlu2 %730  ;;  %581 = vst.msk [vmem:[#allocation4 + $0x8] sm:$0xf] %vm578_vm5, %v559_v22  ;;  %v3649_v22 = vld [vmem:[%s4645_s4 + $0xf0] sm:$0xff]  ;;  %2047 = vmatpush.bf16.msra.mxu1 %v3622_v28  ;;  %3703 = vmatpush.bf16.msra.mxu3 %v3622_v28  ;;  %v1022_v35 = vld [vmem:[#allocation3] sm:$0xff] }
  0xe6   : > { %525 = vst.msk [vmem:[#allocation4 + $0xc] sm:$0xf] %vm521_vm4, %v504_v34  ;;  %3097 = vmatmul.msk.bf16.vlgmr.msra.gmra.mxu0 %vm941_vm12, %v3068_v36  ;;  %v3655_v14 = vld [vmem:[%s4645_s4 + $0x120] sm:$0xff] }
  0xe7   : > { %2131 = vmatpush.bf16.msrb.mxu0 %v3649_v22  ;;  %v3652_v22 = vld [vmem:[%s4645_s4 + $0x108] sm:$0xff] }
  0xe8   : > { %2076 = vmatpush.bf16.msra.mxu2 %v3630_v19  ;;  %v3653_v19 = vld [vmem:[%s4645_s4 + $0x110] sm:$0xff] }
  0xe9   : > { %854 = vrot.lane.b32.xlu0 %v831_v38, %s3779_s22  ;;  %2048 = vmatpush.bf16.msra.mxu1 %v3621_v31  ;;  %v1030_v38 = vpack.c.bf16 %v1022_v35, %v1022_v35 }
  0xea   : > { %3704 = vmatpush.bf16.msra.mxu3 %v3621_v31 }
  0xeb   : > { %852 = vrot.lane.b32.xlu2 %v659_v23, %s3779_s22  ;;  %v561_v39 = vpop.permute.xlu0 %560  ;;  %v3629_v23 = vld [vmem:[%s4645_s4 + $0x50] sm:$0xff]  ;;  %1038 = vst [vmem:[#allocation5] sm:$0xf] %v1030_v38 }
  0xec   : > { %v616_v40 = vpop.permute.xlu1 %615  ;;  %582 = vst.msk [vmem:[#allocation4 + $0xc] sm:$0xf] %vm578_vm5, %v561_v39  ;;  %2077 = vmatpush.bf16.msra.mxu2 %v3629_v23  ;;  %v3620_v39 = vld [vmem:[%s4645_s4 + $0x8] sm:$0xff] }
  0xed   : > { %v790_v41 = vpop.permute.xlu2 %789  ;;  %639 = vst.msk [vmem:[#allocation4 + $0xc] sm:$0xf] %vm635_vm7, %v618_v29  ;;  %v3648_v29 = vld [vmem:[%s4645_s4 + $0xe8] sm:$0xff]  ;;  %2049 = vmatpush.bf16.msra.mxu1 %v3620_v39 }
  0xee   : > { %638 = vst.msk [vmem:[#allocation4 + $0x8] sm:$0xf] %vm635_vm7, %v616_v40  ;;  %2132 = vmatpush.bf16.msrb.mxu0 %v3648_v29  ;;  %v3646_v40 = vld [vmem:[%s4645_s4 + $0xd8] sm:$0xff]  ;;  %3705 = vmatpush.bf16.msra.mxu3 %v3620_v39 }
  0xf0   : > { %2078 = vmatpush.bf16.msra.mxu2 %v3628_v30 }
  0xf2   : > { %2133 = vmatpush.bf16.msrb.mxu0 %v3647_v32 }
  0xf3   : > { %v673_v42 = vpop.permute.xlu0 %672 }
  0xf4   : > { %v675_v43 = vpop.permute.xlu1 %674  ;;  %695 = vst.msk [vmem:[#allocation4 + $0x8] sm:$0xf] %vm692_vm8, %v673_v42  ;;  %2079 = vmatpush.bf16.msra.mxu2 %v3627_v33 }
  0xf5   : > { %v449_v44 = vpop.permute.xlu2 %448  ;;  %753 = vst.msk [vmem:[#allocation4 + $0x8] sm:$0xf] %vm750_vm9, %v731_v37 }
  0xf6   : > { %696 = vst.msk [vmem:[#allocation4 + $0xc] sm:$0xf] %vm692_vm8, %v675_v43  ;;  %2134 = vmatpush.bf16.msrb.mxu0 %v3646_v40  ;;  %v3619_v43 = vld [vmem:[%s4645_s4] sm:$0xff] }
  0xf7   : > { %469 = vst.msk [vmem:[#allocation4 + $0x10] sm:$0xf] %vm464_vm3, %v449_v44  ;;  %v3645_v44 = vld [vmem:[%s4645_s4 + $0xd0] sm:$0xff]  ;;  %2050 = vmatpush.bf16.msra.mxu1 %v3619_v43  ;;  %3706 = vmatpush.bf16.msra.mxu3 %v3619_v43 }
  0xfa   : > { %2135 = vmatpush.bf16.msrb.mxu0 %v3645_v44 }
  0xfb   : > { %v733_v45 = vpop.permute.xlu0 %732 }
  0xfc   : > { %v788_v46 = vpop.permute.xlu1 %787  ;;  %754 = vst.msk [vmem:[#allocation4 + $0xc] sm:$0xf] %vm750_vm9, %v733_v45 }
  0xfd   : > { %v508_v47 = vpop.permute.xlu2 %507  ;;  %811 = vst.msk [vmem:[#allocation4 + $0xc] sm:$0xf] %vm807_vm10, %v790_v41  ;;  %v1070_v41 = vld [vmem:[#allocation3 + $0x2] sm:$0xff] }
  0xfe   : > { %810 = vst.msk [vmem:[#allocation4 + $0x8] sm:$0xf] %vm807_vm10, %v788_v46  ;;  %v1078_v42 = vpack.c.bf16 %v1070_v41, %v1070_v41  ;;  %v3644_v46 = vld [vmem:[%s4645_s4 + $0xc8] sm:$0xff] }
  0xff   : > { %2136 = vmatpush.bf16.msrb.mxu0 %v3644_v46 }
 0x100   : > { %1086 = vst [vmem:[#allocation5 + $0x8] sm:$0xf] %v1078_v42 }
 0x103   : > { %v845_v48 = vpop.permute.xlu0 %844 }
 0x104   : > { %v847_v49 = vpop.permute.xlu1 %846  ;;  %867 = vst.msk [vmem:[#allocation4 + $0x8] sm:$0xf] %vm864_vm11, %v845_v48  ;;  %v4140_v48 = vld [vmem:[%s4644_s3] ss:$0 sm:$0xff] }
 0x105   : > { %v620_v50 = vpop.permute.xlu2 %619  ;;  %868 = vst.msk [vmem:[#allocation4 + $0xc] sm:$0xf] %vm864_vm11, %v847_v49 }
 0x10b   : > { %v451_v51 = vpop.permute.xlu0 %450 }
 0x10c   : > { %v506_v52 = vpop.permute.xlu1 %505  ;;  %470 = vst.msk [vmem:[#allocation4 + $0x14] sm:$0xf] %vm464_vm3, %v451_v51  ;;  %v3576_v53 = vld [vmem:[#allocation4 + $0x8] sm:$0xff] }
 0x10d   : > { %527 = vst.msk [vmem:[#allocation4 + $0x14] sm:$0xf] %vm521_vm4, %v508_v47  ;;  %3098 = vmatmul.msk.bf16.gmra.mxu0 %vm941_vm12, %v3576_v53  ;;  %v679_v54 = vpop.permute.xlu2 %678  ;;  %v3643_v47 = vld [vmem:[%s4645_s4 + $0xc0] sm:$0xff] }
 0x10e   : > { %526 = vst.msk [vmem:[#allocation4 + $0x10] sm:$0xf] %vm521_vm4, %v506_v52  ;;  %2137 = vmatpush.bf16.msrb.mxu0 %v3643_v47 }
 0x113   : > { %v563_v55 = vpop.permute.xlu0 %562 }
 0x114   : > { %v565_v56 = vpop.permute.xlu1 %564  ;;  %583 = vst.msk [vmem:[#allocation4 + $0x10] sm:$0xf] %vm578_vm5, %v563_v55 }
 0x115   : > { %640 = vst.msk [vmem:[#allocation4 + $0x10] sm:$0xf] %vm635_vm7, %v620_v50  ;;  %v792_v57 = vpop.permute.xlu2 %791  ;;  %v4142_v50 = vstv %s390_s16 }
 0x116   : > { %584 = vst.msk [vmem:[#allocation4 + $0x14] sm:$0xf] %vm578_vm5, %v565_v56 }
 0x11b   : > { %v622_v58 = vpop.permute.xlu0 %621 }
 0x11c   : > { %v677_v59 = vpop.permute.xlu1 %676  ;;  %641 = vst.msk [vmem:[#allocation4 + $0x14] sm:$0xf] %vm635_vm7, %v622_v58 }
 0x11d   : > { %698 = vst.msk [vmem:[#allocation4 + $0x14] sm:$0xf] %vm692_vm8, %v679_v54  ;;  %v851_v60 = vpop.permute.xlu2 %850 }
 0x11e   : > { %697 = vst.msk [vmem:[#allocation4 + $0x10] sm:$0xf] %vm692_vm8, %v677_v59 }
 0x123   : > { %v735_v61 = vpop.permute.xlu0 %734 }
 0x124   : > { %v737_v62 = vpop.permute.xlu1 %736  ;;  %755 = vst.msk [vmem:[#allocation4 + $0x10] sm:$0xf] %vm750_vm9, %v735_v61  ;;  %v3583_v61 = vld [vmem:[#allocation5 + $0x4] sm:$0xf] }
 0x125   : > { %812 = vst.msk [vmem:[#allocation4 + $0x10] sm:$0xf] %vm807_vm10, %v792_v57  ;;  %v510_v63 = vpop.permute.xlu2 %509 }
 0x126   : > { %756 = vst.msk [vmem:[#allocation4 + $0x14] sm:$0xf] %vm750_vm9, %v737_v62 }
 0x12b   : > { %v794_v0 = vpop.permute.xlu0 %793 }
 0x12c   : > { %v849_v1 = vpop.permute.xlu1 %848  ;;  %813 = vst.msk [vmem:[#allocation4 + $0x14] sm:$0xf] %vm807_vm10, %v794_v0 }
 0x12d   : > { %870 = vst.msk [vmem:[#allocation4 + $0x14] sm:$0xf] %vm864_vm11, %v851_v60  ;;  %v569_v4 = vpop.permute.xlu2 %568 }
 0x12e   : > { %869 = vst.msk [vmem:[#allocation4 + $0x10] sm:$0xf] %vm864_vm11, %v849_v1 }
 0x133   : > { %v453_v2 = vpop.permute.xlu0 %452 }
 0x134   : > { %v455_v3 = vpop.permute.xlu1 %454  ;;  %471 = vst.msk [vmem:[#allocation4 + $0x18] sm:$0xf] %vm464_vm3, %v453_v2 }
 0x135   : > { %v3577_v5 = vld [vmem:[#allocation4 + $0x10] sm:$0xff]  ;;  %472 = vst.msk [vmem:[#allocation4 + $0x1c] sm:$0xf] %vm464_vm3, %v455_v3  ;;  %v681_v12 = vpop.permute.xlu2 %680 }
 0x136   : > { %528 = vst.msk [vmem:[#allocation4 + $0x18] sm:$0xf] %vm521_vm4, %v510_v63  ;;  %3099 = vmatmul.msk.bf16.gmra.mxu0 %vm941_vm12, %v3577_v5 }
 0x13b   : > { %v512_v8 = vpop.permute.xlu0 %511 }
 0x13c   : > { %v567_v9 = vpop.permute.xlu1 %566  ;;  %529 = vst.msk [vmem:[#allocation4 + $0x1c] sm:$0xf] %vm521_vm4, %v512_v8 }
 0x13d   : > { %585 = vst.msk [vmem:[#allocation4 + $0x18] sm:$0xf] %vm578_vm5, %v567_v9  ;;  %v741_v20 = vpop.permute.xlu2 %740  ;;  %v3104_v9 = vld [vmem:[#allocation5] sm:$0xf] }
 0x13e   : > { %586 = vst.msk [vmem:[#allocation4 + $0x1c] sm:$0xf] %vm578_vm5, %v569_v4  ;;  %v3658_v4 = vld [vmem:[%s4645_s4 + $0x138] sm:$0xff] }
 0x13f   : > { %2159 = vmatpush.bf16.msrb.mxu1 %v3658_v4 }
 0x143   : > { %v624_v15 = vpop.permute.xlu0 %623  ;;  %2160 = vmatpush.bf16.msrb.mxu1 %v3657_v10  ;;  %v3666_v10 = vld [vmem:[%s4645_s4 + $0x178] sm:$0xff] }
 0x144   : > { %v626_v16 = vpop.permute.xlu1 %625  ;;  %642 = vst.msk [vmem:[#allocation4 + $0x18] sm:$0xf] %vm635_vm7, %v624_v15  ;;  %2188 = vmatpush.bf16.msrb.mxu2 %v3666_v10 }
 0x145   : > { %643 = vst.msk [vmem:[#allocation4 + $0x1c] sm:$0xf] %vm635_vm7, %v626_v16  ;;  %v853_v34 = vpop.permute.xlu2 %852 }
 0x146   : > { %699 = vst.msk [vmem:[#allocation4 + $0x18] sm:$0xf] %vm692_vm8, %v681_v12 }
 0x147   : > { %2161 = vmatpush.bf16.msrb.mxu1 %v3656_v13 }
 0x14b   : > { %v683_v25 = vpop.permute.xlu0 %682  ;;  %2162 = vmatpush.bf16.msrb.mxu1 %v3655_v14 }
 0x14c   : > { %v739_v26 = vpop.permute.xlu1 %738  ;;  %700 = vst.msk [vmem:[#allocation4 + $0x1c] sm:$0xf] %vm692_vm8, %v683_v25 }
 0x14d   : > { %757 = vst.msk [vmem:[#allocation4 + $0x18] sm:$0xf] %vm750_vm9, %v739_v26  ;;  %v3651_v26 = vld [vmem:[%s4645_s4 + $0x100] sm:$0xff] }
 0x14e   : > { %758 = vst.msk [vmem:[#allocation4 + $0x1c] sm:$0xf] %vm750_vm9, %v741_v20 }
 0x14f   : > { %2163 = vmatpush.bf16.msrb.mxu1 %v3654_v18  ;;  %v3665_v18 = vld [vmem:[%s4645_s4 + $0x170] sm:$0xff] }
 0x150   : > { %2189 = vmatpush.bf16.msrb.mxu2 %v3665_v18 }
 0x153   : > { %v796_v36 = vpop.permute.xlu0 %795  ;;  %2164 = vmatpush.bf16.msrb.mxu1 %v3653_v19  ;;  %v3642_v19 = vld [vmem:[%s4645_s4 + $0xb8] sm:$0xff] }
 0x154   : > { %v798_v37 = vpop.permute.xlu1 %797  ;;  %814 = vst.msk [vmem:[#allocation4 + $0x18] sm:$0xf] %vm807_vm10, %v796_v36  ;;  %2101 = vmatpush.bf16.msrb.mxu3 %v3642_v19  ;;  %v3675_v19 = vld [vmem:[%s4645_s4 + $0x1c0] sm:$0xff] }
 0x155   : > { %815 = vst.msk [vmem:[#allocation4 + $0x1c] sm:$0xf] %vm807_vm10, %v798_v37 }
 0x156   : > { %871 = vst.msk [vmem:[#allocation4 + $0x18] sm:$0xf] %vm864_vm11, %v853_v34 }
 0x157   : > { %2165 = vmatpush.bf16.msrb.mxu1 %v3652_v22  ;;  %v3690_v22 = vld [vmem:[%s4645_s4 + $0x238] sm:$0xff] }
 0x15b   : > { %v855_v45 = vpop.permute.xlu0 %854  ;;  %2166 = vmatpush.bf16.msrb.mxu1 %v3651_v26 }
 0x15c   : > { %872 = vst.msk [vmem:[#allocation4 + $0x1c] sm:$0xf] %vm864_vm11, %v855_v45 }
 0x163   : > { %v967_v49 = vpop.f32.mrf.mxu0  ;;  %v3578_v51 = vld [vmem:[#allocation4 + $0x18] sm:$0xff] }
 0x164   : > { %v968_v52 = vadd.f32 %v4140_v48, %v967_v49  ;;  %3100 = vmatmul.msk.bf16.gmra.mxu0 %vm941_vm12, %v3578_v51 }
 0x166   : > { %vm987_vm13 = vcmp.ge.f32.partialorder %v968_v52, 0.0  ;;  %v996_v53 = vmul.f32 %v4142_v50, %v968_v52 }
 0x168   : > { %v1004_v54 = vsel %vm987_vm13, %v968_v52, %v996_v53 }
 0x169   : > { %1013 = vst [vmem:[#allocation3 + $0x11] sm:$0xff] %v1004_v54  ;;  %v1055_v55 = vpack.c.bf16 %v1004_v54, %v1004_v54 }
 0x16b   : > { %v969_v56 = vpop.f32.mrf.mxu0  ;;  %1063 = vst [vmem:[#allocation5 + $0x28] sm:$0xf] %v1055_v55 }
 0x16c   : > { %v970_v57 = vadd.f32 %v4140_v48, %v969_v56  ;;  %1134 = vst [vmem:[#allocation5 + $0x10] sm:$0xf] %v1055_v55 }
 0x16e   : > { %vm988_vm14 = vcmp.ge.f32.partialorder %v970_v57, 0.0  ;;  %v997_v58 = vmul.f32 %v4142_v50, %v970_v57 }
 0x170   : > { %v1094_v59 = vld [vmem:[#allocation3 + $0x10] sm:$0xff]  ;;  %v1005_v60 = vsel %vm988_vm14, %v970_v57, %v997_v58 }
 0x171   : > { %v1071_v62 = vld [vmem:[#allocation3 + $0x12] sm:$0xff]  ;;  %1014 = vst [vmem:[#allocation3 + $0x21] sm:$0xff] %v1005_v60  ;;  %v1199_v63 = vpack.c.bf16 %v1005_v60, %v1005_v60  ;;  %v1031_v0 = vpack.c.bf16 %v1094_v59, %v1094_v59 }
 0x172   : > { %v3106_v1 = vld [vmem:[#allocation5 + $0x24] sm:$0xf0]  ;;  %v1079_v3 = vpack.c.bf16 %v1071_v62, %v1071_v62 }
 0x173   : > { %1207 = vst [vmem:[#allocation5 + $0x1c] sm:$0xf] %v1199_v63  ;;  %v3109_v2 = vor.u32 %v3583_v61, %v3106_v1  ;;  %v3120_v53 = vld [vmem:[#allocation5 + $0x10] sm:$0xf] }
 0x174   : > { %1039 = vst [vmem:[#allocation5 + $0x24] sm:$0xf] %v1031_v0 }
 0x175   : > { %2080 = vmatmul.bf16.vlgmr.msra.gmra.mxu2 %v3109_v2  ;;  %1110 = vst [vmem:[#allocation5 + $0xc] sm:$0xf] %v1031_v0 }
 0x176   : > { %1064 = vst [vmem:[#allocation5 + $0x4c] sm:$0xf] %v1199_v63 }
 0x177   : > { %1135 = vst [vmem:[#allocation5 + $0x34] sm:$0xf] %v1199_v63 }
 0x178   : > { %v1095_v5 = vld [vmem:[#allocation3 + $0x20] sm:$0xff]  ;;  %1087 = vst [vmem:[#allocation5 + $0x2c] sm:$0xf] %v1079_v3 }
 0x179   : > { %v1143_v6 = vld [vmem:[#allocation3 + $0x22] sm:$0xff]  ;;  %v1175_v7 = vpack.c.bf16 %v1095_v5, %v1095_v5  ;;  %1158 = vst [vmem:[#allocation5 + $0x14] sm:$0xf] %v1079_v3 }
 0x17a   : > { %v1223_v8 = vpack.c.bf16 %v1143_v6, %v1143_v6 }
 0x17b   : > { %1183 = vst [vmem:[#allocation5 + $0x18] sm:$0xf] %v1175_v7  ;;  %v3587_v11 = vld [vmem:[#allocation5 + $0x20] sm:$0xf0] }
 0x17c   : > { %1231 = vst [vmem:[#allocation5 + $0x20] sm:$0xf] %v1223_v8  ;;  %v3105_v12 = vor.u32 %v3587_v11, %v3104_v9  ;;  %v3584_v15 = vld [vmem:[#allocation5 + $0xc] sm:$0xf] }
 0x17d   : > { %1111 = vst [vmem:[#allocation5 + $0x30] sm:$0xf] %v1175_v7  ;;  %v3592_v35 = vld [vmem:[#allocation5 + $0x4c] sm:$0xf] }
 0x17e   : > { %2051 = vmatmul.bf16.vlgmr.msra.gmra.mxu1 %v3105_v12  ;;  %1040 = vst [vmem:[#allocation5 + $0x48] sm:$0xf] %v1175_v7  ;;  %v3589_v51 = vld [vmem:[#allocation5 + $0x30] sm:$0xf0] }
 0x17f   : > { %1159 = vst [vmem:[#allocation5 + $0x38] sm:$0xf] %v1223_v8  ;;  %v3121_v55 = vor.u32 %v3589_v51, %v3120_v53  ;;  %2275 = vmatpush.bf16.msra.mxu1 %v3690_v22  ;;  %v3637_v51 = vld [vmem:[%s4645_s4 + $0x90] sm:$0xff] }
 0x180   : > { %1088 = vst [vmem:[#allocation5 + $0x50] sm:$0xf] %v1223_v8 }
 0x184   : > { %v3114_v16 = vld [vmem:[#allocation5 + $0x2c] sm:$0xf0] }
 0x185   : > { %v3117_v17 = vor.u32 %v3584_v15, %v3114_v16  ;;  %v3140_v43 = vld [vmem:[#allocation5 + $0x48] sm:$0xf] }
 0x187   : > { %2138 = vmatmul.bf16.vlgmr.msrb.gmra.mxu0 %v3117_v17 }
 0x18a   : > { %v972_v20 = vpop.f32.mrf.mxu0 }
 0x18b   : > { %v973_v21 = vadd.f32 %v4140_v48, %v972_v20  ;;  %v3664_v20 = vld [vmem:[%s4645_s4 + $0x168] sm:$0xff] }
 0x18c   : > { %2190 = vmatpush.bf16.msrb.mxu2 %v3664_v20 }
 0x18d   : > { %vm989_vm15 = vcmp.ge.f32.partialorder %v973_v21, 0.0  ;;  %v998_v23 = vmul.f32 %v4142_v50, %v973_v21 }
 0x18f   : > { %v1006_v24 = vsel %vm989_vm15, %v973_v21, %v998_v23  ;;  %v3682_v21 = vld [vmem:[%s4645_s4 + $0x1f8] sm:$0xff] }
 0x190   : > { %1015 = vst [vmem:[#allocation3 + $0x31] sm:$0xff] %v1006_v24  ;;  %v1200_v25 = vpack.c.bf16 %v1006_v24, %v1006_v24  ;;  %v3641_v24 = vld [vmem:[%s4645_s4 + $0xb0] sm:$0xff]  ;;  %2246 = vmatpush.bf16.msra.mxu0 %v3682_v21 }
 0x191   : > { %2102 = vmatpush.bf16.msrb.mxu3 %v3641_v24 }
 0x192   : > { %1208 = vst [vmem:[#allocation5 + $0x40] sm:$0xf] %v1200_v25  ;;  %v974_v27 = vpop.f32.mrf.mxu0 }
 0x193   : > { %v975_v28 = vadd.f32 %v4140_v48, %v974_v27  ;;  %1065 = vst [vmem:[#allocation5 + $0x70] sm:$0xf] %v1200_v25 }
 0x194   : > { %1136 = vst [vmem:[#allocation5 + $0x58] sm:$0xf] %v1200_v25 }
 0x195   : > { %vm990_vm1 = vcmp.ge.f32.partialorder %v975_v28, 0.0  ;;  %v999_v29 = vmul.f32 %v4142_v50, %v975_v28 }
 0x197   : > { %v1168_v30 = vld [vmem:[#allocation3 + $0x30] sm:$0xff]  ;;  %v1007_v32 = vsel %vm990_vm1, %v975_v28, %v999_v29  ;;  %v3663_v29 = vld [vmem:[%s4645_s4 + $0x160] sm:$0xff] }
 0x198   : > { %v1216_v31 = vld [vmem:[#allocation3 + $0x32] sm:$0xff]  ;;  %v1176_v33 = vpack.c.bf16 %v1168_v30, %v1168_v30  ;;  %1016 = vst [vmem:[#allocation3 + $0x41] sm:$0xff] %v1007_v32  ;;  %v1129_v37 = vpack.c.bf16 %v1007_v32, %v1007_v32  ;;  %v3640_v32 = vld [vmem:[%s4645_s4 + $0xa8] sm:$0xff]  ;;  %2191 = vmatpush.bf16.msrb.mxu2 %v3663_v29 }
 0x199   : > { %v1224_v34 = vpack.c.bf16 %v1216_v31, %v1216_v31  ;;  %v3689_v30 = vld [vmem:[%s4645_s4 + $0x230] sm:$0xff]  ;;  %2103 = vmatpush.bf16.msrb.mxu3 %v3640_v32 }
 0x19a   : > { %1184 = vst [vmem:[#allocation5 + $0x3c] sm:$0xf] %v1176_v33  ;;  %v3142_v36 = vld [vmem:[#allocation5 + $0x6c] sm:$0xf0]  ;;  %2276 = vmatpush.bf16.msra.mxu1 %v3689_v30  ;;  %v3672_v30 = vld [vmem:[%s4645_s4 + $0x1a8] sm:$0xff] }
 0x19b   : > { %1232 = vst [vmem:[#allocation5 + $0x44] sm:$0xf] %v1224_v34  ;;  %v3145_v38 = vor.u32 %v3592_v35, %v3142_v36  ;;  %v3156_v6 = vld [vmem:[#allocation5 + $0x58] sm:$0xf]  ;;  %v2842_v35 = vld [vmem:[%s4647_s6 + $0x20] sm:$0xf] }
 0x19c   : > { %1041 = vst [vmem:[#allocation5 + $0x6c] sm:$0xf] %v1176_v33  ;;  %v3639_v36 = vld [vmem:[%s4645_s4 + $0xa0] sm:$0xff] }
 0x19d   : > { %2085 = vmatmul.bf16.gmra.mxu2 %v3145_v38  ;;  %1112 = vst [vmem:[#allocation5 + $0x54] sm:$0xf] %v1176_v33  ;;  %v3662_v33 = vld [vmem:[%s4645_s4 + $0x158] sm:$0xff]  ;;  %2104 = vmatpush.bf16.msrb.mxu3 %v3639_v36 }
 0x19e   : > { %1137 = vst [vmem:[#allocation5 + $0x7c] sm:$0xf] %v1129_v37  ;;  %2192 = vmatpush.bf16.msrb.mxu2 %v3662_v33 }
 0x19f   : > { %v1097_v39 = vld [vmem:[#allocation3 + $0x40] sm:$0xff]  ;;  %1066 = vst [vmem:[#allocation5 + $0x94] sm:$0xf] %v1129_v37 }
 0x1a0   : > { %v1145_v40 = vld [vmem:[#allocation3 + $0x42] sm:$0xff]  ;;  %v1105_v41 = vpack.c.bf16 %v1097_v39, %v1097_v39  ;;  %1089 = vst [vmem:[#allocation5 + $0x74] sm:$0xf] %v1224_v34  ;;  %v3681_v39 = vld [vmem:[%s4645_s4 + $0x1f0] sm:$0xff] }
 0x1a1   : > { %v1153_v42 = vpack.c.bf16 %v1145_v40, %v1145_v40  ;;  %1160 = vst [vmem:[#allocation5 + $0x5c] sm:$0xf] %v1224_v34  ;;  %v3688_v34 = vld [vmem:[%s4645_s4 + $0x228] sm:$0xff]  ;;  %v2884_v40 = vunpack.c.l.b16 %v2842_v35  ;;  %2247 = vmatpush.bf16.msra.mxu0 %v3681_v39 }
 0x1a2   : > { %1113 = vst [vmem:[#allocation5 + $0x78] sm:$0xf] %v1105_v41  ;;  %2277 = vmatpush.bf16.msra.mxu1 %v3688_v34  ;;  %v3585_v34 = vld [vmem:[#allocation5 + $0x14] sm:$0xf]  ;;  %v3588_v39 = vld [vmem:[#allocation5 + $0x28] sm:$0xf0] }
 0x1a3   : > { %v3596_v44 = vld [vmem:[#allocation5 + $0x68] sm:$0xf0]  ;;  %1042 = vst [vmem:[#allocation5 + $0x90] sm:$0xf] %v1105_v41 }
 0x1a4   : > { %v3141_v45 = vor.u32 %v3596_v44, %v3140_v43  ;;  %1161 = vst [vmem:[#allocation5 + $0x80] sm:$0xf] %v1153_v42  ;;  %v3593_v46 = vld [vmem:[#allocation5 + $0x54] sm:$0xf]  ;;  %v3638_v43 = vld [vmem:[%s4645_s4 + $0x98] sm:$0xff]  ;;  %v3680_v44 = vld [vmem:[%s4645_s4 + $0x1e8] sm:$0xff] }
 0x1a5   : > { %1209 = vst [vmem:[#allocation5 + $0x64] sm:$0xf] %v1129_v37  ;;  %v3598_v1 = vld [vmem:[#allocation5 + $0x78] sm:$0xf0]  ;;  %v1198_v37 = vld [vmem:[#allocation3 + $0x91] sm:$0xff]  ;;  %2105 = vmatpush.bf16.msrb.mxu3 %v3638_v43  ;;  %2248 = vmatpush.bf16.msra.mxu0 %v3680_v44 }
 0x1a6   : > { %2056 = vmatmul.bf16.gmra.mxu1 %v3141_v45  ;;  %1233 = vst [vmem:[#allocation5 + $0x68] sm:$0xf] %v1153_v42  ;;  %v3601_v4 = vld [vmem:[#allocation5 + $0x94] sm:$0xf]  ;;  %v3157_v9 = vor.u32 %v3598_v1, %v3156_v6  ;;  %v1206_v38 = vpack.c.bf16 %v1198_v37, %v1198_v37  ;;  %v3660_v45 = vld [vmem:[%s4645_s4 + $0x148] sm:$0xff]  ;;  %v3671_v37 = vld [vmem:[%s4645_s4 + $0x1a0] sm:$0xff] }
 0x1a7   : > { %1090 = vst [vmem:[#allocation5 + $0x98] sm:$0xf] %v1153_v42  ;;  %v3687_v42 = vld [vmem:[%s4645_s4 + $0x220] sm:$0xff]  ;;  %v3677_v6 = vld [vmem:[%s4645_s4 + $0x1d0] sm:$0xff]  ;;  %v3670_v44 = vld [vmem:[%s4645_s4 + $0x198] sm:$0xff] }
 0x1a8   : > { %1185 = vst [vmem:[#allocation5 + $0x60] sm:$0xf] %v1105_v41  ;;  %v3661_v41 = vld [vmem:[%s4645_s4 + $0x150] sm:$0xff]  ;;  %2278 = vmatpush.bf16.msra.mxu1 %v3687_v42  ;;  %v3136_v42 = vld [vmem:[#allocation5 + $0x20] sm:$0xf] }
 0x1a9   : > { %v3150_v47 = vld [vmem:[#allocation5 + $0x74] sm:$0xf0]  ;;  %1214 = vst [vmem:[#allocation5 + $0x118] sm:$0xf] %v1206_v38  ;;  %2193 = vmatpush.bf16.msrb.mxu2 %v3661_v41  ;;  %2106 = vmatpush.bf16.msrb.mxu3 %v3637_v51  ;;  %v3112_v38 = vld [vmem:[#allocation5 + $0x8] sm:$0xf] }
 0x1aa   : > { %v3153_v49 = vor.u32 %v3593_v46, %v3150_v47  ;;  %v3176_v15 = vld [vmem:[#allocation5 + $0x90] sm:$0xf]  ;;  %v3686_v46 = vld [vmem:[%s4645_s4 + $0x218] sm:$0xff]  ;;  %v2889_v47 = vpack.c.b16 %v2884_v40, %v2884_v40  ;;  %v3591_v40 = vld [vmem:[#allocation5 + $0x40] sm:$0xf0]  ;;  %v3113_v41 = vor.u32 %v3588_v39, %v3112_v38 }
 0x1ab   : > { %v3137_v43 = vor.u32 %v3591_v40, %v3136_v42 }
 0x1ac   : > { %2143 = vmatmul.bf16.gmra.mxu0 %v3153_v49  ;;  %2279 = vmatpush.bf16.msra.mxu1 %v3686_v46  ;;  %v3158_v46 = vld [vmem:[#allocation5 + $0x7c] sm:$0xf0] }
 0x1ad   : > { %2194 = vmatpush.bf16.msrb.mxu2 %v3660_v45  ;;  %v3130_v45 = vld [vmem:[#allocation5 + $0x3c] sm:$0xf0] }
 0x1b3   : > { %v977_v52 = vpop.f32.mrf.mxu0 }
 0x1b4   : > { %v978_v54 = vadd.f32 %v4140_v48, %v977_v52  ;;  %v1222_v52 = vld [vmem:[#allocation3 + $0x92] sm:$0xff] }
 0x1b6   : > { %vm991_vm13 = vcmp.ge.f32.partialorder %v978_v54, 0.0  ;;  %v1000_v56 = vmul.f32 %v4142_v50, %v978_v54  ;;  %2167 = vmatmul.bf16.vlgmr.msrb.gmra.mxu1 %v3121_v55  ;;  %v3679_v55 = vld [vmem:[%s4645_s4 + $0x1e0] sm:$0xff] }
 0x1b7   : > { %2249 = vmatpush.bf16.msra.mxu0 %v3679_v55  ;;  %v3148_v55 = vld [vmem:[#allocation5 + $0x50] sm:$0xf] }
 0x1b8   : > { %v1008_v57 = vsel %vm991_vm13, %v978_v54, %v1000_v56  ;;  %v1230_v54 = vpack.c.bf16 %v1222_v52, %v1222_v52  ;;  %v2907_v56 = vsel %vm954_vm6, %v2889_v47, 0  ;;  %v3586_v47 = vld [vmem:[#allocation5 + $0x1c] sm:$0xf] }
 0x1b9   : > { %1017 = vst [vmem:[#allocation3 + $0x51] sm:$0xff] %v1008_v57  ;;  %v1059_v58 = vpack.c.bf16 %v1008_v57, %v1008_v57  ;;  %v3133_v51 = vor.u32 %v3586_v47, %v3130_v45 }
 0x1ba   : > { %1238 = vst [vmem:[#allocation5 + $0x11c] sm:$0xf] %v1230_v54  ;;  %v3597_v54 = vld [vmem:[#allocation5 + $0x70] sm:$0xf0] }
 0x1bb   : > { %v979_v59 = vpop.f32.mrf.mxu0  ;;  %1067 = vst [vmem:[#allocation5 + $0xb8] sm:$0xf] %v1059_v58 }
 0x1bc   : > { %v980_v60 = vadd.f32 %v4140_v48, %v979_v59  ;;  %1138 = vst [vmem:[#allocation5 + $0xa0] sm:$0xf] %v1059_v58  ;;  %v3685_v59 = vld [vmem:[%s4645_s4 + $0x210] sm:$0xff] }
 0x1bd   : > { %1210 = vst [vmem:[#allocation5 + $0x88] sm:$0xf] %v1059_v58  ;;  %v3659_v58 = vld [vmem:[%s4645_s4 + $0x140] sm:$0xff]  ;;  %2280 = vmatpush.bf16.msra.mxu1 %v3685_v59 }
 0x1be   : > { %vm992_vm14 = vcmp.ge.f32.partialorder %v980_v60, 0.0  ;;  %v1001_v61 = vmul.f32 %v4142_v50, %v980_v60  ;;  %2195 = vmatpush.bf16.msrb.mxu2 %v3659_v58  ;;  %v3172_v58 = vld [vmem:[#allocation5 + $0x68] sm:$0xf] }
 0x1c0   : > { %v1009_v62 = vsel %vm992_vm14, %v980_v60, %v1001_v61  ;;  %v1027_v63 = vld [vmem:[#allocation3 + $0x50] sm:$0xff]  ;;  %v3636_v60 = vld [vmem:[%s4645_s4 + $0x88] sm:$0xff]  ;;  %v3678_v61 = vld [vmem:[%s4645_s4 + $0x1d8] sm:$0xff] }
 0x1c1   : > { %v1218_v0 = vld [vmem:[#allocation3 + $0x52] sm:$0xff]  ;;  %1018 = vst [vmem:[#allocation3 + $0x61] sm:$0xff] %v1009_v62  ;;  %v1035_v2 = vpack.c.bf16 %v1027_v63, %v1027_v63  ;;  %v1131_v3 = vpack.c.bf16 %v1009_v62, %v1009_v62  ;;  %2107 = vmatpush.bf16.msrb.mxu3 %v3636_v60  ;;  %2250 = vmatpush.bf16.msra.mxu0 %v3678_v61  ;;  %v3668_v60 = vld [vmem:[%s4645_s4 + $0x188] sm:$0xff] }
 0x1c2   : > { %v3178_v5 = vld [vmem:[#allocation5 + $0xb4] sm:$0xf0]  ;;  %v1226_v8 = vpack.c.bf16 %v1218_v0, %v1218_v0  ;;  %v1174_v62 = vld [vmem:[#allocation3 + $0x90] sm:$0xff]  ;;  %3707 = vmatpush.bf16.msra.mxu2 %v2907_v56 }
 0x1c3   : > { %1043 = vst [vmem:[#allocation5 + $0xb4] sm:$0xf] %v1035_v2  ;;  %v3181_v7 = vor.u32 %v3601_v4, %v3178_v5  ;;  %v3192_v28 = vld [vmem:[#allocation5 + $0xa0] sm:$0xf]  ;;  %v1182_v0 = vpack.c.bf16 %v1174_v62, %v1174_v62 }
 0x1c4   : > { %1114 = vst [vmem:[#allocation5 + $0x9c] sm:$0xf] %v1035_v2  ;;  %v3635_v4 = vld [vmem:[%s4645_s4 + $0x80] sm:$0xff]  ;;  %v3166_v61 = vld [vmem:[#allocation5 + $0x84] sm:$0xf0] }
 0x1c5   : > { %2090 = vmatmul.bf16.gmra.mxu2 %v3181_v7  ;;  %1139 = vst [vmem:[#allocation5 + $0xc4] sm:$0xf] %v1131_v3  ;;  %v3674_v7 = vld [vmem:[%s4645_s4 + $0x1b8] sm:$0xff]  ;;  %2108 = vmatpush.bf16.msrb.mxu3 %v3635_v4 }
 0x1c6   : > { %2172 = vmatmul.bf16.gmra.mxu1 %v3157_v9  ;;  %1068 = vst [vmem:[#allocation5 + $0xdc] sm:$0xf] %v1131_v3  ;;  %v3683_v9 = vld [vmem:[%s4645_s4 + $0x200] sm:$0xff]  ;;  %2251 = vmatpush.bf16.msra.mxu0 %v3677_v6 }
 0x1c7   : > { %1234 = vst [vmem:[#allocation5 + $0x8c] sm:$0xf] %v1226_v8 }
 0x1c8   : > { %v1099_v11 = vld [vmem:[#allocation3 + $0x60] sm:$0xff]  ;;  %1091 = vst [vmem:[#allocation5 + $0xbc] sm:$0xf] %v1226_v8 }
 0x1c9   : > { %v1147_v12 = vld [vmem:[#allocation3 + $0x62] sm:$0xff]  ;;  %v1107_v13 = vpack.c.bf16 %v1099_v11, %v1099_v11  ;;  %1162 = vst [vmem:[#allocation5 + $0xa4] sm:$0xf] %v1226_v8 }
 0x1ca   : > { %v1155_v14 = vpack.c.bf16 %v1147_v12, %v1147_v12  ;;  %v3605_v16 = vld [vmem:[#allocation5 + $0xb0] sm:$0xf0]  ;;  %1211 = vst [vmem:[#allocation5 + $0xac] sm:$0xf] %v1131_v3 }
 0x1cb   : > { %v3177_v17 = vor.u32 %v3605_v16, %v3176_v15  ;;  %1115 = vst [vmem:[#allocation5 + $0xc0] sm:$0xf] %v1107_v13  ;;  %v3602_v25 = vld [vmem:[#allocation5 + $0x9c] sm:$0xf]  ;;  %v3673_v12 = vld [vmem:[%s4645_s4 + $0x1b0] sm:$0xff] }
 0x1cc   : > { %1044 = vst [vmem:[#allocation5 + $0xd8] sm:$0xf] %v1107_v13  ;;  %v3607_v23 = vld [vmem:[#allocation5 + $0xc0] sm:$0xf0] }
 0x1cd   : > { %2061 = vmatmul.bf16.vlgmr.msra.gmra.mxu3 %v3177_v17  ;;  %1163 = vst [vmem:[#allocation5 + $0xc8] sm:$0xf] %v1155_v14  ;;  %v3193_v31 = vor.u32 %v3607_v23, %v3192_v28  ;;  %v3610_v15 = vld [vmem:[#allocation5 + $0xdc] sm:$0xf] }
 0x1ce   : > { %1235 = vst [vmem:[#allocation5 + $0xb0] sm:$0xf] %v1155_v14  ;;  %2217 = vmatpush.bf16.msra.mxu3 %v3674_v7 }
 0x1cf   : > { %1092 = vst [vmem:[#allocation5 + $0xe0] sm:$0xf] %v1155_v14  ;;  %v3606_v4 = vld [vmem:[#allocation5 + $0xb8] sm:$0xf0] }
 0x1d0   : > { %1186 = vst [vmem:[#allocation5 + $0x84] sm:$0xf] %v1035_v2  ;;  %v3684_v2 = vld [vmem:[%s4645_s4 + $0x208] sm:$0xff] }
 0x1d1   : > { %1187 = vst [vmem:[#allocation5 + $0xa8] sm:$0xf] %v1107_v13  ;;  %2281 = vmatpush.bf16.msra.mxu1 %v3684_v2 }
 0x1d2   : > { %v3186_v26 = vld [vmem:[#allocation5 + $0xbc] sm:$0xf0]  ;;  %1190 = vst [vmem:[#allocation5 + $0x114] sm:$0xf] %v1182_v0  ;;  %2218 = vmatpush.bf16.msra.mxu3 %v3673_v12  ;;  %v3603_v0 = vld [vmem:[#allocation5 + $0xa4] sm:$0xf] }
 0x1d3   : > { %v3189_v27 = vor.u32 %v3602_v25, %v3186_v26  ;;  %v3212_v24 = vld [vmem:[#allocation5 + $0xd8] sm:$0xf] }
 0x1d4   : > { %v3194_v62 = vld [vmem:[#allocation5 + $0xc4] sm:$0xf0] }
 0x1d5   : > { %2148 = vmatmul.bf16.gmra.mxu0 %v3189_v27  ;;  %2282 = vmatpush.bf16.msra.mxu1 %v3683_v9  ;;  %v3197_v2 = vor.u32 %v3603_v0, %v3194_v62 }
 0x1d6   : > { %2177 = vmatmul.bf16.gmra.mxu1 %v3193_v31  ;;  %2219 = vmatpush.bf16.msra.mxu3 %v3672_v30  ;;  %v3122_v31 = vld [vmem:[#allocation5 + $0x34] sm:$0xf0] }
 0x1d7   : > { %v3125_v36 = vor.u32 %v3585_v34, %v3122_v31 }
 0x1d9   : > { %2912 = vmatpush.bf16.msrb.mxu1 %v2907_v56  ;;  %v3600_v56 = vld [vmem:[#allocation5 + $0x88] sm:$0xf0] }
 0x1da   : > { %2220 = vmatpush.bf16.msra.mxu3 %v3671_v37  ;;  %v3173_v59 = vor.u32 %v3600_v56, %v3172_v58 }
 0x1de   : > { %2221 = vmatpush.bf16.msra.mxu3 %v3670_v44 }
 0x1e1   : > { %v982_v49 = vpop.f32.mrf.mxu0 }
 0x1e2   : > { %v983_v53 = vadd.f32 %v4140_v48, %v982_v49  ;;  %v3594_v49 = vld [vmem:[#allocation5 + $0x5c] sm:$0xf] }
 0x1e3   : > { %v3161_v52 = vor.u32 %v3594_v49, %v3158_v46 }
 0x1e4   : > { %vm993_vm15 = vcmp.ge.f32.partialorder %v983_v53, 0.0  ;;  %v1002_v57 = vmul.f32 %v4142_v50, %v983_v53 }
 0x1e6   : > { %v1010_v63 = vsel %vm993_vm15, %v983_v53, %v1002_v57  ;;  %v3669_v53 = vld [vmem:[%s4645_s4 + $0x190] sm:$0xff]  ;;  %v3149_v57 = vor.u32 %v3597_v54, %v3148_v55 }
 0x1e7   : > { %1019 = vst [vmem:[#allocation3 + $0x71] sm:$0xff] %v1010_v63  ;;  %v1061_v1 = vpack.c.bf16 %v1010_v63, %v1010_v63  ;;  %2222 = vmatpush.bf16.msra.mxu3 %v3669_v53  ;;  %v3595_v63 = vld [vmem:[#allocation5 + $0x64] sm:$0xf] }
 0x1e9   : > { %v984_v3 = vpop.f32.mrf.mxu0  ;;  %1069 = vst [vmem:[#allocation5 + $0x100] sm:$0xf] %v1061_v1 }
 0x1ea   : > { %v985_v5 = vadd.f32 %v4140_v48, %v984_v3  ;;  %1140 = vst [vmem:[#allocation5 + $0xe8] sm:$0xf] %v1061_v1  ;;  %v3676_v48 = vld [vmem:[%s4645_s4 + $0x1c8] sm:$0xff]  ;;  %v3667_v3 = vld [vmem:[%s4645_s4 + $0x180] sm:$0xff] }
 0x1eb   : > { %1212 = vst [vmem:[#allocation5 + $0xd0] sm:$0xf] %v1061_v1  ;;  %2252 = vmatpush.bf16.msra.mxu0 %v3676_v48  ;;  %2223 = vmatpush.bf16.msra.mxu3 %v3668_v60  ;;  %v3169_v1 = vor.u32 %v3595_v63, %v3166_v61 }
 0x1ec   : > { %vm994_vm6 = vcmp.ge.f32.partialorder %v985_v5, 0.0  ;;  %v1003_v8 = vmul.f32 %v4142_v50, %v985_v5 }
 0x1ee   : > { %v1011_v10 = vsel %vm994_vm6, %v985_v5, %v1003_v8  ;;  %v1029_v11 = vld [vmem:[#allocation3 + $0x70] sm:$0xff]  ;;  %v3184_v5 = vld [vmem:[#allocation5 + $0x98] sm:$0xf] }
 0x1ef   : > { %v1220_v13 = vld [vmem:[#allocation3 + $0x72] sm:$0xff]  ;;  %1020 = vst [vmem:[#allocation3 + $0x81] sm:$0xff] %v1011_v10  ;;  %v1037_v50 = vpack.c.bf16 %v1029_v11, %v1029_v11  ;;  %v1133_v14 = vpack.c.bf16 %v1011_v10, %v1011_v10  ;;  %2253 = vmatpush.bf16.msra.mxu0 %v3675_v19  ;;  %2224 = vmatpush.bf16.msra.mxu3 %v3667_v3  ;;  %v3604_v11 = vld [vmem:[#allocation5 + $0xac] sm:$0xf] }
 0x1f0   : > { %v3214_v16 = vld [vmem:[#allocation5 + $0xfc] sm:$0xf0]  ;;  %v1228_v17 = vpack.c.bf16 %v1220_v13, %v1220_v13  ;;  %v3185_v7 = vor.u32 %v3606_v4, %v3184_v5  ;;  %v3208_v8 = vld [vmem:[#allocation5 + $0xb0] sm:$0xf] }
 0x1f1   : > { %1045 = vst [vmem:[#allocation5 + $0xfc] sm:$0xf] %v1037_v50  ;;  %v3217_v18 = vor.u32 %v3610_v15, %v3214_v16  ;;  %v3228_v27 = vld [vmem:[#allocation5 + $0xe8] sm:$0xf]  ;;  %v3220_v15 = vld [vmem:[#allocation5 + $0xe0] sm:$0xf] }
 0x1f2   : > { %1116 = vst [vmem:[#allocation5 + $0xe4] sm:$0xf] %v1037_v50  ;;  %v3202_v48 = vld [vmem:[#allocation5 + $0xcc] sm:$0xf0] }
 0x1f3   : > { %2095 = vmatmul.bf16.gmra.mxu2 %v3217_v18  ;;  %1141 = vst [vmem:[#allocation5 + $0x10c] sm:$0xf] %v1133_v14  ;;  %v3205_v13 = vor.u32 %v3604_v11, %v3202_v48  ;;  %v2378_v11 = vld [vmem:[#allocation2 + $0x1] sm:$0xff] }
 0x1f4   : > { %1236 = vst [vmem:[#allocation5 + $0xd4] sm:$0xf] %v1228_v17 }
 0x1f5   : > { %1093 = vst [vmem:[#allocation5 + $0x104] sm:$0xf] %v1228_v17 }
 0x1f6   : > { %v1101_v20 = vld [vmem:[#allocation3 + $0x80] sm:$0xff]  ;;  %1164 = vst [vmem:[#allocation5 + $0xec] sm:$0xf] %v1228_v17  ;;  %v3618_v17 = vld [vmem:[#allocation5 + $0x118] sm:$0xf0] }
 0x1f7   : > { %v1149_v21 = vld [vmem:[#allocation3 + $0x82] sm:$0xff]  ;;  %v1109_v22 = vpack.c.bf16 %v1101_v20, %v1101_v20  ;;  %1213 = vst [vmem:[#allocation5 + $0xf4] sm:$0xf] %v1133_v14 }
 0x1f8   : > { %v1157_v23 = vpack.c.bf16 %v1149_v21, %v1149_v21  ;;  %v3614_v25 = vld [vmem:[#allocation5 + $0xf8] sm:$0xf0]  ;;  %1188 = vst [vmem:[#allocation5 + $0xcc] sm:$0xf] %v1037_v50  ;;  %v3238_v21 = vld [vmem:[#allocation5 + $0x114] sm:$0xf0]  ;;  %v2081_v37 = vpop.f32.mrf.mxu2 }
 0x1f9   : > { %v3213_v26 = vor.u32 %v3614_v25, %v3212_v24  ;;  %1117 = vst [vmem:[#allocation5 + $0x108] sm:$0xf] %v1109_v22  ;;  %v3611_v32 = vld [vmem:[#allocation5 + $0xe4] sm:$0xf]  ;;  %v3128_v24 = vld [vmem:[#allocation5 + $0x18] sm:$0xf] }
 0x1fa   : > { %v3616_v28 = vld [vmem:[#allocation5 + $0x108] sm:$0xf0]  ;;  %1165 = vst [vmem:[#allocation5 + $0x110] sm:$0xf] %v1157_v23 }
 0x1fb   : > { %2066 = vmatmul.bf16.gmra.mxu3 %v3213_v26  ;;  %v3229_v29 = vor.u32 %v3616_v28, %v3228_v27  ;;  %1237 = vst [vmem:[#allocation5 + $0xf8] sm:$0xf] %v1157_v23  ;;  %v3609_v6 = vld [vmem:[#allocation5 + $0xd0] sm:$0xf0]  ;;  %v3590_v23 = vld [vmem:[#allocation5 + $0x38] sm:$0xf0]  ;;  %v2052_v26 = vpop.f32.mrf.mxu1 }
 0x1fc   : > { %1189 = vst [vmem:[#allocation5 + $0xf0] sm:$0xf] %v1109_v22  ;;  %v3209_v9 = vor.u32 %v3609_v6, %v3208_v8  ;;  %v3615_v14 = vld [vmem:[#allocation5 + $0x100] sm:$0xf0]  ;;  %v3129_v25 = vor.u32 %v3590_v23, %v3128_v24  ;;  %v3164_v28 = vld [vmem:[#allocation5 + $0x60] sm:$0xf] }
 0x1fd   : > { %2182 = vmatmul.bf16.gmra.mxu1 %v3229_v29  ;;  %v3612_v12 = vld [vmem:[#allocation5 + $0xec] sm:$0xf]  ;;  %v3221_v18 = vor.u32 %v3615_v14, %v3220_v15  ;;  %v3599_v27 = vld [vmem:[#allocation5 + $0x80] sm:$0xf0] }
 0x1fe   : > { %v3613_v20 = vld [vmem:[#allocation5 + $0xf4] sm:$0xf]  ;;  %v3165_v29 = vor.u32 %v3599_v27, %v3164_v28 }
 0x1ff   : > { %v3241_v22 = vor.u32 %v3613_v20, %v3238_v21  ;;  %v2665_v20 = vld [vmem:[#allocation2 + $0x90] sm:$0xff] }
 0x200   : > { %v3222_v33 = vld [vmem:[#allocation5 + $0x104] sm:$0xf0]  ;;  %v2083_v44 = vpop.f32.mrf.mxu2  ;;  %v2777_v21 = vld [vmem:[#allocation2 + $0x92] sm:$0xff]  ;;  %v2673_v24 = vpack.c.bf16 %v2665_v20, %v2665_v20 }
 0x201   : > { %v3225_v35 = vor.u32 %v3611_v32, %v3222_v33  ;;  %v3230_v10 = vld [vmem:[#allocation5 + $0x10c] sm:$0xf0]  ;;  %v3608_v32 = vld [vmem:[#allocation5 + $0xc8] sm:$0xf0]  ;;  %v3200_v33 = vld [vmem:[#allocation5 + $0xa8] sm:$0xf] }
 0x202   : > { %v3233_v50 = vor.u32 %v3612_v12, %v3230_v10  ;;  %v3244_v16 = vld [vmem:[#allocation5 + $0xf8] sm:$0xf]  ;;  %v3201_v34 = vor.u32 %v3608_v32, %v3200_v33  ;;  %v2434_v12 = vld [vmem:[#allocation2 + $0x2] sm:$0xff]  ;;  %2696 = vrot.lane.b32.xlu2 %v2673_v24, %s3777_s20 }
 0x203   : > { %2153 = vmatmul.bf16.gmra.mxu0 %v3225_v35  ;;  %2196 = vmatmul.bf16.vlgmr.msrb.gmra.mxu2 %v3125_v36  ;;  %v3245_v19 = vor.u32 %v3618_v17, %v3244_v16  ;;  %v2054_v30 = vpop.f32.mrf.mxu1  ;;  %v3236_v40 = vld [vmem:[#allocation5 + $0xf0] sm:$0xf]  ;;  %v2442_v14 = vpack.c.bf16 %v2434_v12, %v2434_v12 }
 0x204   : > { %v2139_v42 = vpop.f32.mrf.mxu0 }
 0x205   : > { %2458 = vrot.lane.b32.xlu1 %v2442_v14, %s3773_s12 }
 0x20b   : > { %2109 = vmatmul.bf16.vlgmr.msrb.gmra.mxu3 %v3113_v41  ;;  %v3617_v41 = vld [vmem:[#allocation5 + $0x110] sm:$0xf0] }
 0x20c   : > { %v2141_v47 = vpop.f32.mrf.mxu0 }
 0x20d   : > { %2283 = vmatmul.bf16.vlgmr.msra.gmra.mxu1 %v3137_v43  ;;  %v3237_v43 = vor.u32 %v3617_v41, %v3236_v40 }
 0x213   : > { %2254 = vmatmul.bf16.vlgmr.msra.gmra.mxu0 %v3133_v51  ;;  %2201 = vmatmul.bf16.gmra.mxu2 %v3161_v52 }
 0x21b   : > { %2114 = vmatmul.bf16.gmra.mxu3 %v3149_v57 }
 0x21d   : > { %2288 = vmatmul.bf16.gmra.mxu1 %v3173_v59 }
 0x220   : > { %v2086_v49 = vpop.f32.mrf.mxu2 }
 0x223   : > { %2259 = vmatmul.bf16.gmra.mxu0 %v3169_v1  ;;  %2206 = vmatmul.bf16.gmra.mxu2 %v3197_v2  ;;  %v4309_v31 = vpop.f32.mrf.mxu1 }
 0x228   : > { %v4329_v55 = vpop.f32.mrf.mxu2 }
 0x229   : > { %v4325_v52 = vpop.f32.mrf.mxu0 }
 0x22b   : > { %2119 = vmatmul.bf16.gmra.mxu3 %v3185_v7  ;;  %v4311_v35 = vpop.f32.mrf.mxu1 }
 0x22d   : > { %2293 = vmatmul.bf16.gmra.mxu1 %v3209_v9  ;;  %v4364_v9 = vld [vmem:[%s4646_s5] ss:$0 sm:$0xff] }
 0x22e   : > { %v2055_v23 = vadd.f32 %v4364_v9, %v2054_v30  ;;  %v2058_v30 = vadd.f32 %v4364_v9, %v4309_v31 }
 0x230   : > { %v2084_v32 = vadd.f32 %v2083_v44, %v2055_v23 }
 0x231   : > { %v4331_v56 = vpop.f32.mrf.mxu0 }
 0x233   : > { %2264 = vmatmul.bf16.gmra.mxu0 %v3205_v13  ;;  %2211 = vmatmul.bf16.gmra.mxu2 %v3233_v50  ;;  %v4315_v38 = vpop.f32.mrf.mxu1  ;;  %v2053_v13 = vadd.f32 %v4364_v9, %v2052_v26  ;;  %v2386_v50 = vpack.c.bf16 %v2378_v11, %v2378_v11  ;;  %v2087_v11 = vadd.f32 %v2086_v49, %v2058_v30 }
 0x235   : > { %2402 = vrot.lane.b32.xlu0 %v2386_v50, %s3772_s11  ;;  %v2082_v17 = vadd.f32 %v2081_v37, %v2053_v13 }
 0x23b   : > { %2124 = vmatmul.bf16.gmra.mxu3 %v3221_v18  ;;  %v4321_v46 = vpop.f32.mrf.mxu1 }
 0x23d   : > { %2298 = vmatmul.bf16.gmra.mxu1 %v3245_v19 }
 0x243   : > { %2269 = vmatmul.bf16.gmra.mxu0 %v3241_v22  ;;  %v4327_v53 = vpop.f32.mrf.mxu1  ;;  %v2721_v22 = vld [vmem:[#allocation2 + $0x91] sm:$0xff] }
 0x244   : > { %v2729_v26 = vpack.c.bf16 %v2721_v22, %v2721_v22 }
 0x246   : > { %2752 = vrot.lane.b32.xlu0 %v2729_v26, %s3778_s21 }
 0x248   : > { %v4335_v59 = vpop.f32.mrf.mxu2 }
 0x24b   : > { %2225 = vmatmul.bf16.vlgmr.msra.gmra.mxu3 %v3129_v25  ;;  %v4333_v57 = vpop.f32.mrf.mxu1  ;;  %v2785_v25 = vpack.c.bf16 %v2777_v21, %v2777_v21 }
 0x24d   : > { %2808 = vrot.lane.b32.xlu1 %v2785_v25, %s3779_s22 }
 0x250   : > { %v4313_v36 = vpop.f32.mrf.mxu3  ;;  %v4341_v63 = vpop.f32.mrf.mxu2 }
 0x252   : > { %v4337_v60 = vpop.f32.mrf.mxu0 }
 0x253   : > { %v4339_v61 = vpop.f32.mrf.mxu1 }
 0x258   : > { %v4317_v39 = vpop.f32.mrf.mxu3 }
 0x25a   : > { %v4343_v0 = vpop.f32.mrf.mxu0 }
 0x25b   : > { %2230 = vmatmul.bf16.gmra.mxu3 %v3165_v29  ;;  %v4347_v2 = vpop.f32.mrf.mxu1 }
 0x26b   : > { %2235 = vmatmul.bf16.gmra.mxu3 %v3201_v34 }
 0x276   : > { %v4349_v3 = vpop.f32.mrf.mxu2 }
 0x27a   : > { %v4355_v6 = vpop.f32.mrf.mxu1 }
 0x27b   : > { %2240 = vmatmul.bf16.gmra.mxu3 %v3237_v43 }
 0x27e   : > { %v4319_v45 = vpop.f32.mrf.mxu3  ;;  %v4357_v7 = vpop.f32.mrf.mxu2 }
 0x280   : > { %v4351_v4 = vpop.f32.mrf.mxu0 }
 0x282   : > { %v4368_v10 = vpop.f32.mrf.mxu1 }
 0x286   : > { %v4323_v51 = vpop.f32.mrf.mxu3  ;;  %v2197_v15 = vpop.f32.mrf.mxu2 }
 0x288   : > { %v4366_v48 = vpop.f32.mrf.mxu0 }
 0x28a   : > { %v2284_v27 = vpop.f32.mrf.mxu1 }
 0x28e   : > { %v2110_v54 = vpop.f32.mrf.mxu3  ;;  %v2199_v33 = vpop.f32.mrf.mxu2 }
 0x28f   : > { %v2111_v18 = vadd.f32 %v2110_v54, %v2082_v17  ;;  %v4385_v17 = vstv %s3101_s10 }
 0x290   : > { %v2255_v19 = vpop.f32.mrf.mxu0 }
 0x291   : > { %v2140_v28 = vadd.f32 %v2139_v42, %v2111_v18 }
 0x292   : > { %v2286_v43 = vpop.f32.mrf.mxu1 }
 0x293   : > { %v2169_v34 = vadd.f32 %v4315_v38, %v2140_v28  ;;  %v2060_v38 = vadd.f32 %v4364_v9, %v4311_v35 }
 0x295   : > { %v2198_v41 = vadd.f32 %v2197_v15, %v2169_v34  ;;  %v2329_v15 = vld [vmem:[#allocation2 + $0x11] sm:$0xff] }
 0x296   : > { %v2112_v58 = vpop.f32.mrf.mxu3  ;;  %v2202_v44 = vpop.f32.mrf.mxu2 }
 0x297   : > { %v2113_v37 = vadd.f32 %v2112_v58, %v2084_v32  ;;  %v2330_v32 = vld [vmem:[#allocation2 + $0x21] sm:$0xff] }
 0x298   : > { %v2257_v40 = vpop.f32.mrf.mxu0 }
 0x299   : > { %v2142_v42 = vadd.f32 %v2141_v47, %v2113_v37 }
 0x29a   : > { %v2289_v21 = vpop.f32.mrf.mxu1 }
 0x29b   : > { %v2171_v13 = vadd.f32 %v4321_v46, %v2142_v42  ;;  %v2089_v46 = vadd.f32 %v4329_v55, %v2060_v38 }
 0x29d   : > { %v2200_v18 = vadd.f32 %v2199_v33, %v2171_v13 }
 0x29e   : > { %v2115_v62 = vpop.f32.mrf.mxu3  ;;  %v2204_v26 = vpop.f32.mrf.mxu2 }
 0x29f   : > { %v2116_v50 = vadd.f32 %v2115_v62, %v2087_v11 }
 0x2a0   : > { %v2260_v49 = vpop.f32.mrf.mxu0 }
 0x2a1   : > { %v2145_v31 = vadd.f32 %v4325_v52, %v2116_v50  ;;  %v2063_v52 = vadd.f32 %v4364_v9, %v4313_v36 }
 0x2a3   : > { %v2174_v23 = vadd.f32 %v4327_v53, %v2145_v31  ;;  %v2092_v53 = vadd.f32 %v4335_v59, %v2063_v52  ;;  %v2065_v59 = vadd.f32 %v4364_v9, %v4317_v39 }
 0x2a5   : > { %v2094_v39 = vadd.f32 %v4341_v63, %v2065_v59 }
 0x2a6   : > { %v4345_v1 = vpop.f32.mrf.mxu3  ;;  %v2207_v38 = vpop.f32.mrf.mxu2 }
 0x2a7   : > { %v2118_v35 = vadd.f32 %v4345_v1, %v2089_v46 }
 0x2a8   : > { %v2262_v37 = vpop.f32.mrf.mxu0 }
 0x2a9   : > { %v2147_v28 = vadd.f32 %v4331_v56, %v2118_v35  ;;  %v2291_v56 = vpop.f32.mrf.mxu1 }
 0x2ae   : > { %v4353_v5 = vpop.f32.mrf.mxu3 }
 0x2af   : > { %v2121_v36 = vadd.f32 %v4353_v5, %v2092_v53 }
 0x2b1   : > { %v2150_v5 = vadd.f32 %v4337_v60, %v2121_v36  ;;  %v2333_v36 = vld [vmem:[#allocation2 + $0x51] sm:$0xff] }
 0x2b6   : > { %v4359_v8 = vpop.f32.mrf.mxu3 }
 0x2be   : > { %v4373_v16 = vpop.f32.mrf.mxu3 }
 0x2c6   : > { %v4378_v29 = vpop.f32.mrf.mxu3 }
 0x2ce   : > { %v2226_v54 = vpop.f32.mrf.mxu3 }
 0x2cf   : > { %v2227_v12 = vadd.f32 %v2226_v54, %v2198_v41 }
 0x2d1   : > { %v2256_v14 = vadd.f32 %v2255_v19, %v2227_v12 }
 0x2d3   : > { %v2285_v58 = vadd.f32 %v2284_v27, %v2256_v14  ;;  %v2203_v27 = vadd.f32 %v2202_v44, %v2174_v23  ;;  %v2331_v44 = vld [vmem:[#allocation2 + $0x31] sm:$0xff]  ;;  %v2294_v23 = vpop.f32.mrf.mxu1 }
 0x2d5   : > { %vm2304_vm1 = vcmp.ge.f32.partialorder %v2285_v58, 0.0  ;;  %v2313_v47 = vmul.f32 %v4385_v17, %v2285_v58 }
 0x2d6   : > { %v2228_v20 = vpop.f32.mrf.mxu3 }
 0x2d7   : > { %v2321_v62 = vsel %vm2304_vm1, %v2285_v58, %v2313_v47  ;;  %v2229_v19 = vadd.f32 %v2228_v20, %v2200_v18 }
 0x2d8   : > { %v2337_v22 = vsub.f32 %v2321_v62, %v2329_v15  ;;  %v2179_v15 = vadd.f32 %v4339_v61, %v2150_v5  ;;  %v2265_v62 = vpop.f32.mrf.mxu0 }
 0x2d9   : > { %v2258_v24 = vadd.f32 %v2257_v40, %v2229_v19  ;;  %v2176_v40 = vadd.f32 %v4333_v57, %v2147_v28  ;;  %v2209_v28 = vpop.f32.mrf.mxu2 }
 0x2da   : > { %2345 = vst.msk [vmem:[#allocation2 + $0x11] sm:$0xff] %vm321_vm0, %v2337_v22  ;;  %v2068_v22 = vadd.f32 %v4364_v9, %v4319_v45  ;;  %v2208_v61 = vadd.f32 %v2207_v38, %v2179_v15 }
 0x2db   : > { %v2287_v25 = vadd.f32 %v2286_v43, %v2258_v24  ;;  %v2205_v57 = vadd.f32 %v2204_v26, %v2176_v40  ;;  %v2332_v24 = vld [vmem:[#allocation2 + $0x41] sm:$0xff] }
 0x2dc   : > { %v2097_v45 = vadd.f32 %v4349_v3, %v2068_v22  ;;  %v2335_v22 = vld [vmem:[#allocation2 + $0x71] sm:$0xff] }
 0x2dd   : > { %vm2305_vm13 = vcmp.ge.f32.partialorder %v2287_v25, 0.0  ;;  %v2314_v55 = vmul.f32 %v4385_v17, %v2287_v25 }
 0x2de   : > { %v2231_v33 = vpop.f32.mrf.mxu3 }
 0x2df   : > { %v2322_v34 = vsel %vm2305_vm13, %v2287_v25, %v2314_v55  ;;  %v2232_v1 = vadd.f32 %v2231_v33, %v2203_v27  ;;  %v2126_v33 = vadd.f32 %v4373_v16, %v2097_v45 }
 0x2e0   : > { %v2338_v30 = vsub.f32 %v2322_v34, %v2330_v32 }
 0x2e1   : > { %v2261_v41 = vadd.f32 %v2260_v49, %v2232_v1  ;;  %v2602_v42 = vld [vmem:[#allocation2 + $0x12] sm:$0xff]  ;;  %v2123_v49 = vadd.f32 %v4359_v8, %v2094_v39  ;;  %v2155_v16 = vadd.f32 %v4351_v4, %v2126_v33  ;;  %v2212_v59 = vpop.f32.mrf.mxu2 }
 0x2e2   : > { %v2379_v43 = vld [vmem:[#allocation2 + $0x11] sm:$0xff]  ;;  %2346 = vst.msk [vmem:[#allocation2 + $0x21] sm:$0xff] %vm321_vm0, %v2338_v30  ;;  %v2610_v11 = vpack.c.bf16 %v2602_v42, %v2602_v42  ;;  %v2267_v30 = vpop.f32.mrf.mxu0 }
 0x2e3   : > { %v2490_v54 = vld [vmem:[#allocation2 + $0x10] sm:$0xff]  ;;  %v2387_v12 = vpack.c.bf16 %v2379_v43, %v2379_v43  ;;  %v2290_v50 = vadd.f32 %v2289_v21, %v2261_v41  ;;  %v2152_v8 = vadd.f32 %v4343_v0, %v2123_v49  ;;  %v2296_v41 = vpop.f32.mrf.mxu1 }
 0x2e4   : > { %v2498_v13 = vpack.c.bf16 %v2490_v54, %v2490_v54  ;;  %2626 = vrot.lane.b32.xlu0 %v2610_v11, %s3776_s19  ;;  %2460 = vrot.lane.b32.xlu2 %v2610_v11, %s3773_s12  ;;  %v2184_v11 = vadd.f32 %v4355_v6, %v2155_v16  ;;  %v2403_v16 = vpop.permute.xlu0 %2402 }
 0x2e5   : > { %vm2306_vm14 = vcmp.ge.f32.partialorder %v2290_v50, 0.0  ;;  %v2315_v14 = vmul.f32 %v4385_v17, %v2290_v50  ;;  %2404 = vrot.lane.b32.xlu1 %v2387_v12, %s3772_s11  ;;  %v2181_v32 = vadd.f32 %v4347_v2, %v2152_v8  ;;  %2426 = vst.msk [vmem:[#allocation4] sm:$0xf] %vm464_vm3, %v2403_v16 }
 0x2e6   : > { %2371 = vst.msk [vmem:[#allocation4 + $0x4] sm:$0xf] %vm407_vm2, %v2498_v13  ;;  %v2233_v58 = vpop.f32.mrf.mxu3  ;;  %v2213_v6 = vadd.f32 %v2212_v59, %v2184_v11 }
 0x2e7   : > { %v2323_v18 = vsel %vm2306_vm14, %v2290_v50, %v2315_v14  ;;  %v2234_v31 = vadd.f32 %v2233_v58, %v2205_v57  ;;  %v2210_v2 = vadd.f32 %v2209_v28, %v2181_v32  ;;  %v2334_v14 = vld [vmem:[#allocation2 + $0x61] sm:$0xff] }
 0x2e8   : > { %v2339_v47 = vsub.f32 %v2323_v18, %v2331_v44  ;;  %v2336_v28 = vld [vmem:[#allocation2 + $0x81] sm:$0xff] }
 0x2e9   : > { %v2263_v20 = vadd.f32 %v2262_v37, %v2234_v31  ;;  %v2436_v46 = vld [vmem:[#allocation2 + $0x22] sm:$0xff]  ;;  %v2070_v37 = vadd.f32 %v4364_v9, %v4323_v51 }
 0x2ea   : > { %v2491_v60 = vld [vmem:[#allocation2 + $0x20] sm:$0xff]  ;;  %2347 = vst.msk [vmem:[#allocation2 + $0x31] sm:$0xff] %vm321_vm0, %v2339_v47  ;;  %v4415_v19 = vpack.c.bf16 %v2436_v46, %v2436_v46  ;;  %v2270_v44 = vpop.f32.mrf.mxu0 }
 0x2eb   : > { %v2499_v21 = vpack.c.bf16 %v2491_v60, %v2491_v60  ;;  %v2292_v63 = vadd.f32 %v2291_v56, %v2263_v20  ;;  %v2547_v27 = vld [vmem:[#allocation2 + $0x21] sm:$0xff]  ;;  %v2099_v9 = vadd.f32 %v4357_v7, %v2070_v37  ;;  %v2299_v31 = vpop.f32.mrf.mxu1 }
 0x2ec   : > { %2462 = vrot.lane.b32.xlu0 %v4415_v19, %s3773_s12  ;;  %2514 = vrot.lane.b32.xlu2 %v2498_v13, %s3774_s17  ;;  %v2555_v34 = vpack.c.bf16 %v2547_v27, %v2547_v27 }
 0x2ed   : > { %2372 = vst.msk [vmem:[#allocation4 + $0x8] sm:$0xf] %vm407_vm2, %v2499_v21  ;;  %vm2307_vm15 = vcmp.ge.f32.partialorder %v2292_v63, 0.0  ;;  %v2316_v35 = vmul.f32 %v4385_v17, %v2292_v63  ;;  %2570 = vrot.lane.b32.xlu1 %v2387_v12, %s3775_s18  ;;  %v2128_v12 = vadd.f32 %v4378_v29, %v2099_v9 }
 0x2ee   : > { %v2236_v52 = vpop.f32.mrf.mxu3 }
 0x2ef   : > { %v2324_v25 = vsel %vm2307_vm15, %v2292_v63, %v2316_v35  ;;  %v2237_v26 = vadd.f32 %v2236_v52, %v2208_v61  ;;  %v2157_v7 = vadd.f32 %v4366_v48, %v2128_v12  ;;  %v4513_v12 = vpop.permute.xlu0 %2752 }
 0x2f0   : > { %v2340_v55 = vsub.f32 %v2324_v25, %v2332_v24 }
 0x2f1   : > { %v2266_v53 = vadd.f32 %v2265_v62, %v2237_v26  ;;  %v2659_v0 = vld [vmem:[#allocation2 + $0x30] sm:$0xff]  ;;  %v2186_v15 = vadd.f32 %v4368_v10, %v2157_v7  ;;  %v2214_v62 = vpop.f32.mrf.mxu2 }
 0x2f2   : > { %2348 = vst.msk [vmem:[#allocation2 + $0x41] sm:$0xff] %vm321_vm0, %v2340_v55  ;;  %v4430_v1 = vpack.c.bf16 %v2659_v0, %v2659_v0  ;;  %v2604_v54 = vld [vmem:[#allocation2 + $0x32] sm:$0xff]  ;;  %v2272_v8 = vpop.f32.mrf.mxu0 }
 0x2f3   : > { %v2295_v3 = vadd.f32 %v2294_v23, %v2266_v53  ;;  %v4445_v50 = vpack.c.bf16 %v2604_v54, %v2604_v54  ;;  %v2381_v18 = vld [vmem:[#allocation2 + $0x31] sm:$0xff]  ;;  %v2301_v45 = vpop.f32.mrf.mxu1 }
 0x2f4   : > { %2516 = vrot.lane.b32.xlu0 %v2499_v21, %s3774_s17  ;;  %2572 = vrot.lane.b32.xlu2 %v2555_v34, %s3775_s18  ;;  %2373 = vst.msk [vmem:[#allocation4 + $0xc] sm:$0xf] %vm407_vm2, %v4430_v1  ;;  %v4460_v48 = vpack.c.bf16 %v2381_v18, %v2381_v18 }
 0x2f5   : > { %vm2308_vm6 = vcmp.ge.f32.partialorder %v2295_v3, 0.0  ;;  %v2317_v40 = vmul.f32 %v4385_v17, %v2295_v3  ;;  %2406 = vrot.lane.b32.xlu1 %v2555_v34, %s3772_s11 }
 0x2f6   : > { %v2238_v51 = vpop.f32.mrf.mxu3 }
 0x2f7   : > { %v2325_v42 = vsel %vm2308_vm6, %v2295_v3, %v2317_v40  ;;  %v2239_v43 = vadd.f32 %v2238_v51, %v2210_v2  ;;  %v2459_v40 = vpop.permute.xlu1 %2458  ;;  %v4501_v51 = vpop.permute.xlu2 %2696 }
 0x2f8   : > { %v2341_v56 = vsub.f32 %v2325_v42, %v2333_v36  ;;  %2482 = vst.msk [vmem:[#allocation4] sm:$0xf] %vm521_vm4, %v2459_v40 }
 0x2f9   : > { %v2268_v13 = vadd.f32 %v2267_v30, %v2239_v43  ;;  %v2493_v4 = vld [vmem:[#allocation2 + $0x40] sm:$0xff] }
 0x2fa   : > { %2349 = vst.msk [vmem:[#allocation2 + $0x51] sm:$0xff] %vm321_vm0, %v2341_v56  ;;  %v4447_v57 = vpack.c.bf16 %v2493_v4, %v2493_v4  ;;  %v2772_v32 = vld [vmem:[#allocation2 + $0x42] sm:$0xff] }
 0x2fb   : > { %v2297_v5 = vadd.f32 %v2296_v41, %v2268_v13  ;;  %v2549_v33 = vld [vmem:[#allocation2 + $0x41] sm:$0xff] }
 0x2fc   : > { %2630 = vrot.lane.b32.xlu0 %v4445_v50, %s3776_s19  ;;  %2682 = vrot.lane.b32.xlu2 %v2499_v21, %s3777_s20  ;;  %2374 = vst.msk [vmem:[#allocation4 + $0x10] sm:$0xf] %vm407_vm2, %v4447_v57  ;;  %v2215_v21 = vadd.f32 %v2214_v62, %v2186_v15  ;;  %v2557_v37 = vpack.c.bf16 %v2549_v33, %v2549_v33 }
 0x2fd   : > { %vm2309_vm1 = vcmp.ge.f32.partialorder %v2297_v5, 0.0  ;;  %v2318_v29 = vmul.f32 %v4385_v17, %v2297_v5  ;;  %2628 = vrot.lane.b32.xlu1 %v4415_v19, %s3776_s19 }
 0x2fe   : > { %v2241_v38 = vpop.f32.mrf.mxu3 }
 0x2ff   : > { %v2326_v58 = vsel %vm2309_vm1, %v2297_v5, %v2318_v29  ;;  %v2242_v39 = vadd.f32 %v2241_v38, %v2213_v6  ;;  %v4516_v13 = vpop.permute.xlu1 %2808 }
 0x300   : > { %v2342_v47 = vsub.f32 %v2326_v58, %v2334_v14 }
 0x301   : > { %v2271_v49 = vadd.f32 %v2270_v44, %v2242_v39  ;;  %v2661_v20 = vld [vmem:[#allocation2 + $0x50] sm:$0xff] }
 0x302   : > { %2350 = vst.msk [vmem:[#allocation2 + $0x61] sm:$0xff] %vm321_vm0, %v2342_v47  ;;  %v2669_v46 = vpack.c.bf16 %v2661_v20, %v2661_v20  ;;  %v2439_v2 = vld [vmem:[#allocation2 + $0x52] sm:$0xff] }
 0x303   : > { %v2300_v60 = vadd.f32 %v2299_v31, %v2271_v49  ;;  %v2447_v41 = vpack.c.bf16 %v2439_v2, %v2439_v2 }
 0x304   : > { %2684 = vrot.lane.b32.xlu0 %v4430_v1, %s3777_s20  ;;  %2408 = vrot.lane.b32.xlu2 %v4460_v48, %s3772_s11  ;;  %2375 = vst.msk [vmem:[#allocation4 + $0x14] sm:$0xf] %vm407_vm2, %v2669_v46 }
 0x305   : > { %vm2310_vm13 = vcmp.ge.f32.partialorder %v2300_v60, 0.0  ;;  %v2319_v10 = vmul.f32 %v4385_v17, %v2300_v60  ;;  %2738 = vrot.lane.b32.xlu1 %v2555_v34, %s3778_s21  ;;  %v2780_v34 = vpack.c.bf16 %v2772_v32, %v2772_v32 }
 0x306   : > { %v2243_v63 = vpop.f32.mrf.mxu3 }
 0x307   : > { %v2327_v23 = vsel %vm2310_vm13, %v2300_v60, %v2319_v10  ;;  %v2244_v61 = vadd.f32 %v2243_v63, %v2215_v21 }
 0x308   : > { %v2343_v35 = vsub.f32 %v2327_v23, %v2335_v22 }
 0x309   : > { %v2273_v24 = vadd.f32 %v2272_v8, %v2244_v61  ;;  %v2662_v52 = vld [vmem:[#allocation2 + $0x60] sm:$0xff]  ;;  %v3698_v61 = vld [vmem:[%s4647_s6 + $0x18] sm:$0xff] }
 0x30a   : > { %2351 = vst.msk [vmem:[#allocation2 + $0x71] sm:$0xff] %vm321_vm0, %v2343_v35  ;;  %v2670_v25 = vpack.c.bf16 %v2662_v52, %v2662_v52  ;;  %v2551_v30 = vld [vmem:[#allocation2 + $0x61] sm:$0xff]  ;;  %3708 = vmatpush.bf16.msra.mxu2 %v3698_v61  ;;  %2913 = vmatpush.bf16.msrb.mxu1 %v3698_v61  ;;  %v2967_v61 = vld [vmem:[#allocation3 + $0x51] sm:$0xff] }
 0x30b   : > { %v2302_v26 = vadd.f32 %v2301_v45, %v2273_v24  ;;  %v2559_v36 = vpack.c.bf16 %v2551_v30, %v2551_v30  ;;  %v2607_v42 = vld [vmem:[#allocation2 + $0x62] sm:$0xff] }
 0x30c   : > { %2520 = vrot.lane.b32.xlu0 %v4447_v57, %s3774_s17  ;;  %2518 = vrot.lane.b32.xlu2 %v4430_v1, %s3774_s17  ;;  %2376 = vst.msk [vmem:[#allocation4 + $0x18] sm:$0xf] %vm407_vm2, %v2670_v25  ;;  %v2615_v43 = vpack.c.bf16 %v2607_v42, %v2607_v42  ;;  %v3696_v24 = vld [vmem:[%s4647_s6 + $0x8] sm:$0xff]  ;;  %v3695_v52 = vld [vmem:[%s4647_s6] sm:$0xff] }
 0x30d   : > { %vm2311_vm14 = vcmp.ge.f32.partialorder %v2302_v26, 0.0  ;;  %v2320_v27 = vmul.f32 %v4385_v17, %v2302_v26  ;;  %2464 = vrot.lane.b32.xlu1 %v4445_v50, %s3773_s12  ;;  %v2383_v17 = vld [vmem:[#allocation2 + $0x51] sm:$0xff] }
 0x30e   : > { %v2391_v1 = vpack.c.bf16 %v2383_v17, %v2383_v17 }
 0x30f   : > { %v2328_v55 = vsel %vm2311_vm14, %v2302_v26, %v2320_v27 }
 0x310   : > { %v2344_v53 = vsub.f32 %v2328_v55, %v2336_v28 }
 0x311   : > { %v2663_v0 = vld [vmem:[#allocation2 + $0x70] sm:$0xff] }
 0x312   : > { %2352 = vst.msk [vmem:[#allocation2 + $0x81] sm:$0xff] %vm321_vm0, %v2344_v53  ;;  %v4479_v3 = vpack.c.bf16 %v2663_v0, %v2663_v0  ;;  %v2719_v56 = vld [vmem:[#allocation2 + $0x71] sm:$0xff] }
 0x313   : > { %v2727_v11 = vpack.c.bf16 %v2719_v56, %v2719_v56  ;;  %v2441_v59 = vld [vmem:[#allocation2 + $0x72] sm:$0xff] }
 0x314   : > { %2798 = vrot.lane.b32.xlu0 %v2780_v34, %s3779_s22  ;;  %2576 = vrot.lane.b32.xlu2 %v2557_v37, %s3775_s18  ;;  %2377 = vst.msk [vmem:[#allocation4 + $0x1c] sm:$0xf] %vm407_vm2, %v4479_v3 }
 0x315   : > { %2574 = vrot.lane.b32.xlu1 %v4460_v48, %s3775_s18 }
 0x319   : > { %v2609_v38 = vld [vmem:[#allocation2 + $0x82] sm:$0xff] }
 0x31a   : > { %v2617_v58 = vpack.c.bf16 %v2609_v38, %v2609_v38  ;;  %v2497_v47 = vld [vmem:[#allocation2 + $0x80] sm:$0xff] }
 0x31b   : > { %v2553_v15 = vld [vmem:[#allocation2 + $0x81] sm:$0xff]  ;;  %v2505_v49 = vpack.c.bf16 %v2497_v47, %v2497_v47 }
 0x31c   : > { %2688 = vrot.lane.b32.xlu0 %v2669_v46, %s3777_s20  ;;  %2686 = vrot.lane.b32.xlu2 %v4447_v57, %s3777_s20  ;;  %v2449_v57 = vpack.c.bf16 %v2441_v59, %v2441_v59  ;;  %v2561_v20 = vpack.c.bf16 %v2553_v15, %v2553_v15  ;;  %v2965_v15 = vld [vmem:[#allocation3 + $0x31] sm:$0xff] }
 0x31d   : > { %2632 = vrot.lane.b32.xlu1 %v2780_v34, %s3776_s19 }
 0x324   : > { %2412 = vrot.lane.b32.xlu0 %v2391_v1, %s3772_s11  ;;  %2410 = vrot.lane.b32.xlu2 %v2557_v37, %s3772_s11 }
 0x325   : > { %2742 = vrot.lane.b32.xlu1 %v2557_v37, %s3778_s21 }
 0x32c   : > { %2522 = vrot.lane.b32.xlu0 %v2669_v46, %s3774_s17  ;;  %2744 = vrot.lane.b32.xlu2 %v2391_v1, %s3778_s21 }
 0x32d   : > { %2466 = vrot.lane.b32.xlu1 %v2780_v34, %s3773_s12 }
 0x334   : > { %2580 = vrot.lane.b32.xlu0 %v2559_v36, %s3775_s18  ;;  %2468 = vrot.lane.b32.xlu2 %v2447_v41, %s3773_s12 }
 0x335   : > { %2800 = vrot.lane.b32.xlu1 %v2447_v41, %s3779_s22 }
 0x33c   : > { %2690 = vrot.lane.b32.xlu0 %v2670_v25, %s3777_s20  ;;  %2578 = vrot.lane.b32.xlu2 %v2391_v1, %s3775_s18 }
 0x33d   : > { %2634 = vrot.lane.b32.xlu1 %v2447_v41, %s3776_s19 }
 0x33e   : > { %v2461_v9 = vpop.permute.xlu2 %2460 }
 0x344   : > { %2414 = vrot.lane.b32.xlu0 %v2559_v36, %s3772_s11  ;;  %2636 = vrot.lane.b32.xlu2 %v2615_v43, %s3776_s19 }
 0x345   : > { %2524 = vrot.lane.b32.xlu1 %v2670_v25, %s3774_s17 }
 0x346   : > { %v2515_v54 = vpop.permute.xlu2 %2514 }
 0x347   : > { %2538 = vst.msk [vmem:[#allocation4] sm:$0xf] %vm578_vm5, %v2515_v54 }
 0x34c   : > { %2748 = vrot.lane.b32.xlu0 %v2727_v11, %s3778_s21  ;;  %2746 = vrot.lane.b32.xlu2 %v2559_v36, %s3778_s21 }
 0x34d   : > { %2802 = vrot.lane.b32.xlu1 %v2615_v43, %s3779_s22 }
 0x34e   : > { %v2573_v4 = vpop.permute.xlu2 %2572 }
 0x354   : > { %2472 = vrot.lane.b32.xlu0 %v2449_v57, %s3773_s12  ;;  %2470 = vrot.lane.b32.xlu2 %v2615_v43, %s3773_s12 }
 0x355   : > { %2692 = vrot.lane.b32.xlu1 %v4479_v3, %s3777_s20 }
 0x356   : > { %v2627_v5 = vpop.permute.xlu0 %2626  ;;  %v2683_v6 = vpop.permute.xlu2 %2682 }
 0x357   : > { %v2405_v7 = vpop.permute.xlu1 %2404 }
 0x358   : > { %2427 = vst.msk [vmem:[#allocation4 + $0x4] sm:$0xf] %vm464_vm3, %v2405_v7 }
 0x359   : > { %2483 = vst.msk [vmem:[#allocation4 + $0x4] sm:$0xf] %vm521_vm4, %v2461_v9 }
 0x35c   : > { %2582 = vrot.lane.b32.xlu0 %v2727_v11, %s3775_s18  ;;  %2804 = vrot.lane.b32.xlu2 %v2449_v57, %s3779_s22 }
 0x35d   : > { %2416 = vrot.lane.b32.xlu1 %v2727_v11, %s3772_s11 }
 0x35e   : > { %v2463_v29 = vpop.permute.xlu0 %2462  ;;  %v2409_v14 = vpop.permute.xlu2 %2408 }
 0x35f   : > { %2429 = vst.msk [vmem:[#allocation4 + $0xc] sm:$0xf] %vm464_vm3, %v2409_v14  ;;  %v2571_v44 = vpop.permute.xlu1 %2570 }
 0x360   : > { %2594 = vst.msk [vmem:[#allocation4] sm:$0xf] %vm635_vm7, %v2571_v44 }
 0x361   : > { %2650 = vst.msk [vmem:[#allocation4] sm:$0xf] %vm692_vm8, %v2627_v5 }
 0x362   : > { %2706 = vst.msk [vmem:[#allocation4] sm:$0xf] %vm750_vm9, %v2683_v6 }
 0x364   : > { %2640 = vrot.lane.b32.xlu0 %v2617_v58, %s3776_s19  ;;  %2638 = vrot.lane.b32.xlu2 %v2449_v57, %s3776_s19 }
 0x365   : > { %2526 = vrot.lane.b32.xlu1 %v4479_v3, %s3774_s17 }
 0x366   : > { %v2517_v39 = vpop.permute.xlu0 %2516  ;;  %v2519_v18 = vpop.permute.xlu2 %2518 }
 0x367   : > { %2539 = vst.msk [vmem:[#allocation4 + $0x4] sm:$0xf] %vm578_vm5, %v2517_v39  ;;  %v2407_v31 = vpop.permute.xlu1 %2406  ;;  %v2946_v39 = vstv %s3534_s14 }
 0x368   : > { %2595 = vst.msk [vmem:[#allocation4 + $0x4] sm:$0xf] %vm635_vm7, %v2573_v4 }
 0x369   : > { %2428 = vst.msk [vmem:[#allocation4 + $0x8] sm:$0xf] %vm464_vm3, %v2407_v31 }
 0x36a   : > { %2484 = vst.msk [vmem:[#allocation4 + $0x8] sm:$0xf] %vm521_vm4, %v2463_v29 }
 0x36b   : > { %2540 = vst.msk [vmem:[#allocation4 + $0x8] sm:$0xf] %vm578_vm5, %v2519_v18 }
 0x36c   : > { %2806 = vrot.lane.b32.xlu0 %v2617_v58, %s3779_s22  ;;  %2528 = vrot.lane.b32.xlu2 %v2505_v49, %s3774_s17 }
 0x36d   : > { %2584 = vrot.lane.b32.xlu1 %v2561_v20, %s3775_s18 }
 0x36e   : > { %v2631_v46 = vpop.permute.xlu0 %2630  ;;  %v2577_v60 = vpop.permute.xlu2 %2576 }
 0x36f   : > { %v2629_v62 = vpop.permute.xlu1 %2628 }
 0x370   : > { %2651 = vst.msk [vmem:[#allocation4 + $0x4] sm:$0xf] %vm692_vm8, %v2629_v62 }
 0x374   : > { %2794 = vrot.lane.b32.xlu0 %v4415_v19, %s3779_s22  ;;  %2750 = vrot.lane.b32.xlu2 %v2561_v20, %s3778_s21 }
 0x375   : > { %2694 = vrot.lane.b32.xlu1 %v2505_v49, %s3777_s20 }
 0x376   : > { %v2685_v21 = vpop.permute.xlu0 %2684  ;;  %v2687_v10 = vpop.permute.xlu2 %2686 }
 0x377   : > { %2707 = vst.msk [vmem:[#allocation4 + $0x4] sm:$0xf] %vm750_vm9, %v2685_v21  ;;  %v2739_v22 = vpop.permute.xlu1 %2738  ;;  %v2966_v21 = vld [vmem:[#allocation3 + $0x41] sm:$0xff] }
 0x378   : > { %2762 = vst.msk [vmem:[#allocation4] sm:$0xf] %vm807_vm10, %v2739_v22 }
 0x37c   : > { %2740 = vrot.lane.b32.xlu2 %v4460_v48, %s3778_s21 }
 0x37d   : > { %2796 = vrot.lane.b32.xlu1 %v4445_v50, %s3779_s22  ;;  %v3697_v50 = vld [vmem:[%s4647_s6 + $0x10] sm:$0xff] }
 0x37e   : > { %v2521_v63 = vpop.permute.xlu0 %2520  ;;  %v2411_v23 = vpop.permute.xlu2 %2410  ;;  %3709 = vmatpush.bf16.msra.mxu2 %v3697_v50  ;;  %2914 = vmatpush.bf16.msrb.mxu1 %v3697_v50 }
 0x37f   : > { %2430 = vst.msk [vmem:[#allocation4 + $0x10] sm:$0xf] %vm464_vm3, %v2411_v23  ;;  %v2465_v19 = vpop.permute.xlu1 %2464 }
 0x380   : > { %2485 = vst.msk [vmem:[#allocation4 + $0xc] sm:$0xf] %vm521_vm4, %v2465_v19 }
 0x381   : > { %2541 = vst.msk [vmem:[#allocation4 + $0xc] sm:$0xf] %vm578_vm5, %v2521_v63 }
 0x382   : > { %2597 = vst.msk [vmem:[#allocation4 + $0xc] sm:$0xf] %vm635_vm7, %v2577_v60  ;;  %3710 = vmatpush.bf16.msra.mxu2 %v3696_v24  ;;  %2915 = vmatpush.bf16.msrb.mxu1 %v3696_v24 }
 0x386   : > { %v2799_v48 = vpop.permute.xlu0 %2798  ;;  %v2745_v8 = vpop.permute.xlu2 %2744  ;;  %3711 = vmatpush.bf16.msra.mxu2 %v3695_v52  ;;  %2916 = vmatpush.bf16.msrb.mxu1 %v3695_v52  ;;  %v2968_v52 = vld [vmem:[#allocation3 + $0x61] sm:$0xff] }
 0x387   : > { %v2575_v35 = vpop.permute.xlu1 %2574 }
 0x388   : > { %2596 = vst.msk [vmem:[#allocation4 + $0x8] sm:$0xf] %vm635_vm7, %v2575_v35 }
 0x389   : > { %2652 = vst.msk [vmem:[#allocation4 + $0x8] sm:$0xf] %vm692_vm8, %v2631_v46 }
 0x38a   : > { %2708 = vst.msk [vmem:[#allocation4 + $0x8] sm:$0xf] %vm750_vm9, %v2687_v10 }
 0x38e   : > { %v2689_v45 = vpop.permute.xlu0 %2688  ;;  %v2469_v25 = vpop.permute.xlu2 %2468 }
 0x38f   : > { %v2633_v26 = vpop.permute.xlu1 %2632 }
 0x390   : > { %2653 = vst.msk [vmem:[#allocation4 + $0xc] sm:$0xf] %vm692_vm8, %v2633_v26 }
 0x391   : > { %2709 = vst.msk [vmem:[#allocation4 + $0xc] sm:$0xf] %vm750_vm9, %v2689_v45 }
 0x392   : > { %2765 = vst.msk [vmem:[#allocation4 + $0xc] sm:$0xf] %vm807_vm10, %v2745_v8 }
 0x396   : > { %v2413_v27 = vpop.permute.xlu0 %2412  ;;  %v2579_v28 = vpop.permute.xlu2 %2578 }
 0x397   : > { %2431 = vst.msk [vmem:[#allocation4 + $0x14] sm:$0xf] %vm464_vm3, %v2413_v27  ;;  %v2743_v55 = vpop.permute.xlu1 %2742 }
 0x398   : > { %2487 = vst.msk [vmem:[#allocation4 + $0x14] sm:$0xf] %vm521_vm4, %v2469_v25 }
 0x399   : > { %2764 = vst.msk [vmem:[#allocation4 + $0x8] sm:$0xf] %vm807_vm10, %v2743_v55 }
 0x39a   : > { %2820 = vst.msk [vmem:[#allocation4 + $0x8] sm:$0xf] %vm864_vm11, %v2799_v48 }
 0x39e   : > { %v2523_v32 = vpop.permute.xlu0 %2522  ;;  %v2637_v33 = vpop.permute.xlu2 %2636 }
 0x39f   : > { %v2467_v53 = vpop.permute.xlu1 %2466 }
 0x3a0   : > { %2486 = vst.msk [vmem:[#allocation4 + $0x10] sm:$0xf] %vm521_vm4, %v2467_v53  ;;  %v2963_v53 = vld [vmem:[#allocation3 + $0x11] sm:$0xff] }
 0x3a1   : > { %2542 = vst.msk [vmem:[#allocation4 + $0x10] sm:$0xf] %vm578_vm5, %v2523_v32 }
 0x3a2   : > { %2598 = vst.msk [vmem:[#allocation4 + $0x10] sm:$0xf] %vm635_vm7, %v2579_v28 }
 0x3a6   : > { %v2581_v0 = vpop.permute.xlu0 %2580  ;;  %v2747_v34 = vpop.permute.xlu2 %2746 }
 0x3a7   : > { %v2801_v37 = vpop.permute.xlu1 %2800 }
 0x3a8   : > { %2821 = vst.msk [vmem:[#allocation4 + $0xc] sm:$0xf] %vm864_vm11, %v2801_v37 }
 0x3ae   : > { %v2691_v3 = vpop.permute.xlu0 %2690  ;;  %v2471_v17 = vpop.permute.xlu2 %2470 }
 0x3af   : > { %v2635_v1 = vpop.permute.xlu1 %2634  ;;  %v3692_v30 = vld [vmem:[#allocation4 + $0x8] sm:$0xff] }
 0x3b0   : > { %2654 = vst.msk [vmem:[#allocation4 + $0x10] sm:$0xf] %vm692_vm8, %v2635_v1  ;;  %3568 = vmatmul.msk.bf16.vlgmr.msra.gmra.mxu2 %vm941_vm12, %v3692_v30 }
 0x3b1   : > { %2710 = vst.msk [vmem:[#allocation4 + $0x10] sm:$0xf] %vm750_vm9, %v2691_v3 }
 0x3b2   : > { %2766 = vst.msk [vmem:[#allocation4 + $0x10] sm:$0xf] %vm807_vm10, %v2747_v34  ;;  %v2969_v34 = vld [vmem:[#allocation3 + $0x71] sm:$0xff] }
 0x3b6   : > { %v2415_v2 = vpop.permute.xlu0 %2414  ;;  %v2805_v16 = vpop.permute.xlu2 %2804 }
 0x3b7   : > { %2432 = vst.msk [vmem:[#allocation4 + $0x18] sm:$0xf] %vm464_vm3, %v2415_v2  ;;  %v2525_v40 = vpop.permute.xlu1 %2524 }
 0x3b8   : > { %2488 = vst.msk [vmem:[#allocation4 + $0x18] sm:$0xf] %vm521_vm4, %v2471_v17 }
 0x3b9   : > { %2543 = vst.msk [vmem:[#allocation4 + $0x14] sm:$0xf] %vm578_vm5, %v2525_v40 }
 0x3ba   : > { %2599 = vst.msk [vmem:[#allocation4 + $0x14] sm:$0xf] %vm635_vm7, %v2581_v0 }
 0x3bb   : > { %2655 = vst.msk [vmem:[#allocation4 + $0x14] sm:$0xf] %vm692_vm8, %v2637_v33 }
 0x3be   : > { %v2749_v36 = vpop.permute.xlu0 %2748  ;;  %v2639_v41 = vpop.permute.xlu2 %2638 }
 0x3bf   : > { %v2803_v9 = vpop.permute.xlu1 %2802 }
 0x3c0   : > { %2822 = vst.msk [vmem:[#allocation4 + $0x10] sm:$0xf] %vm864_vm11, %v2803_v9 }
 0x3c6   : > { %v2473_v42 = vpop.permute.xlu0 %2472  ;;  %v2529_v43 = vpop.permute.xlu2 %2528 }
 0x3c7   : > { %v2693_v54 = vpop.permute.xlu1 %2692 }
 0x3c8   : > { %2711 = vst.msk [vmem:[#allocation4 + $0x14] sm:$0xf] %vm750_vm9, %v2693_v54 }
 0x3c9   : > { %2767 = vst.msk [vmem:[#allocation4 + $0x14] sm:$0xf] %vm807_vm10, %v2749_v36 }
 0x3ca   : > { %2823 = vst.msk [vmem:[#allocation4 + $0x14] sm:$0xf] %vm864_vm11, %v2805_v16 }
 0x3ce   : > { %v2583_v56 = vpop.permute.xlu0 %2582  ;;  %v2751_v11 = vpop.permute.xlu2 %2750 }
 0x3cf   : > { %v2417_v4 = vpop.permute.xlu1 %2416 }
 0x3d0   : > { %2433 = vst.msk [vmem:[#allocation4 + $0x1c] sm:$0xf] %vm464_vm3, %v2417_v4 }
 0x3d1   : > { %2489 = vst.msk [vmem:[#allocation4 + $0x1c] sm:$0xf] %vm521_vm4, %v2473_v42  ;;  %v3693_v59 = vld [vmem:[#allocation4 + $0x10] sm:$0xff]  ;;  %v2970_v42 = vld [vmem:[#allocation3 + $0x81] sm:$0xff] }
 0x3d2   : > { %2545 = vst.msk [vmem:[#allocation4 + $0x1c] sm:$0xf] %vm578_vm5, %v2529_v43  ;;  %3569 = vmatmul.msk.bf16.gmra.mxu2 %vm941_vm12, %v3693_v59 }
 0x3d6   : > { %v2641_v57 = vpop.permute.xlu0 %2640  ;;  %v2741_v5 = vpop.permute.xlu2 %2740 }
 0x3d7   : > { %2763 = vst.msk [vmem:[#allocation4 + $0x4] sm:$0xf] %vm807_vm10, %v2741_v5  ;;  %v2527_v6 = vpop.permute.xlu1 %2526 }
 0x3d8   : > { %2544 = vst.msk [vmem:[#allocation4 + $0x18] sm:$0xf] %vm578_vm5, %v2527_v6 }
 0x3d9   : > { %2600 = vst.msk [vmem:[#allocation4 + $0x18] sm:$0xf] %vm635_vm7, %v2583_v56 }
 0x3da   : > { %2656 = vst.msk [vmem:[#allocation4 + $0x18] sm:$0xf] %vm692_vm8, %v2639_v41  ;;  %v2964_v41 = vld [vmem:[#allocation3 + $0x21] sm:$0xff] }
 0x3de   : > { %v2807_v7 = vpop.permute.xlu0 %2806 }
 0x3df   : > { %v2585_v29 = vpop.permute.xlu1 %2584 }
 0x3e0   : > { %2601 = vst.msk [vmem:[#allocation4 + $0x1c] sm:$0xf] %vm635_vm7, %v2585_v29 }
 0x3e1   : > { %2657 = vst.msk [vmem:[#allocation4 + $0x1c] sm:$0xf] %vm692_vm8, %v2641_v57 }
 0x3e2   : > { %2713 = vst.msk [vmem:[#allocation4 + $0x1c] sm:$0xf] %vm750_vm9, %v4501_v51 }
 0x3e3   : > { %2769 = vst.msk [vmem:[#allocation4 + $0x1c] sm:$0xf] %vm807_vm10, %v4513_v12 }
 0x3e4   : > { %2825 = vst.msk [vmem:[#allocation4 + $0x1c] sm:$0xf] %vm864_vm11, %v4516_v13  ;;  %v3742_v13 = vld [vmem:[%s4648_s7] ss:$0 sm:$0xff] }
 0x3e6   : > { %v2795_v14 = vpop.permute.xlu0 %2794 }
 0x3e7   : > { %2818 = vst.msk [vmem:[#allocation4] sm:$0xf] %vm864_vm11, %v2795_v14  ;;  %v2695_v44 = vpop.permute.xlu1 %2694 }
 0x3e8   : > { %2712 = vst.msk [vmem:[#allocation4 + $0x18] sm:$0xf] %vm750_vm9, %v2695_v44 }
 0x3e9   : > { %2768 = vst.msk [vmem:[#allocation4 + $0x18] sm:$0xf] %vm807_vm10, %v2751_v11 }
 0x3ea   : > { %2824 = vst.msk [vmem:[#allocation4 + $0x18] sm:$0xf] %vm864_vm11, %v2807_v7 }
 0x3ef   : > { %v2797_v38 = vpop.permute.xlu1 %2796 }
 0x3f0   : > { %2819 = vst.msk [vmem:[#allocation4 + $0x4] sm:$0xf] %vm864_vm11, %v2797_v38 }
 0x3f1   : > { %v3694_v51 = vld [vmem:[#allocation4 + $0x18] sm:$0xff] }
 0x3f2   : > { %3570 = vmatmul.msk.bf16.gmra.mxu2 %vm941_vm12, %v3694_v51 }
 0x3f7   : > { %v3691_v12 = vld [vmem:[#allocation4] sm:$0xff] }
 0x3f8   : > { %3567 = vmatmul.msk.bf16.vlgmr.msrb.gmra.mxu1 %vm941_vm12, %v3691_v12 }
 0x433   : > { %v2923_v58 = vpop.f32.mrf.mxu2 }
 0x434   : > { %v2924_v18 = vadd.f32 %v3742_v13, %v2923_v58 }
 0x436   : > { %vm2940_vm0 = vcmp.ge.f32.partialorder %v2924_v18, 0.0  ;;  %v2949_v31 = vmul.f32 %v2946_v39, %v2924_v18 }
 0x438   : > { %v2957_v47 = vsel %vm2940_vm0, %v2924_v18, %v2949_v31 }
 0x439   : > { %v2973_v49 = vadd.f32 %v2965_v15, %v2957_v47 }
 0x43b   : > { %2981 = vst [vmem:[%s4628_s25 + $0x10] sm:$0xff] %v2973_v49  ;;  %v2925_v20 = vpop.f32.mrf.mxu2 }
 0x43c   : > { %v2926_v46 = vadd.f32 %v3742_v13, %v2925_v20 }
 0x43e   : > { %vm2941_vm2 = vcmp.ge.f32.partialorder %v2926_v46, 0.0  ;;  %v2950_v60 = vmul.f32 %v2946_v39, %v2926_v46 }
 0x440   : > { %v2958_v62 = vsel %vm2941_vm2, %v2926_v46, %v2950_v60 }
 0x441   : > { %v2974_v10 = vadd.f32 %v2966_v21, %v2958_v62 }
 0x443   : > { %2982 = vst [vmem:[%s4628_s25 + $0x18] sm:$0xff] %v2974_v10 }
 0x455   : > { %v2928_v22 = vpop.f32.mrf.mxu2 }
 0x456   : > { %v2929_v63 = vadd.f32 %v3742_v13, %v2928_v22 }
 0x458   : > { %vm2942_vm3 = vcmp.ge.f32.partialorder %v2929_v63, 0.0  ;;  %v2951_v23 = vmul.f32 %v2946_v39, %v2929_v63 }
 0x45a   : > { %v2959_v19 = vsel %vm2942_vm3, %v2929_v63, %v2951_v23 }
 0x45b   : > { %v2975_v50 = vadd.f32 %v2967_v61, %v2959_v19 }
 0x45d   : > { %2983 = vst [vmem:[%s4628_s25 + $0x20] sm:$0xff] %v2975_v50  ;;  %v2930_v48 = vpop.f32.mrf.mxu2 }
 0x45e   : > { %v2931_v8 = vadd.f32 %v3742_v13, %v2930_v48 }
 0x460   : > { %vm2943_vm4 = vcmp.ge.f32.partialorder %v2931_v8, 0.0  ;;  %v2952_v35 = vmul.f32 %v2946_v39, %v2931_v8 }
 0x462   : > { %v2960_v24 = vsel %vm2943_vm4, %v2931_v8, %v2952_v35 }
 0x463   : > { %v2976_v45 = vadd.f32 %v2968_v52, %v2960_v24 }
 0x465   : > { %2984 = vst [vmem:[%s4628_s25 + $0x28] sm:$0xff] %v2976_v45 }
 0x475   : > { %v2918_v25 = vpop.f32.mrf.mxu1  ;;  %v2933_v26 = vpop.f32.mrf.mxu2 }
 0x476   : > { %v2919_v27 = vadd.f32 %v3742_v13, %v2918_v25  ;;  %v2934_v28 = vadd.f32 %v3742_v13, %v2933_v26 }
 0x478   : > { %vm2938_vm5 = vcmp.ge.f32.partialorder %v2919_v27, 0.0  ;;  %v2947_v55 = vmul.f32 %v2946_v39, %v2919_v27  ;;  %vm2944_vm7 = vcmp.ge.f32.partialorder %v2934_v28, 0.0  ;;  %v2953_v32 = vmul.f32 %v2946_v39, %v2934_v28 }
 0x47a   : > { %v2955_v33 = vsel %vm2938_vm5, %v2919_v27, %v2947_v55  ;;  %v2961_v0 = vsel %vm2944_vm7, %v2934_v28, %v2953_v32 }
 0x47b   : > { %v2971_v37 = vadd.f32 %v2963_v53, %v2955_v33  ;;  %v2977_v3 = vadd.f32 %v2969_v34, %v2961_v0 }
 0x47d   : > { %2979 = vst [vmem:[%s4628_s25] sm:$0xff] %v2971_v37  ;;  %v2920_v17 = vpop.f32.mrf.mxu1  ;;  %v2935_v1 = vpop.f32.mrf.mxu2 }
 0x47e   : > { %2985 = vst [vmem:[%s4628_s25 + $0x30] sm:$0xff] %v2977_v3  ;;  %v2921_v30 = vadd.f32 %v3742_v13, %v2920_v17  ;;  %v2936_v2 = vadd.f32 %v3742_v13, %v2935_v1 }
 0x480   : > { %vm2939_vm8 = vcmp.ge.f32.partialorder %v2921_v30, 0.0  ;;  %v2948_v16 = vmul.f32 %v2946_v39, %v2921_v30  ;;  %vm2945_vm9 = vcmp.ge.f32.partialorder %v2936_v2, 0.0  ;;  %v2954_v40 = vmul.f32 %v2946_v39, %v2936_v2 }
 0x482   : > { %v2956_v36 = vsel %vm2939_vm8, %v2921_v30, %v2948_v16  ;;  %v2962_v9 = vsel %vm2945_vm9, %v2936_v2, %v2954_v40 }
 0x483   : > { %v2972_v43 = vadd.f32 %v2964_v41, %v2956_v36  ;;  %v2978_v54 = vadd.f32 %v2970_v42, %v2962_v9 }
 0x485   : > { %2980 = vst [vmem:[%s4628_s25 + $0x8] sm:$0xff] %v2972_v43 }
 0x486   : > { %2986 = vst [vmem:[%s4628_s25 + $0x38] sm:$0xff] %v2978_v54 }
 0x487 PF: > { %s19_s27 = sadd.s32 1, %s3768_s27  }
 0x488   : > { %p16_p7 = scmp.ge.s32.totalorder %s19_s27, 4  }
 0x48a   :  { %18 = sbr.rel (!%p16_p7) target bundleno = 1 (0x1), region = 93 }
 0x48f   :  { %3008 = vsyncpa [#allocation7], 1 }
 0x490   :  { %3010 = vsyncpa [#allocation7 + $0x1], 1 }

</bundles_post_ra>
